<compile_context>
chip_gen: v6e
topology: v6e:2x2x1
jax: 0.10.0
libtpu: 0.0.40
codegen_flags: <defaults>
</compile_context>

<pallas_src>
import functools

import jax
import jax.numpy as jnp
from jax.experimental import pallas as pl
from jax.experimental.pallas import tpu as pltpu  # noqa: F401  (TPU backend registration)

D_MODEL = 32
NUM_HEADS = 4
HEAD_DIM = D_MODEL // NUM_HEADS
# TODO(synk): the FFN class body is not given in the source; assuming the standard
# transformer FFN (Linear d->4d, ReLU, Linear 4d->d, biases).
FFN_HIDDEN = 4 * D_MODEL
LN_EPS = 1e-5


# ------------------------------- the fused kernel -------------------------------

def _block_kernel(img_ref, prm_ref, orig_ref, pos_ref, mask_i_ref, mask_p_ref,
                  # CrossAttention2 (queries = images, kv = prompts) + LN3
                  wq2_ref, bq2_ref, wkv2_ref, bkv2_ref, wo2_ref, bo2_ref, g3_ref, be3_ref,
                  # FFN2 + LN4
                  w12_ref, b12_ref, w22_ref, b22_ref, g4_ref, be4_ref,
                  # CrossAttention1 (queries = prompts, kv = images) + LN1
                  wq1_ref, bq1_ref, wkv1_ref, bkv1_ref, wo1_ref, bo1_ref, g1_ref, be1_ref,
                  # FFN1 + LN2
                  w11_ref, b11_ref, w21_ref, b21_ref, g2_ref, be2_ref,
                  # outputs
                  img_out_ref, prm_out_ref,
                  *, num_heads, head_dim, scale, add_pos):
    d = num_heads * head_dim

    def layernorm(z, g_ref, b_ref):
        mu = jnp.mean(z, axis=-1, keepdims=True)
        var = jnp.mean((z - mu) ** 2, axis=-1, keepdims=True)
        return (z - mu) * jax.lax.rsqrt(var + LN_EPS) * g_ref[...] + b_ref[...]

    def mhca(x_rows, kv_rows, mask, wq_ref, bq_ref, wkv_ref, bkv_ref, wo_ref, bo_ref):
        # x_rows: (Rq, D), kv_rows: (Rk, D), mask: (Rq, Rk) additive block-diag mask.
        q = jnp.dot(x_rows, wq_ref[...], preferred_element_type=jnp.float32) + bq_ref[...]
        kvp = jnp.dot(kv_rows, wkv_ref[...], preferred_element_type=jnp.float32) + bkv_ref[...]
        wo = wo_ref[...]
        out = None
        for h in range(num_heads):                       # static unrolled (4 heads)
            lo = h * head_dim
            qh = q[:, lo:lo + head_dim]                  # (Rq, dh)
            kh = kvp[:, lo:lo + head_dim]                # (Rk, dh)
            vh = kvp[:, d + lo:d + lo + head_dim]        # (Rk, dh)
            # scores without any transpose: contract the head dim of both operands.
            s = jax.lax.dot_general(qh, kh, (((1,), (1,)), ((), ())),
                                    preferred_element_type=jnp.float32) * scale + mask
            m = jnp.max(s, axis=-1, keepdims=True)
            p = jnp.exp(s - m)
            p = p * pl.reciprocal(jnp.sum(p, axis=-1, keepdims=True), approx=True)
            hv = jnp.dot(p, vh, preferred_element_type=jnp.float32)               # (Rq, dh)
            contrib = jnp.dot(hv, wo[lo:lo + head_dim, :],
                              preferred_element_type=jnp.float32)                 # (Rq, D)
            out = contrib if out is None else out + contrib
        return out + bo_ref[...]

    def ffn(x_rows, w1_ref, b1_ref, w2_ref, b2_ref):
        h = jnp.dot(x_rows, w1_ref[...], preferred_element_type=jnp.float32) + b1_ref[...]
        h = jnp.maximum(h, 0.0)
        return jnp.dot(h, w2_ref[...], preferred_element_type=jnp.float32) + b2_ref[...]

    img = img_ref[...].astype(jnp.float32)               # (B*S_img, D)
    prm = prm_ref[...].astype(jnp.float32)               # (B*S_prm, D)

    # Stage 1: images = LN3(images + MHCA2(images, prompts))
    attn2 = mhca(img, prm, mask_i_ref[...],
                 wq2_ref, bq2_ref, wkv2_ref, bkv2_ref, wo2_ref, bo2_ref)
    img = layernorm(img + attn2, g3_ref, be3_ref)

    # Stage 2: images = LN4(images + (FFN2(images) [+ pos]))
    f = ffn(img, w12_ref, b12_ref, w22_ref, b22_ref)
    if add_pos:
        f = f + pos_ref[...].astype(jnp.float32)
    img = layernorm(img + f, g4_ref, be4_ref)

    # Stage 3: prompts = LN1(prompts + MHCA1(prompts, images))
    attn1 = mhca(prm, img, mask_p_ref[...],
                 wq1_ref, bq1_ref, wkv1_ref, bkv1_ref, wo1_ref, bo1_ref)
    prm = layernorm(prm + attn1, g1_ref, be1_ref)

    # Stage 4: prompts = LN2(prompts + FFN1(prompts))
    prm = layernorm(prm + ffn(prm, w11_ref, b11_ref, w21_ref, b21_ref), g2_ref, be2_ref)

    # Stage 5: prompts_output = prompts + original_prompts   (fused epilogue)
    prm = prm + orig_ref[...].astype(jnp.float32)

    img_out_ref[...] = img.astype(img_out_ref.dtype)
    prm_out_ref[...] = prm.astype(prm_out_ref.dtype)


# ------------------------------- wrapper -------------------------------

def _block_diag_mask(batch, sq, sk, dtype=jnp.float32):
    """(B*sq, B*sk) additive mask: 0 within a batch element, -1e30 across."""
    rb = jnp.repeat(jnp.arange(batch, dtype=jnp.int32), sq)
    cb = jnp.repeat(jnp.arange(batch, dtype=jnp.int32), sk)
    return jnp.where(rb[:, None] == cb[None, :], 0.0, -1e30).astype(dtype)


def cross_attention_block(prep, images, prompts_input, original_prompts,
                          pos_encodings, add_pos=True):
    """Forward pass of CrossAttentionBlock — one pallas_call (eval semantics)."""
    B, s_img, D = images.shape
    s_prm = prompts_input.shape[1]

    img2 = images.reshape(B * s_img, D)
    prm2 = prompts_input.reshape(B * s_prm, D)
    org2 = original_prompts.reshape(B * s_prm, D)
    pos2 = pos_encodings.reshape(B * s_img, D)
    mask_i = _block_diag_mask(B, s_img, s_prm)   # stage-1 attention (img queries)
    mask_p = _block_diag_mask(B, s_prm, s_img)   # stage-3 attention (prompt queries)

    kernel = functools.partial(_block_kernel, num_heads=NUM_HEADS, head_dim=HEAD_DIM,
                               scale=1.0 / (HEAD_DIM ** 0.5), add_pos=add_pos)

    img_out, prm_out = pl.pallas_call(
        kernel,
        out_shape=(jax.ShapeDtypeStruct((B * s_img, D), images.dtype),
                   jax.ShapeDtypeStruct((B * s_prm, D), prompts_input.dtype)),
    )(img2, prm2, org2, pos2, mask_i, mask_p, *prep)

    return img_out.reshape(B, s_img, D), prm_out.reshape(B, s_prm, D)


# -------------------- one-time parameter preparation (hoisted folding) --------------------

def prepare_params(p):
    """Fold the bias-free pre-projections into the MHA in-projections, concat K|V,
    and pre-reshape all 1-D vectors to (1, D).  Done once, outside the forward path."""
    def fold_mhca(m):
        wq = m["w_q"] @ m["in_q_w"]                        # (x@A)@B == x@(A@B), exact
        wk = m["w_k"] @ m["in_k_w"]
        wv = m["w_v"] @ m["in_v_w"]
        return (wq, m["in_q_b"].reshape(1, -1),
                jnp.concatenate([wk, wv], axis=1),          # (D, 2D)
                jnp.concatenate([m["in_k_b"], m["in_v_b"]]).reshape(1, -1),
                m["out_w"], m["out_b"].reshape(1, -1))

    def ffn_w(f):
        return (f["w1"], f["b1"].reshape(1, -1), f["w2"], f["b2"].reshape(1, -1))

    def ln(g, b):
        return (g.reshape(1, -1), b.reshape(1, -1))

    return (*fold_mhca(p["ca2"]), *ln(p["ln3_g"], p["ln3_b"]),
            *ffn_w(p["ffn2"]),    *ln(p["ln4_g"], p["ln4_b"]),
            *fold_mhca(p["ca1"]), *ln(p["ln1_g"], p["ln1_b"]),
            *ffn_w(p["ffn1"]),    *ln(p["ln2_g"], p["ln2_b"]))


# ------------------------------- parameter init -------------------------------

def init_params(key):
    keys = iter(jax.random.split(key, 64))

    def w(shape, scale=0.05):
        return scale * jax.random.normal(next(keys), shape, jnp.float32)

    def mhca_params():
        return dict(
            w_q=w((D_MODEL, D_MODEL)), w_k=w((D_MODEL, D_MODEL)), w_v=w((D_MODEL, D_MODEL)),
            in_q_w=w((D_MODEL, D_MODEL)), in_q_b=w((D_MODEL,)),
            in_k_w=w((D_MODEL, D_MODEL)), in_k_b=w((D_MODEL,)),
            in_v_w=w((D_MODEL, D_MODEL)), in_v_b=w((D_MODEL,)),
            out_w=w((D_MODEL, D_MODEL)), out_b=w((D_MODEL,)),
        )

    def ffn_params():
        return dict(w1=w((D_MODEL, FFN_HIDDEN)), b1=w((FFN_HIDDEN,)),
                    w2=w((FFN_HIDDEN, D_MODEL)), b2=w((D_MODEL,)))

    return dict(
        ca1=mhca_params(), ca2=mhca_params(),
        ffn1=ffn_params(), ffn2=ffn_params(),
        ln1_g=jnp.ones((D_MODEL,), jnp.float32), ln1_b=jnp.zeros((D_MODEL,), jnp.float32),
        ln2_g=jnp.ones((D_MODEL,), jnp.float32), ln2_b=jnp.zeros((D_MODEL,), jnp.float32),
        ln3_g=jnp.ones((D_MODEL,), jnp.float32), ln3_b=jnp.zeros((D_MODEL,), jnp.float32),
        ln4_g=jnp.ones((D_MODEL,), jnp.float32), ln4_b=jnp.zeros((D_MODEL,), jnp.float32),
    )


if __name__ == "__main__":
    key = jax.random.PRNGKey(0)
    kp, k1, k2, k3, k4 = jax.random.split(key, 5)
    params = init_params(kp)
    prep = prepare_params(params)          # weight folding hoisted out of the forward

    B, N_IMG, N_PROMPT = 2, 16, 8
    images = jax.random.normal(k1, (B, N_IMG, D_MODEL), jnp.float32)
    prompts_input = jax.random.normal(k2, (B, N_PROMPT, D_MODEL), jnp.float32)
    original_prompts = jax.random.normal(k3, (B, N_PROMPT, D_MODEL), jnp.float32)
    pos_encodings = jax.random.normal(k4, (B, N_IMG, D_MODEL), jnp.float32)

    fwd = jax.jit(functools.partial(cross_attention_block, add_pos=True))
    img_out, prompt_out = fwd(prep, images, prompts_input, original_prompts, pos_encodings)
    jax.block_until_ready((img_out, prompt_out))

    assert img_out.shape == (B, N_IMG, D_MODEL)
    assert prompt_out.shape == (B, N_PROMPT, D_MODEL)
    print("KERNEL_OK")
</pallas_src>

<mosaic_0001>
module attributes {stable_mosaic.version = 11 : i64} {
  func.func @_block_kernel(%arg0: memref<32x32xf32, #tpu.memory_space<vmem>>, %arg1: memref<16x32xf32, #tpu.memory_space<vmem>>, %arg2: memref<16x32xf32, #tpu.memory_space<vmem>>, %arg3: memref<32x32xf32, #tpu.memory_space<vmem>>, %arg4: memref<32x16xf32, #tpu.memory_space<vmem>>, %arg5: memref<16x32xf32, #tpu.memory_space<vmem>>, %arg6: memref<32x32xf32, #tpu.memory_space<vmem>>, %arg7: memref<1x32xf32, #tpu.memory_space<vmem>>, %arg8: memref<32x64xf32, #tpu.memory_space<vmem>>, %arg9: memref<1x64xf32, #tpu.memory_space<vmem>>, %arg10: memref<32x32xf32, #tpu.memory_space<vmem>>, %arg11: memref<1x32xf32, #tpu.memory_space<vmem>>, %arg12: memref<1x32xf32, #tpu.memory_space<vmem>>, %arg13: memref<1x32xf32, #tpu.memory_space<vmem>>, %arg14: memref<32x128xf32, #tpu.memory_space<vmem>>, %arg15: memref<1x128xf32, #tpu.memory_space<vmem>>, %arg16: memref<128x32xf32, #tpu.memory_space<vmem>>, %arg17: memref<1x32xf32, #tpu.memory_space<vmem>>, %arg18: memref<1x32xf32, #tpu.memory_space<vmem>>, %arg19: memref<1x32xf32, #tpu.memory_space<vmem>>, %arg20: memref<32x32xf32, #tpu.memory_space<vmem>>, %arg21: memref<1x32xf32, #tpu.memory_space<vmem>>, %arg22: memref<32x64xf32, #tpu.memory_space<vmem>>, %arg23: memref<1x64xf32, #tpu.memory_space<vmem>>, %arg24: memref<32x32xf32, #tpu.memory_space<vmem>>, %arg25: memref<1x32xf32, #tpu.memory_space<vmem>>, %arg26: memref<1x32xf32, #tpu.memory_space<vmem>>, %arg27: memref<1x32xf32, #tpu.memory_space<vmem>>, %arg28: memref<32x128xf32, #tpu.memory_space<vmem>>, %arg29: memref<1x128xf32, #tpu.memory_space<vmem>>, %arg30: memref<128x32xf32, #tpu.memory_space<vmem>>, %arg31: memref<1x32xf32, #tpu.memory_space<vmem>>, %arg32: memref<1x32xf32, #tpu.memory_space<vmem>>, %arg33: memref<1x32xf32, #tpu.memory_space<vmem>>, %arg34: memref<32x32xf32, #tpu.memory_space<vmem>>, %arg35: memref<16x32xf32, #tpu.memory_space<vmem>>) attributes {dimension_semantics = [], scalar_prefetch = 0 : i64, scratch_operands = 0 : i64, tpu.core_type = #tpu.core_type<tc>} {
    %c0 = arith.constant 0 : index
    %c0_0 = arith.constant 0 : index
    %0 = vector.load %arg0[%c0, %c0_0] : memref<32x32xf32, #tpu.memory_space<vmem>>, vector<32x32xf32>
    %c0_1 = arith.constant 0 : index
    %c0_2 = arith.constant 0 : index
    %1 = vector.load %arg1[%c0_1, %c0_2] : memref<16x32xf32, #tpu.memory_space<vmem>>, vector<16x32xf32>
    %c0_3 = arith.constant 0 : index
    %c0_4 = arith.constant 0 : index
    %2 = vector.load %arg4[%c0_3, %c0_4] : memref<32x16xf32, #tpu.memory_space<vmem>>, vector<32x16xf32>
    %c0_5 = arith.constant 0 : index
    %c0_6 = arith.constant 0 : index
    %3 = vector.load %arg6[%c0_5, %c0_6] : memref<32x32xf32, #tpu.memory_space<vmem>>, vector<32x32xf32>
    %cst = arith.constant dense<0.000000e+00> : vector<32x32xf32>
    %4 = tpu.matmul %0, %3, %cst {dimension_numbers = #tpu.dot_dimension_numbers<[1], [0], [0], [1], [0, 0, 1, 1], [], []>} : vector<32x32xf32>, vector<32x32xf32>, vector<32x32xf32> -> vector<32x32xf32>
    %c0_7 = arith.constant 0 : index
    %c0_8 = arith.constant 0 : index
    %5 = vector.load %arg7[%c0_7, %c0_8] : memref<1x32xf32, #tpu.memory_space<vmem>>, vector<1x32xf32>
    %6 = vector.broadcast %5 : vector<1x32xf32> to vector<32x32xf32>
    %7 = arith.addf %4, %6 : vector<32x32xf32>
    %c0_9 = arith.constant 0 : index
    %c0_10 = arith.constant 0 : index
    %8 = vector.load %arg8[%c0_9, %c0_10] : memref<32x64xf32, #tpu.memory_space<vmem>>, vector<32x64xf32>
    %cst_11 = arith.constant dense<0.000000e+00> : vector<16x64xf32>
    %9 = tpu.matmul %1, %8, %cst_11 {dimension_numbers = #tpu.dot_dimension_numbers<[1], [0], [0], [1], [0, 0, 1, 1], [], []>} : vector<16x32xf32>, vector<32x64xf32>, vector<16x64xf32> -> vector<16x64xf32>
    %c0_12 = arith.constant 0 : index
    %c0_13 = arith.constant 0 : index
    %10 = vector.load %arg9[%c0_12, %c0_13] : memref<1x64xf32, #tpu.memory_space<vmem>>, vector<1x64xf32>
    %11 = vector.broadcast %10 : vector<1x64xf32> to vector<16x64xf32>
    %12 = arith.addf %9, %11 : vector<16x64xf32>
    %c0_14 = arith.constant 0 : index
    %c0_15 = arith.constant 0 : index
    %13 = vector.load %arg10[%c0_14, %c0_15] : memref<32x32xf32, #tpu.memory_space<vmem>>, vector<32x32xf32>
    %14 = vector.extract_strided_slice %7 {offsets = [0, 0], sizes = [32, 8], strides = [1, 1]} : vector<32x32xf32> to vector<32x8xf32>
    %15 = vector.extract_strided_slice %12 {offsets = [0, 0], sizes = [16, 8], strides = [1, 1]} : vector<16x64xf32> to vector<16x8xf32>
    %16 = vector.extract_strided_slice %12 {offsets = [0, 32], sizes = [16, 8], strides = [1, 1]} : vector<16x64xf32> to vector<16x8xf32>
    %cst_16 = arith.constant dense<0.000000e+00> : vector<32x16xf32>
    %17 = tpu.matmul %14, %15, %cst_16 {dimension_numbers = #tpu.dot_dimension_numbers<[1], [1], [0], [0], [0, 0, 1, 0], [], []>} : vector<32x8xf32>, vector<16x8xf32>, vector<32x16xf32> -> vector<32x16xf32>
    %cst_17 = arith.constant 0.353553385 : f32
    %18 = vector.broadcast %cst_17 : f32 to vector<32x16xf32>
    %19 = arith.mulf %17, %18 : vector<32x16xf32>
    %20 = arith.addf %19, %2 : vector<32x16xf32>
    %cst_18 = arith.constant dense<0xFF800000> : vector<32xf32>
    %21 = vector.multi_reduction <maximumf>, %20, %cst_18 [1] : vector<32x16xf32> to vector<32xf32>
    %22 = vector.shape_cast %21 : vector<32xf32> to vector<32x1xf32>
    %23 = vector.broadcast %22 : vector<32x1xf32> to vector<32x16xf32>
    %24 = arith.subf %20, %23 : vector<32x16xf32>
    %25 = math.exp %24 : vector<32x16xf32>
    %cst_19 = arith.constant dense<0.000000e+00> : vector<32xf32>
    %26 = vector.multi_reduction <add>, %25, %cst_19 [1] : vector<32x16xf32> to vector<32xf32>
    %27 = vector.shape_cast %26 : vector<32xf32> to vector<32x1xf32>
    %28 = tpu.reciprocal %27 {approx = true} : vector<32x1xf32> -> vector<32x1xf32>
    %29 = vector.broadcast %28 : vector<32x1xf32> to vector<32x16xf32>
    %30 = arith.mulf %25, %29 : vector<32x16xf32>
    %cst_20 = arith.constant dense<0.000000e+00> : vector<32x8xf32>
    %31 = tpu.matmul %30, %16, %cst_20 {dimension_numbers = #tpu.dot_dimension_numbers<[1], [0], [0], [1], [0, 0, 1, 1], [], []>} : vector<32x16xf32>, vector<16x8xf32>, vector<32x8xf32> -> vector<32x8xf32>
    %32 = vector.extract_strided_slice %13 {offsets = [0, 0], sizes = [8, 32], strides = [1, 1]} : vector<32x32xf32> to vector<8x32xf32>
    %cst_21 = arith.constant dense<0.000000e+00> : vector<32x32xf32>
    %33 = tpu.matmul %31, %32, %cst_21 {dimension_numbers = #tpu.dot_dimension_numbers<[1], [0], [0], [1], [0, 0, 1, 1], [], []>} : vector<32x8xf32>, vector<8x32xf32>, vector<32x32xf32> -> vector<32x32xf32>
    %34 = vector.extract_strided_slice %7 {offsets = [0, 8], sizes = [32, 8], strides = [1, 1]} : vector<32x32xf32> to vector<32x8xf32>
    %35 = vector.extract_strided_slice %12 {offsets = [0, 8], sizes = [16, 8], strides = [1, 1]} : vector<16x64xf32> to vector<16x8xf32>
    %36 = vector.extract_strided_slice %12 {offsets = [0, 40], sizes = [16, 8], strides = [1, 1]} : vector<16x64xf32> to vector<16x8xf32>
    %cst_22 = arith.constant dense<0.000000e+00> : vector<32x16xf32>
    %37 = tpu.matmul %34, %35, %cst_22 {dimension_numbers = #tpu.dot_dimension_numbers<[1], [1], [0], [0], [0, 0, 1, 0], [], []>} : vector<32x8xf32>, vector<16x8xf32>, vector<32x16xf32> -> vector<32x16xf32>
    %cst_23 = arith.constant 0.353553385 : f32
    %38 = vector.broadcast %cst_23 : f32 to vector<32x16xf32>
    %39 = arith.mulf %37, %38 : vector<32x16xf32>
    %40 = arith.addf %39, %2 : vector<32x16xf32>
    %cst_24 = arith.constant dense<0xFF800000> : vector<32xf32>
    %41 = vector.multi_reduction <maximumf>, %40, %cst_24 [1] : vector<32x16xf32> to vector<32xf32>
    %42 = vector.shape_cast %41 : vector<32xf32> to vector<32x1xf32>
    %43 = vector.broadcast %42 : vector<32x1xf32> to vector<32x16xf32>
    %44 = arith.subf %40, %43 : vector<32x16xf32>
    %45 = math.exp %44 : vector<32x16xf32>
    %cst_25 = arith.constant dense<0.000000e+00> : vector<32xf32>
    %46 = vector.multi_reduction <add>, %45, %cst_25 [1] : vector<32x16xf32> to vector<32xf32>
    %47 = vector.shape_cast %46 : vector<32xf32> to vector<32x1xf32>
    %48 = tpu.reciprocal %47 {approx = true} : vector<32x1xf32> -> vector<32x1xf32>
    %49 = vector.broadcast %48 : vector<32x1xf32> to vector<32x16xf32>
    %50 = arith.mulf %45, %49 : vector<32x16xf32>
    %cst_26 = arith.constant dense<0.000000e+00> : vector<32x8xf32>
    %51 = tpu.matmul %50, %36, %cst_26 {dimension_numbers = #tpu.dot_dimension_numbers<[1], [0], [0], [1], [0, 0, 1, 1], [], []>} : vector<32x16xf32>, vector<16x8xf32>, vector<32x8xf32> -> vector<32x8xf32>
    %52 = vector.extract_strided_slice %13 {offsets = [8, 0], sizes = [8, 32], strides = [1, 1]} : vector<32x32xf32> to vector<8x32xf32>
    %cst_27 = arith.constant dense<0.000000e+00> : vector<32x32xf32>
    %53 = tpu.matmul %51, %52, %cst_27 {dimension_numbers = #tpu.dot_dimension_numbers<[1], [0], [0], [1], [0, 0, 1, 1], [], []>} : vector<32x8xf32>, vector<8x32xf32>, vector<32x32xf32> -> vector<32x32xf32>
    %54 = arith.addf %33, %53 : vector<32x32xf32>
    %55 = vector.extract_strided_slice %7 {offsets = [0, 16], sizes = [32, 8], strides = [1, 1]} : vector<32x32xf32> to vector<32x8xf32>
    %56 = vector.extract_strided_slice %12 {offsets = [0, 16], sizes = [16, 8], strides = [1, 1]} : vector<16x64xf32> to vector<16x8xf32>
    %57 = vector.extract_strided_slice %12 {offsets = [0, 48], sizes = [16, 8], strides = [1, 1]} : vector<16x64xf32> to vector<16x8xf32>
    %cst_28 = arith.constant dense<0.000000e+00> : vector<32x16xf32>
    %58 = tpu.matmul %55, %56, %cst_28 {dimension_numbers = #tpu.dot_dimension_numbers<[1], [1], [0], [0], [0, 0, 1, 0], [], []>} : vector<32x8xf32>, vector<16x8xf32>, vector<32x16xf32> -> vector<32x16xf32>
    %cst_29 = arith.constant 0.353553385 : f32
    %59 = vector.broadcast %cst_29 : f32 to vector<32x16xf32>
    %60 = arith.mulf %58, %59 : vector<32x16xf32>
    %61 = arith.addf %60, %2 : vector<32x16xf32>
    %cst_30 = arith.constant dense<0xFF800000> : vector<32xf32>
    %62 = vector.multi_reduction <maximumf>, %61, %cst_30 [1] : vector<32x16xf32> to vector<32xf32>
    %63 = vector.shape_cast %62 : vector<32xf32> to vector<32x1xf32>
    %64 = vector.broadcast %63 : vector<32x1xf32> to vector<32x16xf32>
    %65 = arith.subf %61, %64 : vector<32x16xf32>
    %66 = math.exp %65 : vector<32x16xf32>
    %cst_31 = arith.constant dense<0.000000e+00> : vector<32xf32>
    %67 = vector.multi_reduction <add>, %66, %cst_31 [1] : vector<32x16xf32> to vector<32xf32>
    %68 = vector.shape_cast %67 : vector<32xf32> to vector<32x1xf32>
    %69 = tpu.reciprocal %68 {approx = true} : vector<32x1xf32> -> vector<32x1xf32>
    %70 = vector.broadcast %69 : vector<32x1xf32> to vector<32x16xf32>
    %71 = arith.mulf %66, %70 : vector<32x16xf32>
    %cst_32 = arith.constant dense<0.000000e+00> : vector<32x8xf32>
    %72 = tpu.matmul %71, %57, %cst_32 {dimension_numbers = #tpu.dot_dimension_numbers<[1], [0], [0], [1], [0, 0, 1, 1], [], []>} : vector<32x16xf32>, vector<16x8xf32>, vector<32x8xf32> -> vector<32x8xf32>
    %73 = vector.extract_strided_slice %13 {offsets = [16, 0], sizes = [8, 32], strides = [1, 1]} : vector<32x32xf32> to vector<8x32xf32>
    %cst_33 = arith.constant dense<0.000000e+00> : vector<32x32xf32>
    %74 = tpu.matmul %72, %73, %cst_33 {dimension_numbers = #tpu.dot_dimension_numbers<[1], [0], [0], [1], [0, 0, 1, 1], [], []>} : vector<32x8xf32>, vector<8x32xf32>, vector<32x32xf32> -> vector<32x32xf32>
    %75 = arith.addf %54, %74 : vector<32x32xf32>
    %76 = vector.extract_strided_slice %7 {offsets = [0, 24], sizes = [32, 8], strides = [1, 1]} : vector<32x32xf32> to vector<32x8xf32>
    %77 = vector.extract_strided_slice %12 {offsets = [0, 24], sizes = [16, 8], strides = [1, 1]} : vector<16x64xf32> to vector<16x8xf32>
    %78 = vector.extract_strided_slice %12 {offsets = [0, 56], sizes = [16, 8], strides = [1, 1]} : vector<16x64xf32> to vector<16x8xf32>
    %cst_34 = arith.constant dense<0.000000e+00> : vector<32x16xf32>
    %79 = tpu.matmul %76, %77, %cst_34 {dimension_numbers = #tpu.dot_dimension_numbers<[1], [1], [0], [0], [0, 0, 1, 0], [], []>} : vector<32x8xf32>, vector<16x8xf32>, vector<32x16xf32> -> vector<32x16xf32>
    %cst_35 = arith.constant 0.353553385 : f32
    %80 = vector.broadcast %cst_35 : f32 to vector<32x16xf32>
    %81 = arith.mulf %79, %80 : vector<32x16xf32>
    %82 = arith.addf %81, %2 : vector<32x16xf32>
    %cst_36 = arith.constant dense<0xFF800000> : vector<32xf32>
    %83 = vector.multi_reduction <maximumf>, %82, %cst_36 [1] : vector<32x16xf32> to vector<32xf32>
    %84 = vector.shape_cast %83 : vector<32xf32> to vector<32x1xf32>
    %85 = vector.broadcast %84 : vector<32x1xf32> to vector<32x16xf32>
    %86 = arith.subf %82, %85 : vector<32x16xf32>
    %87 = math.exp %86 : vector<32x16xf32>
    %cst_37 = arith.constant dense<0.000000e+00> : vector<32xf32>
    %88 = vector.multi_reduction <add>, %87, %cst_37 [1] : vector<32x16xf32> to vector<32xf32>
    %89 = vector.shape_cast %88 : vector<32xf32> to vector<32x1xf32>
    %90 = tpu.reciprocal %89 {approx = true} : vector<32x1xf32> -> vector<32x1xf32>
    %91 = vector.broadcast %90 : vector<32x1xf32> to vector<32x16xf32>
    %92 = arith.mulf %87, %91 : vector<32x16xf32>
    %cst_38 = arith.constant dense<0.000000e+00> : vector<32x8xf32>
    %93 = tpu.matmul %92, %78, %cst_38 {dimension_numbers = #tpu.dot_dimension_numbers<[1], [0], [0], [1], [0, 0, 1, 1], [], []>} : vector<32x16xf32>, vector<16x8xf32>, vector<32x8xf32> -> vector<32x8xf32>
    %94 = vector.extract_strided_slice %13 {offsets = [24, 0], sizes = [8, 32], strides = [1, 1]} : vector<32x32xf32> to vector<8x32xf32>
    %cst_39 = arith.constant dense<0.000000e+00> : vector<32x32xf32>
    %95 = tpu.matmul %93, %94, %cst_39 {dimension_numbers = #tpu.dot_dimension_numbers<[1], [0], [0], [1], [0, 0, 1, 1], [], []>} : vector<32x8xf32>, vector<8x32xf32>, vector<32x32xf32> -> vector<32x32xf32>
    %96 = arith.addf %75, %95 : vector<32x32xf32>
    %c0_40 = arith.constant 0 : index
    %c0_41 = arith.constant 0 : index
    %97 = vector.load %arg11[%c0_40, %c0_41] : memref<1x32xf32, #tpu.memory_space<vmem>>, vector<1x32xf32>
    %98 = vector.broadcast %97 : vector<1x32xf32> to vector<32x32xf32>
    %99 = arith.addf %96, %98 : vector<32x32xf32>
    %100 = arith.addf %0, %99 : vector<32x32xf32>
    %cst_42 = arith.constant dense<0.000000e+00> : vector<32xf32>
    %101 = vector.multi_reduction <add>, %100, %cst_42 [1] : vector<32x32xf32> to vector<32xf32>
    %102 = vector.shape_cast %101 : vector<32xf32> to vector<32x1xf32>
    %cst_43 = arith.constant 3.200000e+01 : f32
    %103 = vector.broadcast %cst_43 : f32 to vector<32x1xf32>
    %104 = arith.divf %102, %103 : vector<32x1xf32>
    %105 = vector.broadcast %104 : vector<32x1xf32> to vector<32x32xf32>
    %106 = arith.subf %100, %105 : vector<32x32xf32>
    %107 = arith.mulf %106, %106 : vector<32x32xf32>
    %cst_44 = arith.constant dense<0.000000e+00> : vector<32xf32>
    %108 = vector.multi_reduction <add>, %107, %cst_44 [1] : vector<32x32xf32> to vector<32xf32>
    %109 = vector.shape_cast %108 : vector<32xf32> to vector<32x1xf32>
    %cst_45 = arith.constant 3.200000e+01 : f32
    %110 = vector.broadcast %cst_45 : f32 to vector<32x1xf32>
    %111 = arith.divf %109, %110 : vector<32x1xf32>
    %112 = vector.broadcast %104 : vector<32x1xf32> to vector<32x32xf32>
    %113 = arith.subf %100, %112 : vector<32x32xf32>
    %cst_46 = arith.constant 9.99999974E-6 : f32
    %114 = vector.broadcast %cst_46 : f32 to vector<32x1xf32>
    %115 = arith.addf %111, %114 : vector<32x1xf32>
    %116 = math.rsqrt %115 : vector<32x1xf32>
    %117 = vector.broadcast %116 : vector<32x1xf32> to vector<32x32xf32>
    %118 = arith.mulf %113, %117 : vector<32x32xf32>
    %c0_47 = arith.constant 0 : index
    %c0_48 = arith.constant 0 : index
    %119 = vector.load %arg12[%c0_47, %c0_48] : memref<1x32xf32, #tpu.memory_space<vmem>>, vector<1x32xf32>
    %120 = vector.broadcast %119 : vector<1x32xf32> to vector<32x32xf32>
    %121 = arith.mulf %118, %120 : vector<32x32xf32>
    %c0_49 = arith.constant 0 : index
    %c0_50 = arith.constant 0 : index
    %122 = vector.load %arg13[%c0_49, %c0_50] : memref<1x32xf32, #tpu.memory_space<vmem>>, vector<1x32xf32>
    %123 = vector.broadcast %122 : vector<1x32xf32> to vector<32x32xf32>
    %124 = arith.addf %121, %123 : vector<32x32xf32>
    %c0_51 = arith.constant 0 : index
    %c0_52 = arith.constant 0 : index
    %125 = vector.load %arg14[%c0_51, %c0_52] : memref<32x128xf32, #tpu.memory_space<vmem>>, vector<32x128xf32>
    %cst_53 = arith.constant dense<0.000000e+00> : vector<32x128xf32>
    %126 = tpu.matmul %124, %125, %cst_53 {dimension_numbers = #tpu.dot_dimension_numbers<[1], [0], [0], [1], [0, 0, 1, 1], [], []>} : vector<32x32xf32>, vector<32x128xf32>, vector<32x128xf32> -> vector<32x128xf32>
    %c0_54 = arith.constant 0 : index
    %c0_55 = arith.constant 0 : index
    %127 = vector.load %arg15[%c0_54, %c0_55] : memref<1x128xf32, #tpu.memory_space<vmem>>, vector<1x128xf32>
    %128 = vector.broadcast %127 : vector<1x128xf32> to vector<32x128xf32>
    %129 = arith.addf %126, %128 : vector<32x128xf32>
    %cst_56 = arith.constant 0.000000e+00 : f32
    %130 = vector.broadcast %cst_56 : f32 to vector<32x128xf32>
    %131 = arith.maximumf %129, %130 : vector<32x128xf32>
    %c0_57 = arith.constant 0 : index
    %c0_58 = arith.constant 0 : index
    %132 = vector.load %arg16[%c0_57, %c0_58] : memref<128x32xf32, #tpu.memory_space<vmem>>, vector<128x32xf32>
    %cst_59 = arith.constant dense<0.000000e+00> : vector<32x32xf32>
    %133 = tpu.matmul %131, %132, %cst_59 {dimension_numbers = #tpu.dot_dimension_numbers<[1], [0], [0], [1], [0, 0, 1, 1], [], []>} : vector<32x128xf32>, vector<128x32xf32>, vector<32x32xf32> -> vector<32x32xf32>
    %c0_60 = arith.constant 0 : index
    %c0_61 = arith.constant 0 : index
    %134 = vector.load %arg17[%c0_60, %c0_61] : memref<1x32xf32, #tpu.memory_space<vmem>>, vector<1x32xf32>
    %135 = vector.broadcast %134 : vector<1x32xf32> to vector<32x32xf32>
    %136 = arith.addf %133, %135 : vector<32x32xf32>
    %c0_62 = arith.constant 0 : index
    %c0_63 = arith.constant 0 : index
    %137 = vector.load %arg3[%c0_62, %c0_63] : memref<32x32xf32, #tpu.memory_space<vmem>>, vector<32x32xf32>
    %138 = arith.addf %136, %137 : vector<32x32xf32>
    %139 = arith.addf %124, %138 : vector<32x32xf32>
    %cst_64 = arith.constant dense<0.000000e+00> : vector<32xf32>
    %140 = vector.multi_reduction <add>, %139, %cst_64 [1] : vector<32x32xf32> to vector<32xf32>
    %141 = vector.shape_cast %140 : vector<32xf32> to vector<32x1xf32>
    %cst_65 = arith.constant 3.200000e+01 : f32
    %142 = vector.broadcast %cst_65 : f32 to vector<32x1xf32>
    %143 = arith.divf %141, %142 : vector<32x1xf32>
    %144 = vector.broadcast %143 : vector<32x1xf32> to vector<32x32xf32>
    %145 = arith.subf %139, %144 : vector<32x32xf32>
    %146 = arith.mulf %145, %145 : vector<32x32xf32>
    %cst_66 = arith.constant dense<0.000000e+00> : vector<32xf32>
    %147 = vector.multi_reduction <add>, %146, %cst_66 [1] : vector<32x32xf32> to vector<32xf32>
    %148 = vector.shape_cast %147 : vector<32xf32> to vector<32x1xf32>
    %cst_67 = arith.constant 3.200000e+01 : f32
    %149 = vector.broadcast %cst_67 : f32 to vector<32x1xf32>
    %150 = arith.divf %148, %149 : vector<32x1xf32>
    %151 = vector.broadcast %143 : vector<32x1xf32> to vector<32x32xf32>
    %152 = arith.subf %139, %151 : vector<32x32xf32>
    %cst_68 = arith.constant 9.99999974E-6 : f32
    %153 = vector.broadcast %cst_68 : f32 to vector<32x1xf32>
    %154 = arith.addf %150, %153 : vector<32x1xf32>
    %155 = math.rsqrt %154 : vector<32x1xf32>
    %156 = vector.broadcast %155 : vector<32x1xf32> to vector<32x32xf32>
    %157 = arith.mulf %152, %156 : vector<32x32xf32>
    %c0_69 = arith.constant 0 : index
    %c0_70 = arith.constant 0 : index
    %158 = vector.load %arg18[%c0_69, %c0_70] : memref<1x32xf32, #tpu.memory_space<vmem>>, vector<1x32xf32>
    %159 = vector.broadcast %158 : vector<1x32xf32> to vector<32x32xf32>
    %160 = arith.mulf %157, %159 : vector<32x32xf32>
    %c0_71 = arith.constant 0 : index
    %c0_72 = arith.constant 0 : index
    %161 = vector.load %arg19[%c0_71, %c0_72] : memref<1x32xf32, #tpu.memory_space<vmem>>, vector<1x32xf32>
    %162 = vector.broadcast %161 : vector<1x32xf32> to vector<32x32xf32>
    %163 = arith.addf %160, %162 : vector<32x32xf32>
    %c0_73 = arith.constant 0 : index
    %c0_74 = arith.constant 0 : index
    %164 = vector.load %arg5[%c0_73, %c0_74] : memref<16x32xf32, #tpu.memory_space<vmem>>, vector<16x32xf32>
    %c0_75 = arith.constant 0 : index
    %c0_76 = arith.constant 0 : index
    %165 = vector.load %arg20[%c0_75, %c0_76] : memref<32x32xf32, #tpu.memory_space<vmem>>, vector<32x32xf32>
    %cst_77 = arith.constant dense<0.000000e+00> : vector<16x32xf32>
    %166 = tpu.matmul %1, %165, %cst_77 {dimension_numbers = #tpu.dot_dimension_numbers<[1], [0], [0], [1], [0, 0, 1, 1], [], []>} : vector<16x32xf32>, vector<32x32xf32>, vector<16x32xf32> -> vector<16x32xf32>
    %c0_78 = arith.constant 0 : index
    %c0_79 = arith.constant 0 : index
    %167 = vector.load %arg21[%c0_78, %c0_79] : memref<1x32xf32, #tpu.memory_space<vmem>>, vector<1x32xf32>
    %168 = vector.broadcast %167 : vector<1x32xf32> to vector<16x32xf32>
    %169 = arith.addf %166, %168 : vector<16x32xf32>
    %c0_80 = arith.constant 0 : index
    %c0_81 = arith.constant 0 : index
    %170 = vector.load %arg22[%c0_80, %c0_81] : memref<32x64xf32, #tpu.memory_space<vmem>>, vector<32x64xf32>
    %cst_82 = arith.constant dense<0.000000e+00> : vector<32x64xf32>
    %171 = tpu.matmul %163, %170, %cst_82 {dimension_numbers = #tpu.dot_dimension_numbers<[1], [0], [0], [1], [0, 0, 1, 1], [], []>} : vector<32x32xf32>, vector<32x64xf32>, vector<32x64xf32> -> vector<32x64xf32>
    %c0_83 = arith.constant 0 : index
    %c0_84 = arith.constant 0 : index
    %172 = vector.load %arg23[%c0_83, %c0_84] : memref<1x64xf32, #tpu.memory_space<vmem>>, vector<1x64xf32>
    %173 = vector.broadcast %172 : vector<1x64xf32> to vector<32x64xf32>
    %174 = arith.addf %171, %173 : vector<32x64xf32>
    %c0_85 = arith.constant 0 : index
    %c0_86 = arith.constant 0 : index
    %175 = vector.load %arg24[%c0_85, %c0_86] : memref<32x32xf32, #tpu.memory_space<vmem>>, vector<32x32xf32>
    %176 = vector.extract_strided_slice %169 {offsets = [0, 0], sizes = [16, 8], strides = [1, 1]} : vector<16x32xf32> to vector<16x8xf32>
    %177 = vector.extract_strided_slice %174 {offsets = [0, 0], sizes = [32, 8], strides = [1, 1]} : vector<32x64xf32> to vector<32x8xf32>
    %178 = vector.extract_strided_slice %174 {offsets = [0, 32], sizes = [32, 8], strides = [1, 1]} : vector<32x64xf32> to vector<32x8xf32>
    %cst_87 = arith.constant dense<0.000000e+00> : vector<16x32xf32>
    %179 = tpu.matmul %176, %177, %cst_87 {dimension_numbers = #tpu.dot_dimension_numbers<[1], [1], [0], [0], [0, 0, 1, 0], [], []>} : vector<16x8xf32>, vector<32x8xf32>, vector<16x32xf32> -> vector<16x32xf32>
    %cst_88 = arith.constant 0.353553385 : f32
    %180 = vector.broadcast %cst_88 : f32 to vector<16x32xf32>
    %181 = arith.mulf %179, %180 : vector<16x32xf32>
    %182 = arith.addf %181, %164 : vector<16x32xf32>
    %cst_89 = arith.constant dense<0xFF800000> : vector<16xf32>
    %183 = vector.multi_reduction <maximumf>, %182, %cst_89 [1] : vector<16x32xf32> to vector<16xf32>
    %184 = vector.shape_cast %183 : vector<16xf32> to vector<16x1xf32>
    %185 = vector.broadcast %184 : vector<16x1xf32> to vector<16x32xf32>
    %186 = arith.subf %182, %185 : vector<16x32xf32>
    %187 = math.exp %186 : vector<16x32xf32>
    %cst_90 = arith.constant dense<0.000000e+00> : vector<16xf32>
    %188 = vector.multi_reduction <add>, %187, %cst_90 [1] : vector<16x32xf32> to vector<16xf32>
    %189 = vector.shape_cast %188 : vector<16xf32> to vector<16x1xf32>
    %190 = tpu.reciprocal %189 {approx = true} : vector<16x1xf32> -> vector<16x1xf32>
    %191 = vector.broadcast %190 : vector<16x1xf32> to vector<16x32xf32>
    %192 = arith.mulf %187, %191 : vector<16x32xf32>
    %cst_91 = arith.constant dense<0.000000e+00> : vector<16x8xf32>
    %193 = tpu.matmul %192, %178, %cst_91 {dimension_numbers = #tpu.dot_dimension_numbers<[1], [0], [0], [1], [0, 0, 1, 1], [], []>} : vector<16x32xf32>, vector<32x8xf32>, vector<16x8xf32> -> vector<16x8xf32>
    %194 = vector.extract_strided_slice %175 {offsets = [0, 0], sizes = [8, 32], strides = [1, 1]} : vector<32x32xf32> to vector<8x32xf32>
    %cst_92 = arith.constant dense<0.000000e+00> : vector<16x32xf32>
    %195 = tpu.matmul %193, %194, %cst_92 {dimension_numbers = #tpu.dot_dimension_numbers<[1], [0], [0], [1], [0, 0, 1, 1], [], []>} : vector<16x8xf32>, vector<8x32xf32>, vector<16x32xf32> -> vector<16x32xf32>
    %196 = vector.extract_strided_slice %169 {offsets = [0, 8], sizes = [16, 8], strides = [1, 1]} : vector<16x32xf32> to vector<16x8xf32>
    %197 = vector.extract_strided_slice %174 {offsets = [0, 8], sizes = [32, 8], strides = [1, 1]} : vector<32x64xf32> to vector<32x8xf32>
    %198 = vector.extract_strided_slice %174 {offsets = [0, 40], sizes = [32, 8], strides = [1, 1]} : vector<32x64xf32> to vector<32x8xf32>
    %cst_93 = arith.constant dense<0.000000e+00> : vector<16x32xf32>
    %199 = tpu.matmul %196, %197, %cst_93 {dimension_numbers = #tpu.dot_dimension_numbers<[1], [1], [0], [0], [0, 0, 1, 0], [], []>} : vector<16x8xf32>, vector<32x8xf32>, vector<16x32xf32> -> vector<16x32xf32>
    %cst_94 = arith.constant 0.353553385 : f32
    %200 = vector.broadcast %cst_94 : f32 to vector<16x32xf32>
    %201 = arith.mulf %199, %200 : vector<16x32xf32>
    %202 = arith.addf %201, %164 : vector<16x32xf32>
    %cst_95 = arith.constant dense<0xFF800000> : vector<16xf32>
    %203 = vector.multi_reduction <maximumf>, %202, %cst_95 [1] : vector<16x32xf32> to vector<16xf32>
    %204 = vector.shape_cast %203 : vector<16xf32> to vector<16x1xf32>
    %205 = vector.broadcast %204 : vector<16x1xf32> to vector<16x32xf32>
    %206 = arith.subf %202, %205 : vector<16x32xf32>
    %207 = math.exp %206 : vector<16x32xf32>
    %cst_96 = arith.constant dense<0.000000e+00> : vector<16xf32>
    %208 = vector.multi_reduction <add>, %207, %cst_96 [1] : vector<16x32xf32> to vector<16xf32>
    %209 = vector.shape_cast %208 : vector<16xf32> to vector<16x1xf32>
    %210 = tpu.reciprocal %209 {approx = true} : vector<16x1xf32> -> vector<16x1xf32>
    %211 = vector.broadcast %210 : vector<16x1xf32> to vector<16x32xf32>
    %212 = arith.mulf %207, %211 : vector<16x32xf32>
    %cst_97 = arith.constant dense<0.000000e+00> : vector<16x8xf32>
    %213 = tpu.matmul %212, %198, %cst_97 {dimension_numbers = #tpu.dot_dimension_numbers<[1], [0], [0], [1], [0, 0, 1, 1], [], []>} : vector<16x32xf32>, vector<32x8xf32>, vector<16x8xf32> -> vector<16x8xf32>
    %214 = vector.extract_strided_slice %175 {offsets = [8, 0], sizes = [8, 32], strides = [1, 1]} : vector<32x32xf32> to vector<8x32xf32>
    %cst_98 = arith.constant dense<0.000000e+00> : vector<16x32xf32>
    %215 = tpu.matmul %213, %214, %cst_98 {dimension_numbers = #tpu.dot_dimension_numbers<[1], [0], [0], [1], [0, 0, 1, 1], [], []>} : vector<16x8xf32>, vector<8x32xf32>, vector<16x32xf32> -> vector<16x32xf32>
    %216 = arith.addf %195, %215 : vector<16x32xf32>
    %217 = vector.extract_strided_slice %169 {offsets = [0, 16], sizes = [16, 8], strides = [1, 1]} : vector<16x32xf32> to vector<16x8xf32>
    %218 = vector.extract_strided_slice %174 {offsets = [0, 16], sizes = [32, 8], strides = [1, 1]} : vector<32x64xf32> to vector<32x8xf32>
    %219 = vector.extract_strided_slice %174 {offsets = [0, 48], sizes = [32, 8], strides = [1, 1]} : vector<32x64xf32> to vector<32x8xf32>
    %cst_99 = arith.constant dense<0.000000e+00> : vector<16x32xf32>
    %220 = tpu.matmul %217, %218, %cst_99 {dimension_numbers = #tpu.dot_dimension_numbers<[1], [1], [0], [0], [0, 0, 1, 0], [], []>} : vector<16x8xf32>, vector<32x8xf32>, vector<16x32xf32> -> vector<16x32xf32>
    %cst_100 = arith.constant 0.353553385 : f32
    %221 = vector.broadcast %cst_100 : f32 to vector<16x32xf32>
    %222 = arith.mulf %220, %221 : vector<16x32xf32>
    %223 = arith.addf %222, %164 : vector<16x32xf32>
    %cst_101 = arith.constant dense<0xFF800000> : vector<16xf32>
    %224 = vector.multi_reduction <maximumf>, %223, %cst_101 [1] : vector<16x32xf32> to vector<16xf32>
    %225 = vector.shape_cast %224 : vector<16xf32> to vector<16x1xf32>
    %226 = vector.broadcast %225 : vector<16x1xf32> to vector<16x32xf32>
    %227 = arith.subf %223, %226 : vector<16x32xf32>
    %228 = math.exp %227 : vector<16x32xf32>
    %cst_102 = arith.constant dense<0.000000e+00> : vector<16xf32>
    %229 = vector.multi_reduction <add>, %228, %cst_102 [1] : vector<16x32xf32> to vector<16xf32>
    %230 = vector.shape_cast %229 : vector<16xf32> to vector<16x1xf32>
    %231 = tpu.reciprocal %230 {approx = true} : vector<16x1xf32> -> vector<16x1xf32>
    %232 = vector.broadcast %231 : vector<16x1xf32> to vector<16x32xf32>
    %233 = arith.mulf %228, %232 : vector<16x32xf32>
    %cst_103 = arith.constant dense<0.000000e+00> : vector<16x8xf32>
    %234 = tpu.matmul %233, %219, %cst_103 {dimension_numbers = #tpu.dot_dimension_numbers<[1], [0], [0], [1], [0, 0, 1, 1], [], []>} : vector<16x32xf32>, vector<32x8xf32>, vector<16x8xf32> -> vector<16x8xf32>
    %235 = vector.extract_strided_slice %175 {offsets = [16, 0], sizes = [8, 32], strides = [1, 1]} : vector<32x32xf32> to vector<8x32xf32>
    %cst_104 = arith.constant dense<0.000000e+00> : vector<16x32xf32>
    %236 = tpu.matmul %234, %235, %cst_104 {dimension_numbers = #tpu.dot_dimension_numbers<[1], [0], [0], [1], [0, 0, 1, 1], [], []>} : vector<16x8xf32>, vector<8x32xf32>, vector<16x32xf32> -> vector<16x32xf32>
    %237 = arith.addf %216, %236 : vector<16x32xf32>
    %238 = vector.extract_strided_slice %169 {offsets = [0, 24], sizes = [16, 8], strides = [1, 1]} : vector<16x32xf32> to vector<16x8xf32>
    %239 = vector.extract_strided_slice %174 {offsets = [0, 24], sizes = [32, 8], strides = [1, 1]} : vector<32x64xf32> to vector<32x8xf32>
    %240 = vector.extract_strided_slice %174 {offsets = [0, 56], sizes = [32, 8], strides = [1, 1]} : vector<32x64xf32> to vector<32x8xf32>
    %cst_105 = arith.constant dense<0.000000e+00> : vector<16x32xf32>
    %241 = tpu.matmul %238, %239, %cst_105 {dimension_numbers = #tpu.dot_dimension_numbers<[1], [1], [0], [0], [0, 0, 1, 0], [], []>} : vector<16x8xf32>, vector<32x8xf32>, vector<16x32xf32> -> vector<16x32xf32>
    %cst_106 = arith.constant 0.353553385 : f32
    %242 = vector.broadcast %cst_106 : f32 to vector<16x32xf32>
    %243 = arith.mulf %241, %242 : vector<16x32xf32>
    %244 = arith.addf %243, %164 : vector<16x32xf32>
    %cst_107 = arith.constant dense<0xFF800000> : vector<16xf32>
    %245 = vector.multi_reduction <maximumf>, %244, %cst_107 [1] : vector<16x32xf32> to vector<16xf32>
    %246 = vector.shape_cast %245 : vector<16xf32> to vector<16x1xf32>
    %247 = vector.broadcast %246 : vector<16x1xf32> to vector<16x32xf32>
    %248 = arith.subf %244, %247 : vector<16x32xf32>
    %249 = math.exp %248 : vector<16x32xf32>
    %cst_108 = arith.constant dense<0.000000e+00> : vector<16xf32>
    %250 = vector.multi_reduction <add>, %249, %cst_108 [1] : vector<16x32xf32> to vector<16xf32>
    %251 = vector.shape_cast %250 : vector<16xf32> to vector<16x1xf32>
    %252 = tpu.reciprocal %251 {approx = true} : vector<16x1xf32> -> vector<16x1xf32>
    %253 = vector.broadcast %252 : vector<16x1xf32> to vector<16x32xf32>
    %254 = arith.mulf %249, %253 : vector<16x32xf32>
    %cst_109 = arith.constant dense<0.000000e+00> : vector<16x8xf32>
    %255 = tpu.matmul %254, %240, %cst_109 {dimension_numbers = #tpu.dot_dimension_numbers<[1], [0], [0], [1], [0, 0, 1, 1], [], []>} : vector<16x32xf32>, vector<32x8xf32>, vector<16x8xf32> -> vector<16x8xf32>
    %256 = vector.extract_strided_slice %175 {offsets = [24, 0], sizes = [8, 32], strides = [1, 1]} : vector<32x32xf32> to vector<8x32xf32>
    %cst_110 = arith.constant dense<0.000000e+00> : vector<16x32xf32>
    %257 = tpu.matmul %255, %256, %cst_110 {dimension_numbers = #tpu.dot_dimension_numbers<[1], [0], [0], [1], [0, 0, 1, 1], [], []>} : vector<16x8xf32>, vector<8x32xf32>, vector<16x32xf32> -> vector<16x32xf32>
    %258 = arith.addf %237, %257 : vector<16x32xf32>
    %c0_111 = arith.constant 0 : index
    %c0_112 = arith.constant 0 : index
    %259 = vector.load %arg25[%c0_111, %c0_112] : memref<1x32xf32, #tpu.memory_space<vmem>>, vector<1x32xf32>
    %260 = vector.broadcast %259 : vector<1x32xf32> to vector<16x32xf32>
    %261 = arith.addf %258, %260 : vector<16x32xf32>
    %262 = arith.addf %1, %261 : vector<16x32xf32>
    %cst_113 = arith.constant dense<0.000000e+00> : vector<16xf32>
    %263 = vector.multi_reduction <add>, %262, %cst_113 [1] : vector<16x32xf32> to vector<16xf32>
    %264 = vector.shape_cast %263 : vector<16xf32> to vector<16x1xf32>
    %cst_114 = arith.constant 3.200000e+01 : f32
    %265 = vector.broadcast %cst_114 : f32 to vector<16x1xf32>
    %266 = arith.divf %264, %265 : vector<16x1xf32>
    %267 = vector.broadcast %266 : vector<16x1xf32> to vector<16x32xf32>
    %268 = arith.subf %262, %267 : vector<16x32xf32>
    %269 = arith.mulf %268, %268 : vector<16x32xf32>
    %cst_115 = arith.constant dense<0.000000e+00> : vector<16xf32>
    %270 = vector.multi_reduction <add>, %269, %cst_115 [1] : vector<16x32xf32> to vector<16xf32>
    %271 = vector.shape_cast %270 : vector<16xf32> to vector<16x1xf32>
    %cst_116 = arith.constant 3.200000e+01 : f32
    %272 = vector.broadcast %cst_116 : f32 to vector<16x1xf32>
    %273 = arith.divf %271, %272 : vector<16x1xf32>
    %274 = vector.broadcast %266 : vector<16x1xf32> to vector<16x32xf32>
    %275 = arith.subf %262, %274 : vector<16x32xf32>
    %cst_117 = arith.constant 9.99999974E-6 : f32
    %276 = vector.broadcast %cst_117 : f32 to vector<16x1xf32>
    %277 = arith.addf %273, %276 : vector<16x1xf32>
    %278 = math.rsqrt %277 : vector<16x1xf32>
    %279 = vector.broadcast %278 : vector<16x1xf32> to vector<16x32xf32>
    %280 = arith.mulf %275, %279 : vector<16x32xf32>
    %c0_118 = arith.constant 0 : index
    %c0_119 = arith.constant 0 : index
    %281 = vector.load %arg26[%c0_118, %c0_119] : memref<1x32xf32, #tpu.memory_space<vmem>>, vector<1x32xf32>
    %282 = vector.broadcast %281 : vector<1x32xf32> to vector<16x32xf32>
    %283 = arith.mulf %280, %282 : vector<16x32xf32>
    %c0_120 = arith.constant 0 : index
    %c0_121 = arith.constant 0 : index
    %284 = vector.load %arg27[%c0_120, %c0_121] : memref<1x32xf32, #tpu.memory_space<vmem>>, vector<1x32xf32>
    %285 = vector.broadcast %284 : vector<1x32xf32> to vector<16x32xf32>
    %286 = arith.addf %283, %285 : vector<16x32xf32>
    %c0_122 = arith.constant 0 : index
    %c0_123 = arith.constant 0 : index
    %287 = vector.load %arg28[%c0_122, %c0_123] : memref<32x128xf32, #tpu.memory_space<vmem>>, vector<32x128xf32>
    %cst_124 = arith.constant dense<0.000000e+00> : vector<16x128xf32>
    %288 = tpu.matmul %286, %287, %cst_124 {dimension_numbers = #tpu.dot_dimension_numbers<[1], [0], [0], [1], [0, 0, 1, 1], [], []>} : vector<16x32xf32>, vector<32x128xf32>, vector<16x128xf32> -> vector<16x128xf32>
    %c0_125 = arith.constant 0 : index
    %c0_126 = arith.constant 0 : index
    %289 = vector.load %arg29[%c0_125, %c0_126] : memref<1x128xf32, #tpu.memory_space<vmem>>, vector<1x128xf32>
    %290 = vector.broadcast %289 : vector<1x128xf32> to vector<16x128xf32>
    %291 = arith.addf %288, %290 : vector<16x128xf32>
    %cst_127 = arith.constant 0.000000e+00 : f32
    %292 = vector.broadcast %cst_127 : f32 to vector<16x128xf32>
    %293 = arith.maximumf %291, %292 : vector<16x128xf32>
    %c0_128 = arith.constant 0 : index
    %c0_129 = arith.constant 0 : index
    %294 = vector.load %arg30[%c0_128, %c0_129] : memref<128x32xf32, #tpu.memory_space<vmem>>, vector<128x32xf32>
    %cst_130 = arith.constant dense<0.000000e+00> : vector<16x32xf32>
    %295 = tpu.matmul %293, %294, %cst_130 {dimension_numbers = #tpu.dot_dimension_numbers<[1], [0], [0], [1], [0, 0, 1, 1], [], []>} : vector<16x128xf32>, vector<128x32xf32>, vector<16x32xf32> -> vector<16x32xf32>
    %c0_131 = arith.constant 0 : index
    %c0_132 = arith.constant 0 : index
    %296 = vector.load %arg31[%c0_131, %c0_132] : memref<1x32xf32, #tpu.memory_space<vmem>>, vector<1x32xf32>
    %297 = vector.broadcast %296 : vector<1x32xf32> to vector<16x32xf32>
    %298 = arith.addf %295, %297 : vector<16x32xf32>
    %299 = arith.addf %286, %298 : vector<16x32xf32>
    %cst_133 = arith.constant dense<0.000000e+00> : vector<16xf32>
    %300 = vector.multi_reduction <add>, %299, %cst_133 [1] : vector<16x32xf32> to vector<16xf32>
    %301 = vector.shape_cast %300 : vector<16xf32> to vector<16x1xf32>
    %cst_134 = arith.constant 3.200000e+01 : f32
    %302 = vector.broadcast %cst_134 : f32 to vector<16x1xf32>
    %303 = arith.divf %301, %302 : vector<16x1xf32>
    %304 = vector.broadcast %303 : vector<16x1xf32> to vector<16x32xf32>
    %305 = arith.subf %299, %304 : vector<16x32xf32>
    %306 = arith.mulf %305, %305 : vector<16x32xf32>
    %cst_135 = arith.constant dense<0.000000e+00> : vector<16xf32>
    %307 = vector.multi_reduction <add>, %306, %cst_135 [1] : vector<16x32xf32> to vector<16xf32>
    %308 = vector.shape_cast %307 : vector<16xf32> to vector<16x1xf32>
    %cst_136 = arith.constant 3.200000e+01 : f32
    %309 = vector.broadcast %cst_136 : f32 to vector<16x1xf32>
    %310 = arith.divf %308, %309 : vector<16x1xf32>
    %311 = vector.broadcast %303 : vector<16x1xf32> to vector<16x32xf32>
    %312 = arith.subf %299, %311 : vector<16x32xf32>
    %cst_137 = arith.constant 9.99999974E-6 : f32
    %313 = vector.broadcast %cst_137 : f32 to vector<16x1xf32>
    %314 = arith.addf %310, %313 : vector<16x1xf32>
    %315 = math.rsqrt %314 : vector<16x1xf32>
    %316 = vector.broadcast %315 : vector<16x1xf32> to vector<16x32xf32>
    %317 = arith.mulf %312, %316 : vector<16x32xf32>
    %c0_138 = arith.constant 0 : index
    %c0_139 = arith.constant 0 : index
    %318 = vector.load %arg32[%c0_138, %c0_139] : memref<1x32xf32, #tpu.memory_space<vmem>>, vector<1x32xf32>
    %319 = vector.broadcast %318 : vector<1x32xf32> to vector<16x32xf32>
    %320 = arith.mulf %317, %319 : vector<16x32xf32>
    %c0_140 = arith.constant 0 : index
    %c0_141 = arith.constant 0 : index
    %321 = vector.load %arg33[%c0_140, %c0_141] : memref<1x32xf32, #tpu.memory_space<vmem>>, vector<1x32xf32>
    %322 = vector.broadcast %321 : vector<1x32xf32> to vector<16x32xf32>
    %323 = arith.addf %320, %322 : vector<16x32xf32>
    %c0_142 = arith.constant 0 : index
    %c0_143 = arith.constant 0 : index
    %324 = vector.load %arg2[%c0_142, %c0_143] : memref<16x32xf32, #tpu.memory_space<vmem>>, vector<16x32xf32>
    %325 = arith.addf %323, %324 : vector<16x32xf32>
    %c0_144 = arith.constant 0 : index
    %c0_145 = arith.constant 0 : index
    %326 = vector.load %arg34[%c0_144, %c0_145] : memref<32x32xf32, #tpu.memory_space<vmem>>, vector<32x32xf32>
    tpu.vector_store %arg34[%c0_144, %c0_145], %163 {strides = array<i32>} : memref<32x32xf32, #tpu.memory_space<vmem>>, vector<32x32xf32>,
    %c0_146 = arith.constant 0 : index
    %c0_147 = arith.constant 0 : index
    %327 = vector.load %arg35[%c0_146, %c0_147] : memref<16x32xf32, #tpu.memory_space<vmem>>, vector<16x32xf32>
    tpu.vector_store %arg35[%c0_146, %c0_147], %325 {strides = array<i32>} : memref<16x32xf32, #tpu.memory_space<vmem>>, vector<16x32xf32>,
    return
  }
}

</mosaic_0001>

<bundles_post_ra>
// kernel: eq.18
= control target key start
LH: loop header
LB: loop body
LE: loop exit
PB: predicated region body
PF: predicated region fallthrough
CT: control target
= control target key end

     0   :  { %vm8_vm0 = vcmask 64512   ;;  %vm14_vm1 = vcmask 130112   ;;  %s42_s0 = inlined_call_operand.vmem [shape: s32[2,8], index: 0, kind: input, shape index: {}]   ;;  %s43_s1 = inlined_call_operand.vmem [shape: s32[16], index: 1, kind: output, shape index: {}]  }
   0x1   :  { %v5_v0 = vld [vmem:[%s42_s0] sm:$0x3]  ;;  %s25_s0 = smov 8  }
   0x2   :  { %6 = vst [vmem:[#allocation1] sm:$0x3] %v5_v0 }
   0x9   :  { %v11_v1 = vld [vmem:[#allocation1 + $0x1] sm:$0x1]   ;;  %v7_v2 = vld [vmem:[#allocation1] sm:$0x1]  }
   0xa   :  { %12 = vrot.lane.b32.xlu0 %v11_v1, %s25_s0  ;;  %9 = vst.msk [vmem:[#allocation0] sm:$0x1] %vm8_vm0, %v7_v2  }
  0x7c   :  { %v13_v3 = vpop.permute.xlu0 %12  }
  0x7d   :  { %15 = vst.msk [vmem:[#allocation0] sm:$0x1] %vm14_vm1, %v13_v3  }
  0x84   :  { %v20_v4 = vld [vmem:[#allocation0] sm:$0x1] }
  0x85   :  { %23 = vst [vmem:[%s43_s1] sm:$0x1] %v20_v4 }

// kernel: eq.15
= control target key start
LH: loop header
LB: loop body
LE: loop exit
PB: predicated region body
PF: predicated region fallthrough
CT: control target
= control target key end

     0   :  { %vm8_vm0 = vcmask 130048   ;;  %vm14_vm1 = vcmask 261248   ;;  %s42_s0 = inlined_call_operand.vmem [shape: s32[2,16], index: 0, kind: input, shape index: {}]   ;;  %s43_s1 = inlined_call_operand.vmem [shape: s32[32], index: 1, kind: output, shape index: {}]  }
   0x1   :  { %v5_v0 = vld [vmem:[%s42_s0] sm:$0x3]  ;;  %s25_s0 = smov 16  }
   0x2   :  { %6 = vst [vmem:[#allocation1] sm:$0x3] %v5_v0 }
   0x9   :  { %v11_v1 = vld [vmem:[#allocation1 + $0x1] sm:$0x1]   ;;  %v7_v2 = vld [vmem:[#allocation1] sm:$0x1]  }
   0xa   :  { %12 = vrot.lane.b32.xlu0 %v11_v1, %s25_s0  ;;  %9 = vst.msk [vmem:[#allocation0] sm:$0x1] %vm8_vm0, %v7_v2  }
  0x7c   :  { %v13_v3 = vpop.permute.xlu0 %12  }
  0x7d   :  { %15 = vst.msk [vmem:[#allocation0] sm:$0x1] %vm14_vm1, %v13_v3  }
  0x84   :  { %v20_v4 = vld [vmem:[#allocation0] sm:$0x1] }
  0x85   :  { %23 = vst [vmem:[%s43_s1] sm:$0x1] %v20_v4 }

// kernel: cross_attention_block.1
= control target key start
LH: loop header
LB: loop body
LE: loop exit
PB: predicated region body
PF: predicated region fallthrough
CT: control target
= control target key end

     0   :  { %s5166_s6 = smov 1   ;;  %s5167_s10 = smov 2   ;;  %s6021_s0 = inlined_call_operand.smem [shape: u32[36], index: -1, kind: input, shape index: {}] }
   0x1   :  { %s5228_s5 = sld [smem:[%s6021_s0]]   ;;  %s5168_s14 = smov 3  }
   0x2   :  { %s5233_s9 = sld [smem:[%s6021_s0 + %s5166_s6]]   ;;  %s5169_s18 = smov 4  }
   0x3   :  { %s5238_s13 = sld [smem:[%s6021_s0 + %s5167_s10]]   ;;  %s5170_s22 = smov 5  }
   0x4   :  { %s5243_s17 = sld [smem:[%s6021_s0 + %s5168_s14]]   ;;  %s5171_s26 = smov 6  }
   0x5   :  { %s5248_s21 = sld [smem:[%s6021_s0 + %s5169_s18]]   ;;  %s5172_s30 = smov 7  }
   0x6   :  { %s5253_s25 = sld [smem:[%s6021_s0 + %s5170_s22]]   ;;  %s5173_s4 = smov 8  }
   0x7   :  { %s5258_s29 = sld [smem:[%s6021_s0 + %s5171_s26]]   ;;  %s5174_s10 = smov 9  }
   0x8   :  { %s5263_s3 = sld [smem:[%s6021_s0 + %s5172_s30]]   ;;  %s5175_s15 = smov 10  }
   0x9   :  { %6034 = sst [smem:[#allocation26_spill]] %s5238_s13  ;;  %s5176_s20 = smov 11  }
   0xa   :  { %6035 = sst [smem:[#allocation27_spill]] %s5243_s17  ;;  %s5177_s26 = smov 12  }
   0xb   :  { %6036 = sst [smem:[#allocation28_spill]] %s5248_s21  ;;  %s5178_s1 = smov 13  }
   0xc   :  { %6037 = sst [smem:[#allocation29_spill]] %s5253_s25  ;;  %s5179_s7 = smov 14  }
   0xd   :  { %s5268_s8 = sld [smem:[%s6021_s0 + %s5173_s4]]   ;;  %s5181_s22 = smov 16  }
   0xe   :  { %s5273_s14 = sld [smem:[%s6021_s0 + %s5174_s10]]   ;;  %s5182_s28 = smov 17  }
   0xf   :  { %s5278_s19 = sld [smem:[%s6021_s0 + %s5175_s15]]   ;;  %s5180_s15 = smov 15  }
  0x10   :  { %s5283_s24 = sld [smem:[%s6021_s0 + %s5176_s20]]  }
  0x11   :  { %s5288_s30 = sld [smem:[%s6021_s0 + %s5177_s26]]  }
  0x12   :  { %s5293_s6 = sld [smem:[%s6021_s0 + %s5178_s1]]  }
  0x13   :  { %s5298_s12 = sld [smem:[%s6021_s0 + %s5179_s7]]   ;;  %s5183_s7 = smov 18  }
  0x14   :  { %s5303_s20 = sld [smem:[%s6021_s0 + %s5180_s15]]   ;;  %s5184_s15 = smov 19  }
  0x15   :  { %6038 = sst [smem:[#allocation30_spill]] %s5278_s19 }
  0x16   :  { %6039 = sst [smem:[#allocation31_spill]] %s5283_s24 }
  0x17   :  { %s5308_s27 = sld [smem:[%s6021_s0 + %s5181_s22]]   ;;  %s5185_s22 = smov 20  }
  0x18   :  { %s5313_s4 = sld [smem:[%s6021_s0 + %s5182_s28]]   ;;  %s5186_s28 = smov 21  }
  0x19   :  { %6040 = sst [smem:[#allocation32_spill]] %s5298_s12 }
  0x1a   :  { %s5318_s13 = sld [smem:[%s6021_s0 + %s5183_s7]]   ;;  %s5187_s7 = smov 22  }
  0x1b   :  { %s5323_s25 = sld [smem:[%s6021_s0 + %s5184_s15]]   ;;  %s5188_s15 = smov 23  }
  0x1c   :  { %s5328_s17 = sld [smem:[%s6021_s0 + %s5185_s22]]   ;;  %s5189_s22 = smov 24  }
  0x1d   :  { %6041 = sst [smem:[#allocation33_spill]] %s5308_s27 }
  0x1e   :  { %6042 = sst [smem:[#allocation34_spill]] %s5313_s4 }
  0x1f   :  { %s5333_s4 = sld [smem:[%s6021_s0 + %s5186_s28]]   ;;  %s5190_s28 = smov 25  }
  0x20   :  { %s5338_s27 = sld [smem:[%s6021_s0 + %s5187_s7]]   ;;  %s5191_s7 = smov 26  }
  0x21   :  { %s5343_s12 = sld [smem:[%s6021_s0 + %s5188_s15]]   ;;  %s5192_s15 = smov 27  }
  0x22   :  { %6043 = sst [smem:[#allocation35_spill]] %s5328_s17 }
  0x23   :  { %s5348_s17 = sld [smem:[%s6021_s0 + %s5189_s22]]   ;;  %s5193_s22 = smov 28  }
  0x24   :  { %s5353_s24 = sld [smem:[%s6021_s0 + %s5190_s28]]   ;;  %s5194_s28 = smov 29  }
  0x25   :  { %s5363_s19 = sld [smem:[%s6021_s0 + %s5192_s15]]   ;;  %s5196_s15 = smov 31  }
  0x26   :  { %6044 = sst [smem:[#allocation36_spill]] %s5338_s27 }
  0x27   :  { %s5358_s27 = sld [smem:[%s6021_s0 + %s5191_s7]]   ;;  %s5195_s7 = smov 30  }
  0x28   :  { %s5373_s21 = sld [smem:[%s6021_s0 + %s5194_s28]]   ;;  %s5198_s28 = smov 33  }
  0x29   :  { %6045 = sst [smem:[#allocation37_spill]] %s5348_s17 }
  0x2a   :  { %s5368_s17 = sld [smem:[%s6021_s0 + %s5193_s22]]   ;;  %s5197_s22 = smov 32  }
  0x2b   :  { %6047 = sst [smem:[#allocation39_spill]] %s5363_s19 }
  0x2c   :  { %s5383_s19 = sld [smem:[%s6021_s0 + %s5196_s15]]   ;;  %s5200_s15 = smov 35  }
  0x2d   :  { %6046 = sst [smem:[#allocation38_spill]] %s5358_s27 }
  0x2e   :  { %6049 = sst [smem:[#allocation41_spill]] %s5373_s21 }
  0x2f   :  { %s5378_s27 = sld [smem:[%s6021_s0 + %s5195_s7]]   ;;  %s5199_s7 = smov 34  }
  0x30   :  { %6048 = sst [smem:[#allocation40_spill]] %s5368_s17 }
  0x31   :  { %s5388_s17 = sld [smem:[%s6021_s0 + %s5197_s22]]  }
  0x32   :  { %6051 = sst [smem:[#allocation43_spill]] %s5383_s19 }
  0x33   :  { %s5393_s21 = sld [smem:[%s6021_s0 + %s5198_s28]]  }
  0x34   :  { %s5403_s19 = sld [smem:[%s6021_s0 + %s5200_s15]]  }
  0x35   :  { %6050 = sst [smem:[#allocation42_spill]] %s5378_s27 }
  0x36   :  { %s5398_s27 = sld [smem:[%s6021_s0 + %s5199_s7]]  }
  0x37   :  { %77 = vsyncpa [#allocation3], 0 }
  0x38   :  { %78 = vsyncpa [#allocation6], 0 }
  0x39   :  { %79 = vsyncpa [#allocation9], 0 }
  0x3a   :  { %80 = vsyncpa [#allocation12], 0 }
  0x3b   :  { %81 = vsyncpa [#allocation15], 0 }
  0x3c   :  { %82 = vsyncpa [#allocation4], 0 }
  0x3d   :  { %83 = vsyncpa [#allocation18], 0  ;;  %s5201_s22 = smov [#allocation5]   ;;  %s5202_s26 = smov [#allocation8]  }
  0x3e   :  { %s124_s23 = sshll.u32 %s5201_s22, 4  ;;  %s150_s28 = sshll.u32 %s5202_s26, 4  ;;  %s125_s23 = int_to_ptr.vmem [resolvable:$true] %s124_s23  ;;  %s151_s28 = int_to_ptr.vmem [resolvable:$true] %s150_s28 }
  0x3f   :  { %s4960_s1 = scalar_lea.vmem %s125_s23, 16  ;;  %s4964_s2 = scalar_lea.vmem %s125_s23, 32 }
  0x40   :  { %p4961_p0 = scmp.ne.s32.totalorder %s125_s23, %s4960_s1  ;;  %p4965_p1 = scmp.lt.s32.totalorder %s125_s23, %s125_s23 }
  0x41   :  { %p4966_p2 = scmp.lt.s32.totalorder %s4964_s2, %s4960_s1 }
  0x43   :  { %p4967_p3 = por %p4966_p2, %p4965_p1 }
  0x45   :  { %p4968_p4 = pnand %p4967_p3, %p4961_p0 }
  0x47   :  { %4971 = shalt.err (!%p4968_p4)
}
  0x48   :  { %127 = dma.hbm_to_vmem [thread:$0]  %s5293_s6, 16, %s125_s23, [#allocation6]  }
  0x49   :  { %s4980_s0 = scalar_lea.vmem %s151_s28, 16  ;;  %s4984_s7 = scalar_lea.vmem %s151_s28, 32 }
  0x4a   :  { %p4981_p5 = scmp.ne.s32.totalorder %s151_s28, %s4980_s0  ;;  %p4985_p6 = scmp.lt.s32.totalorder %s151_s28, %s151_s28 }
  0x4b   :  { %p4986_p7 = scmp.lt.s32.totalorder %s4984_s7, %s4980_s0 }
  0x4d   :  { %p4987_p8 = por %p4986_p7, %p4985_p6 }
  0x4f   :  { %p4988_p9 = pnand %p4987_p8, %p4981_p5 }
  0x51   :  { %4991 = shalt.err (!%p4988_p9)
}
  0x52   :  { %153 = dma.hbm_to_vmem [thread:$0]  %s5318_s13, 16, %s151_s28, [#allocation9]  }
  0x53   :  { %s5203_s10 = smov [#allocation11]   ;;  %s5204_s15 = smov [#allocation2]  }
  0x54   :  { %s172_s11 = sshll.u32 %s5203_s10, 4  ;;  %s114_s16 = sshll.u32 %s5204_s15, 4  ;;  %s173_s11 = int_to_ptr.vmem [resolvable:$true] %s172_s11  ;;  %s115_s16 = int_to_ptr.vmem [resolvable:$true] %s114_s16 }
  0x55   :  { %s5000_s18 = scalar_lea.vmem %s173_s11, 16  ;;  %s5004_s22 = scalar_lea.vmem %s173_s11, 32 }
  0x56   :  { %p5001_p10 = scmp.ne.s32.totalorder %s173_s11, %s5000_s18  ;;  %p5005_p11 = scmp.lt.s32.totalorder %s173_s11, %s173_s11 }
  0x57   :  { %p5006_p12 = scmp.lt.s32.totalorder %s5004_s22, %s5000_s18 }
  0x59   :  { %p5007_p13 = por %p5006_p12, %p5005_p11 }
  0x5b   :  { %p5008_p0 = pnand %p5007_p13, %p5001_p10 }
  0x5d   :  { %5011 = shalt.err (!%p5008_p0)
}
  0x5e   :  { %175 = dma.hbm_to_vmem [thread:$0]  %s5333_s4, 16, %s173_s11, [#allocation12]  }
  0x5f   :  { %s5020_s6 = scalar_lea.vmem %s115_s16, 16  ;;  %s5024_s23 = scalar_lea.vmem %s115_s16, 32 }
  0x60   :  { %p5021_p1 = scmp.ne.s32.totalorder %s115_s16, %s5020_s6  ;;  %p5025_p2 = scmp.lt.s32.totalorder %s115_s16, %s115_s16 }
  0x61   :  { %p5026_p3 = scmp.lt.s32.totalorder %s5024_s23, %s5020_s6 }
  0x63   :  { %p5027_p4 = por %p5026_p3, %p5025_p2 }
  0x65   :  { %p5028_p5 = pnand %p5027_p4, %p5021_p1 }
  0x67   :  { %5031 = shalt.err (!%p5028_p5)
}
  0x68   :  { %117 = dma.hbm_to_vmem [thread:$0]  %s5288_s30, 16, %s115_s16, [#allocation3]  }
  0x69   :  { %s5205_s13 = smov [#allocation7]   ;;  %s5206_s28 = smov [#allocation10]  }
  0x6a   :  { %s136_s26 = sshll.u32 %s5205_s13, 4  ;;  %s160_s1 = sshll.u32 %s5206_s28, 4  ;;  %s137_s26 = int_to_ptr.vmem [resolvable:$true] %s136_s26  ;;  %s161_s1 = int_to_ptr.vmem [resolvable:$true] %s160_s1 }
  0x6b   :  { %s5040_s2 = scalar_lea.vmem %s137_s26, 16  ;;  %s5044_s0 = scalar_lea.vmem %s137_s26, 32 }
  0x6c   :  { %p5041_p6 = scmp.ne.s32.totalorder %s137_s26, %s5040_s2  ;;  %p5045_p7 = scmp.lt.s32.totalorder %s137_s26, %s137_s26 }
  0x6d   :  { %p5046_p8 = scmp.lt.s32.totalorder %s5044_s0, %s5040_s2 }
  0x6f   :  { %p5047_p9 = por %p5046_p8, %p5045_p7 }
  0x71   :  { %p5048_p10 = pnand %p5047_p9, %p5041_p6 }
  0x73   :  { %5051 = shalt.err (!%p5048_p10)
}
  0x74   :  { %139 = dma.hbm_to_vmem [thread:$0]  %s5303_s20, 16, %s137_s26, [#allocation6]  }
  0x75   :  { %s5060_s4 = scalar_lea.vmem %s161_s1, 16  ;;  %s5064_s7 = scalar_lea.vmem %s161_s1, 32 }
  0x76   :  { %p5061_p11 = scmp.ne.s32.totalorder %s161_s1, %s5060_s4  ;;  %p5065_p12 = scmp.lt.s32.totalorder %s161_s1, %s161_s1 }
  0x77   :  { %p5066_p13 = scmp.lt.s32.totalorder %s5064_s7, %s5060_s4 }
  0x79   :  { %p5067_p0 = por %p5066_p13, %p5065_p12 }
  0x7b   :  { %p5068_p1 = pnand %p5067_p0, %p5061_p11 }
  0x7d   :  { %5071 = shalt.err (!%p5068_p1)
}
  0x7e   :  { %163 = dma.hbm_to_vmem [thread:$0]  %s5323_s25, 16, %s161_s1, [#allocation9]  }
  0x7f   :  { %s5207_s30 = smov [#allocation13]   ;;  %s5208_s11 = smov [#allocation14]  }
  0x80   :  { %s184_s10 = sshll.u32 %s5207_s30, 4  ;;  %s196_s15 = sshll.u32 %s5208_s11, 4  ;;  %s185_s10 = int_to_ptr.vmem [resolvable:$true] %s184_s10  ;;  %s197_s15 = int_to_ptr.vmem [resolvable:$true] %s196_s15 }
  0x81   :  { %s5080_s16 = scalar_lea.vmem %s185_s10, 16  ;;  %s5084_s18 = scalar_lea.vmem %s185_s10, 32 }
  0x82   :  { %p5081_p2 = scmp.ne.s32.totalorder %s185_s10, %s5080_s16  ;;  %p5085_p3 = scmp.lt.s32.totalorder %s185_s10, %s185_s10 }
  0x83   :  { %p5086_p4 = scmp.lt.s32.totalorder %s5084_s18, %s5080_s16 }
  0x85   :  { %p5087_p5 = por %p5086_p4, %p5085_p3 }
  0x87   :  { %p5088_p6 = pnand %p5087_p5, %p5081_p2 }
  0x89   :  { %5091 = shalt.err (!%p5088_p6)
}
  0x8a   :  { %187 = dma.hbm_to_vmem [thread:$0]  %s5343_s12, 16, %s185_s10, [#allocation12]  }
  0x8b   :  { %s5100_s20 = scalar_lea.vmem %s197_s15, 16  ;;  %s5104_s22 = scalar_lea.vmem %s197_s15, 32 }
  0x8c   :  { %p5101_p7 = scmp.ne.s32.totalorder %s197_s15, %s5100_s20  ;;  %p5105_p8 = scmp.lt.s32.totalorder %s197_s15, %s197_s15 }
  0x8d   :  { %p5106_p9 = scmp.lt.s32.totalorder %s5104_s22, %s5100_s20 }
  0x8f   :  { %p5107_p10 = por %p5106_p9, %p5105_p8 }
  0x91   :  { %p5108_p11 = pnand %p5107_p10, %p5101_p7 }
  0x93   :  { %5111 = shalt.err (!%p5108_p11)
}
  0x94   :  { %199 = dma.hbm_to_vmem [thread:$0]  %s5353_s24, 16, %s197_s15, [#allocation15]  }
  0x95   :  { %5152 = dma.done.wait [#allocation3], 16  }
  0x96   :  { %5153 = vsyncadd [#allocation3], 4294967280 }
  0x97   :  { %5154 = dma.done.wait [#allocation6], 32  }
  0x98   :  { %5155 = vsyncadd [#allocation6], 4294967264 }
  0x99   :  { %5156 = dma.done.wait [#allocation9], 32  }
  0x9a   :  { %5157 = vsyncadd [#allocation9], 4294967264 }
  0x9b   :  { %5158 = dma.done.wait [#allocation12], 32  }
  0x9c   :  { %5159 = vsyncadd [#allocation12], 4294967264 }
  0x9d   :  { %5160 = dma.done.wait [#allocation15], 16  }
  0x9e   :  { %5161 = vsyncadd [#allocation15], 4294967280  ;;  %v362_v0 = vld [vmem:[%s5268_s8 + $0x18] sm:$0xff]  ;;  %v361_v1 = vld [vmem:[%s5268_s8 + $0x10] sm:$0xff]  ;;  %vm261_vm0 = vcmask 261120   ;;  %vm455_vm1 = vcmask 64512  }
  0x9f   :  { %v253_v2 = vld [vmem:[%s5258_s29 + $0x18] sm:$0xff]  ;;  %4422 = vmatprep.subr.mxu1 %v362_v0  ;;  %v252_v3 = vld [vmem:[%s5258_s29 + $0x10] sm:$0xff]  ;;  %v360_v4 = vld [vmem:[%s5268_s8 + $0x8] sm:$0xff]  ;;  %vm567_vm2 = vcmask 130048   ;;  %s5209_s25 = smov 96   ;;  %s5213_s24 = smov 80  }
  0xa0   :  { %4408 = vmatprep.subr.mxu0 %v253_v2  ;;  %4423 = vmatpush3.msra.mxu1 %v362_v0  ;;  %v244_v5 = vld [vmem:[%s5233_s9] sm:$0xff]  ;;  %v251_v6 = vld [vmem:[%s5258_s29 + $0x8] sm:$0xff]  ;;  %v5432_v12 = vld [vmem:[%s5228_s5 + $0x10] sm:$0xff]  ;;  %s5214_s12 = smov 104   ;;  %s5215_s6 = smov 72  }
  0xa1   :  { %4409 = vmatpush3.msra.mxu0 %v253_v2  ;;  %4424 = vmatprep.subr.mxu1 %v361_v1  ;;  %v359_v7 = vld [vmem:[%s5268_s8] sm:$0xff]  ;;  %v245_v9 = vld [vmem:[%s5233_s9 + $0x8] sm:$0xff]  ;;  %v5441_v13 = vld [vmem:[%s5228_s5 + $0x18] sm:$0xff]  ;;  %s5211_s8 = smov 88   ;;  %s6054_s23 = sld [smem:[#allocation31_spill]] }
  0xa2   :  { %4410 = vmatprep.subr.mxu0 %v252_v3  ;;  %4425 = vmatpush3.msra.mxu1 %v361_v1  ;;  %v250_v8 = vld [vmem:[%s5258_s29] sm:$0xff]  ;;  %v5428_v11 = vld [vmem:[%s5228_s5 + $0x8] sm:$0xff]  ;;  %s5210_s29 = smov 120   ;;  %s6055_s13 = sld [smem:[#allocation32_spill]] }
  0xa3   :  { %4411 = vmatpush3.msra.mxu0 %v252_v3  ;;  %4426 = vmatprep.subr.mxu1 %v360_v4  ;;  %v5425_v10 = vld [vmem:[%s5228_s5] sm:$0xff]  ;;  %s6052_s5 = sld [smem:[#allocation28_spill]]  ;;  %s5216_s18 = smov [#allocation16]  }
  0xa4   :  { %4430 = vmatprep.mubr.msk.f32.mxu1 %vm261_vm0, %v244_v5  ;;  %4427 = vmatpush3.msra.mxu1 %v360_v4  ;;  %v4073_v14 = vld [vmem:[%s5273_s14] ss:$0 sm:$0xff]  ;;  %s5212_s14 = smov 112   ;;  %s6056_s26 = sld [smem:[#allocation33_spill]] }
  0xa5   :  { %4412 = vmatprep.subr.mxu0 %v251_v6  ;;  %4428 = vmatprep.subr.mxu1 %v359_v7  ;;  %v4068_v19 = vld [vmem:[%s5263_s3] ss:$0 sm:$0xff]  ;;  %s6053_s3 = sld [smem:[#allocation30_spill]]  ;;  %s4001_s20 = sshll.u32 %s5216_s18, 4  ;;  %s4002_s20 = int_to_ptr.vmem [resolvable:$true] %s4001_s20 }
  0xa6   :  { %4413 = vmatpush3.msra.mxu0 %v251_v6  ;;  %4429 = vmatpush3.msra.mxu1 %v359_v7  ;;  %s6057_s28 = sld [smem:[#allocation34_spill]]  ;;  %s5112_s22 = scalar_lea.vmem %s4002_s20, 512 }
  0xa7   :  { %4414 = vmatprep.subr.mxu0 %v250_v8  ;;  %4431 = vmatmul.mubr.msk.f32.vlgmr.msra.gmra.mxu1 %vm261_vm0, %v245_v9  ;;  %s6058_s1 = sld [smem:[#allocation27_spill]]  ;;  %p5113_p12 = scmp.ne.s32.totalorder %s4002_s20, %s5112_s22 }
  0xa8   :  { %4415 = vmatpush3.msra.mxu0 %v250_v8  ;;  %4416 = vmatprep.mubr.msk.f32.mxu0 %vm261_vm0, %v5425_v10  ;;  %s6059_s2 = sld [smem:[#allocation35_spill]]  ;;  %p5117_p13 = scmp.lt.s32.totalorder %s4002_s20, %s4002_s20 }
  0xa9   :  { %4417 = vmatmul.mubr.msk.f32.vlgmr.msra.gmra.mxu0 %vm261_vm0, %v5428_v11  ;;  %v5476_v30 = vld [vmem:[%s6052_s5] sm:$0xff]  ;;  %v5479_v34 = vld [vmem:[%s6052_s5 + $0x8] sm:$0xff]  ;;  %v5483_v37 = vld [vmem:[%s6052_s5 + $0x10] sm:$0xff]  ;;  %s6060_s0 = sld [smem:[#allocation36_spill]]  ;;  %p5118_p0 = scmp.lt.s32.totalorder %s5112_s22, %s5112_s22 }
  0xaa   :  { %4419 = vmatprep.mubr.msk.f32.mxu0 %vm261_vm0, %v5432_v12  ;;  %v5488_v42 = vld [vmem:[%s6052_s5 + $0x18] sm:$0xff]  ;;  %s6062_s4 = sld [smem:[#allocation37_spill]] }
  0xab   :  { %s6063_s7 = sld [smem:[#allocation40_spill]]  ;;  %p5119_p1 = por %p5118_p0, %p5117_p13 }
  0xac   :  { %s6064_s30 = sld [smem:[#allocation42_spill]] }
  0xad   :  { %4420 = vmatmul.mubr.msk.f32.gmra.mxu0 %vm261_vm0, %v5441_v13  ;;  %s6065_s10 = sld [smem:[#allocation38_spill]]  ;;  %p5120_p2 = pnand %p5119_p1, %p5113_p12 }
  0xae   :  { %s6066_s11 = sld [smem:[#allocation39_spill]] }
  0xaf   :  { %s6067_s15 = sld [smem:[#allocation41_spill]] }
  0xb0   :  { %s6068_s16 = sld [smem:[#allocation43_spill]] }
 0x167   :  { %v4432_v15 = vpop.f32.mrf.mxu1 }
 0x168   :  { %v5446_v16 = vadd.f32 %v4432_v15, %v4073_v14 }
 0x169   :  { %v442_v17 = vpop.f32.mrf.mxu1  ;;  %v4418_v18 = vpop.f32.mrf.mxu0 }
 0x16a   :  { %v5449_v20 = vadd.f32 %v4073_v14, %v442_v17  ;;  %4433 = vmatprep.subr.msk.mxu0 %vm455_vm1, %v5446_v16  ;;  %v5463_v25 = vadd.f32 %v4418_v18, %v4068_v19 }
 0x16b   :  { %4434 = vmatpush3.xpose.msk.msra.mxu0 %vm455_vm1, %v5446_v16  ;;  %v340_v21 = vpop.f32.mrf.mxu0 }
 0x16c   :  { %4435 = vmatprep.subr.msk.mxu0 %vm455_vm1, %v5449_v20  ;;  %v5457_v22 = vadd.f32 %v4068_v19, %v340_v21 }
 0x16d   :  { %v4421_v23 = vpop.f32.mrf.mxu0 }
 0x16e   :  { %4437 = vmatprep.mubr.msk.f32.mxu0 %vm455_vm1, %v5457_v22  ;;  %v5471_v27 = vadd.f32 %v4421_v23, %v4068_v19 }
 0x16f   :  { %4436 = vmatpush3.xpose.msk.msra.mxu0 %vm455_vm1, %v5449_v20  ;;  %v350_v24 = vpop.f32.mrf.mxu0 }
 0x170   :  { %v5465_v26 = vadd.f32 %v4068_v19, %v350_v24 }
 0x172   :  { %4438 = vmatmul.mubr.msk.f32.vlgmr.msra.gmra.mxu0 %vm455_vm1, %v5463_v25 }
 0x173   :  { %4440 = vmatprep.mubr.msk.f32.mxu0 %vm455_vm1, %v5465_v26 }
 0x176   :  { %4441 = vmatmul.mubr.msk.f32.gmra.mxu0 %vm455_vm1, %v5471_v27 }
 0x232   :  { %v4439_v28 = vpop.f32.mrf.mxu0 }
 0x233   :  { %v560_v31 = vmul.f32 0.35355338, %v4439_v28 }
 0x234   :  { %v540_v29 = vpop.f32.mrf.mxu0 }
 0x235   :  { %v559_v32 = vmul.f32 0.35355338, %v540_v29  ;;  %v564_v41 = vadd.f32 %v560_v31, %v5479_v34 }
 0x236   :  { %v4442_v33 = vpop.f32.mrf.mxu0 }
 0x237   :  { %v563_v35 = vadd.f32 %v559_v32, %v5476_v30  ;;  %v562_v38 = vmul.f32 0.35355338, %v4442_v33  ;;  %v571_v44 = vsel %vm567_vm2, %v564_v41, -inf }
 0x238   :  { %v550_v36 = vpop.f32.mrf.mxu0 }
 0x239   :  { %v561_v39 = vmul.f32 0.35355338, %v550_v36  ;;  %v568_v40 = vsel %vm567_vm2, %v563_v35, -inf  ;;  %v566_v46 = vadd.f32 %v562_v38, %v5488_v42 }
 0x23a   :  { %569 = vmax.xlane.f32.xlu0 %v568_v40 }
 0x23b   :  { %v565_v43 = vadd.f32 %v561_v39, %v5483_v37  ;;  %v577_v47 = vsel %vm567_vm2, %v566_v46, -inf }
 0x23d   :  { %v574_v45 = vsel %vm567_vm2, %v565_v43, -inf }
 0x23e   :  { %572 = vmax.xlane.f32.xlu0 %v571_v44  ;;  %575 = vmax.xlane.f32.xlu1 %v574_v45 }
 0x242   :  { %578 = vmax.xlane.f32.xlu1 %v577_v47 }
 0x2c3   :  { %v570_v48 = vpop.xlane.xlu0 %569 }
 0x2c4   :  { %v580_v49 = vsub.f32 %v563_v35, %v570_v48 }
 0x2c6   :  { %v584_v50 = vmul.f32 1.442695, %v580_v49 }
 0x2c7   :  { %v573_v51 = vpop.xlane.xlu0 %572  ;;  %v576_v52 = vpop.xlane.xlu1 %575 }
 0x2c8   :  { %4830 = vpow2.f32 %v584_v50  ;;  %v581_v53 = vsub.f32 %v564_v41, %v573_v51  ;;  %v582_v54 = vsub.f32 %v565_v43, %v576_v52 }
 0x2ca   :  { %v586_v55 = vmul.f32 1.442695, %v581_v53  ;;  %v588_v56 = vmul.f32 1.442695, %v582_v54 }
 0x2cb   :  { %v579_v57 = vpop.xlane.xlu1 %578 }
 0x2cc   :  { %4832 = vpow2.f32 %v586_v55  ;;  %v583_v58 = vsub.f32 %v566_v46, %v579_v57 }
 0x2cd   :  { %4834 = vpow2.f32 %v588_v56 }
 0x2ce   :  { %v590_v59 = vmul.f32 1.442695, %v583_v58 }
 0x2d0   :  { %4836 = vpow2.f32 %v590_v59 }
 0x2d5   :  { %v4831_v60 = vpop.eup %4830 }
 0x2d6   :  { %v592_v61 = vsel %vm567_vm2, %v4831_v60, 0.0 }
 0x2d7   :  { %593 = vadd.xlane.f32.xlu0 %v592_v61 }
 0x2d9   :  { %v4833_v62 = vpop.eup %4832 }
 0x2da   :  { %v4835_v63 = vpop.eup %4834  ;;  %v595_v0 = vsel %vm567_vm2, %v4833_v62, 0.0 }
 0x2db   :  { %596 = vadd.xlane.f32.xlu1 %v595_v0  ;;  %v598_v1 = vsel %vm567_vm2, %v4835_v63, 0.0 }
 0x2dc   :  { %599 = vadd.xlane.f32.xlu0 %v598_v1 }
 0x2dd   :  { %v4837_v2 = vpop.eup %4836 }
 0x2de   :  { %v601_v3 = vsel %vm567_vm2, %v4837_v2, 0.0 }
 0x2df   :  { %602 = vadd.xlane.f32.xlu1 %v601_v3 }
 0x2f0   :  { %612 = vrot.lane.b32.xlu1 %v5449_v20, %s5209_s25 }
 0x2f2   :  { %614 = vrot.lane.b32.xlu0 %v5446_v16, %s5209_s25 }
 0x2f4   :  { %725 = vrot.lane.b32.xlu1 %v5446_v16, %s5210_s29 }
 0x2f6   :  { %715 = vrot.lane.b32.xlu0 %v5457_v22, %s5210_s29 }
 0x2f8   :  { %723 = vrot.lane.b32.xlu1 %v5449_v20, %s5210_s29 }
 0x2fa   :  { %719 = vrot.lane.b32.xlu0 %v5465_v26, %s5210_s29 }
 0x2fc   :  { %717 = vrot.lane.b32.xlu1 %v5463_v25, %s5210_s29 }
 0x300   :  { %721 = vrot.lane.b32.xlu1 %v5471_v27, %s5210_s29 }
 0x360   :  { %v594_v4 = vpop.xlane.xlu0 %593 }
 0x361   :  { %4838 = vrcp.f32 %v594_v4 }
 0x364   :  { %v597_v5 = vpop.xlane.xlu1 %596 }
 0x365   :  { %v600_v6 = vpop.xlane.xlu0 %599  ;;  %4840 = vrcp.f32 %v597_v5 }
 0x366   :  { %4842 = vrcp.f32 %v600_v6 }
 0x368   :  { %v603_v7 = vpop.xlane.xlu1 %602 }
 0x369   :  { %v615_v8 = vpop.permute.xlu0 %614  ;;  %4844 = vrcp.f32 %v603_v7 }
 0x36a   :  { %4443 = vmatprep.subr.mxu1 %v615_v8 }
 0x36b   :  { %4444 = vmatpush3.msra.mxu1 %v615_v8 }
 0x36c   :  { %v613_v9 = vpop.permute.xlu1 %612 }
 0x36d   :  { %4445 = vmatprep.subr.mxu1 %v613_v9  ;;  %v716_v29 = vpop.permute.xlu0 %715 }
 0x36e   :  { %v4839_v14 = vpop.eup %4838  ;;  %4446 = vmatpush3.msra.mxu1 %v613_v9 }
 0x36f   :  { %v608_v15 = vmul.f32 %v4839_v14, %v4831_v60 }
 0x370   :  { %v726_v17 = vpop.permute.xlu1 %725 }
 0x371   :  { %4447 = vmatprep.mubr.msk.f32.mxu1 %vm567_vm2, %v608_v15  ;;  %4453 = vmatprep.subr.msk.mxu1 %vm455_vm1, %v726_v17  ;;  %v720_v33 = vpop.permute.xlu0 %719 }
 0x372   :  { %v4841_v18 = vpop.eup %4840 }
 0x373   :  { %v4843_v19 = vpop.eup %4842  ;;  %v609_v21 = vmul.f32 %v4841_v18, %v4833_v62 }
 0x374   :  { %v724_v23 = vpop.permute.xlu1 %723  ;;  %v610_v24 = vmul.f32 %v4843_v19, %v4835_v63  ;;  %v452_v19 = vld [vmem:[%s6053_s3 + $0x8] sm:$0xff] }
 0x375   :  { %4448 = vmatmul.mubr.msk.f32.vlgmr.msra.gmra.mxu1 %vm567_vm2, %v609_v21 }
 0x376   :  { %v4845_v28 = vpop.eup %4844  ;;  %4454 = vmatpush3.xpose.msk.msra.mxu1 %vm455_vm1, %v726_v17  ;;  %4450 = vmatprep.mubr.msk.f32.mxu1 %vm567_vm2, %v610_v24 }
 0x377   :  { %4455 = vmatprep.subr.msk.mxu1 %vm455_vm1, %v724_v23  ;;  %v611_v31 = vmul.f32 %v4845_v28, %v4837_v2 }
 0x378   :  { %v718_v32 = vpop.permute.xlu1 %717 }
 0x379   :  { %4451 = vmatmul.mubr.msk.f32.gmra.mxu1 %vm567_vm2, %v611_v31 }
 0x37a   :  { %4456 = vmatpush3.xpose.msk.msra.mxu1 %vm455_vm1, %v724_v23  ;;  %4457 = vmatprep.mubr.msk.f32.mxu1 %vm455_vm1, %v716_v29 }
 0x37b   :  { %4473 = vmatprep.subr.mxu1 %v452_v19 }
 0x37c   :  { %v722_v35 = vpop.permute.xlu1 %721 }
 0x37d   :  { %4458 = vmatmul.mubr.msk.f32.vlgmr.msra.gmra.mxu1 %vm455_vm1, %v718_v32  ;;  %v451_v32 = vld [vmem:[%s6053_s3] sm:$0xff] }
 0x37e   :  { %4460 = vmatprep.mubr.msk.f32.mxu1 %vm455_vm1, %v720_v33  ;;  %4474 = vmatpush3.msra.mxu1 %v452_v19 }
 0x381   :  { %4461 = vmatmul.mubr.msk.f32.gmra.mxu1 %vm455_vm1, %v722_v35 }
 0x435   :  { %v5527_v36 = vpop.f32.mrf.mxu1 }
 0x437   :  { %v5529_v38 = vpop.f32.mrf.mxu1 }
 0x439   :  { %v5531_v39 = vpop.f32.mrf.mxu1 }
 0x43b   :  { %v5533_v40 = vpop.f32.mrf.mxu1 }
 0x43d   :  { %v4459_v41 = vpop.f32.mrf.mxu1 }
 0x43e   :  { %v825_v43 = vmul.f32 0.35355338, %v4459_v41 }
 0x43f   :  { %v805_v44 = vpop.f32.mrf.mxu1 }
 0x440   :  { %v824_v45 = vmul.f32 0.35355338, %v805_v44  ;;  %v829_v46 = vadd.f32 %v825_v43, %v5479_v34 }
 0x441   :  { %v4462_v47 = vpop.f32.mrf.mxu1 }
 0x442   :  { %v835_v48 = vsel %vm567_vm2, %v829_v46, -inf  ;;  %v828_v49 = vadd.f32 %v824_v45, %v5476_v30  ;;  %v827_v51 = vmul.f32 0.35355338, %v4462_v47 }
 0x443   :  { %836 = vmax.xlane.f32.xlu1 %v835_v48  ;;  %v815_v50 = vpop.f32.mrf.mxu1 }
 0x444   :  { %v826_v52 = vmul.f32 0.35355338, %v815_v50  ;;  %v832_v53 = vsel %vm567_vm2, %v828_v49, -inf  ;;  %v831_v56 = vadd.f32 %v827_v51, %v5488_v42 }
 0x445   :  { %833 = vmax.xlane.f32.xlu0 %v832_v53 }
 0x446   :  { %v830_v54 = vadd.f32 %v826_v52, %v5483_v37  ;;  %v841_v57 = vsel %vm567_vm2, %v831_v56, -inf }
 0x448   :  { %v838_v55 = vsel %vm567_vm2, %v830_v54, -inf }
 0x449   :  { %839 = vmax.xlane.f32.xlu0 %v838_v55 }
 0x44d   :  { %842 = vmax.xlane.f32.xlu0 %v841_v57 }
 0x4cc   :  { %v837_v58 = vpop.xlane.xlu1 %836 }
 0x4cd   :  { %v845_v59 = vsub.f32 %v829_v46, %v837_v58 }
 0x4ce   :  { %v834_v60 = vpop.xlane.xlu0 %833 }
 0x4cf   :  { %v850_v61 = vmul.f32 1.442695, %v845_v59  ;;  %v844_v62 = vsub.f32 %v828_v49, %v834_v60 }
 0x4d1   :  { %4846 = vpow2.f32 %v850_v61  ;;  %v848_v63 = vmul.f32 1.442695, %v844_v62 }
 0x4d2   :  { %v840_v0 = vpop.xlane.xlu0 %839 }
 0x4d3   :  { %4848 = vpow2.f32 %v848_v63  ;;  %v846_v1 = vsub.f32 %v830_v54, %v840_v0 }
 0x4d5   :  { %v852_v2 = vmul.f32 1.442695, %v846_v1 }
 0x4d6   :  { %v843_v3 = vpop.xlane.xlu0 %842 }
 0x4d7   :  { %4850 = vpow2.f32 %v852_v2  ;;  %v847_v4 = vsub.f32 %v831_v56, %v843_v3 }
 0x4d9   :  { %v854_v5 = vmul.f32 1.442695, %v847_v4 }
 0x4db   :  { %4852 = vpow2.f32 %v854_v5 }
 0x4de   :  { %v4847_v6 = vpop.eup %4846 }
 0x4df   :  { %v859_v7 = vsel %vm567_vm2, %v4847_v6, 0.0 }
 0x4e0   :  { %v4849_v8 = vpop.eup %4848  ;;  %860 = vadd.xlane.f32.xlu1 %v859_v7 }
 0x4e1   :  { %v856_v9 = vsel %vm567_vm2, %v4849_v8, 0.0 }
 0x4e2   :  { %857 = vadd.xlane.f32.xlu0 %v856_v9 }
 0x4e4   :  { %v4851_v14 = vpop.eup %4850 }
 0x4e5   :  { %v862_v15 = vsel %vm567_vm2, %v4851_v14, 0.0 }
 0x4e6   :  { %863 = vadd.xlane.f32.xlu0 %v862_v15 }
 0x4e8   :  { %v4853_v17 = vpop.eup %4852 }
 0x4e9   :  { %v865_v18 = vsel %vm567_vm2, %v4853_v17, 0.0 }
 0x4ea   :  { %866 = vadd.xlane.f32.xlu1 %v865_v18 }
 0x4fb   :  { %876 = vrot.lane.b32.xlu1 %v5449_v20, %s5211_s8 }
 0x4fc   :  { %878 = vrot.lane.b32.xlu0 %v5446_v16, %s5211_s8 }
 0x4ff   :  { %1183 = vrot.lane.b32.xlu1 %v5446_v16, %s5212_s14 }
 0x500   :  { %1173 = vrot.lane.b32.xlu0 %v5457_v22, %s5212_s14 }
 0x503   :  { %1181 = vrot.lane.b32.xlu1 %v5449_v20, %s5212_s14 }
 0x504   :  { %1177 = vrot.lane.b32.xlu0 %v5465_v26, %s5212_s14 }
 0x507   :  { %1175 = vrot.lane.b32.xlu1 %v5463_v25, %s5212_s14 }
 0x50b   :  { %1179 = vrot.lane.b32.xlu1 %v5471_v27, %s5212_s14 }
 0x569   :  { %v861_v21 = vpop.xlane.xlu1 %860 }
 0x56a   :  { %4854 = vrcp.f32 %v861_v21 }
 0x56b   :  { %v858_v23 = vpop.xlane.xlu0 %857 }
 0x56c   :  { %4856 = vrcp.f32 %v858_v23 }
 0x56f   :  { %v864_v24 = vpop.xlane.xlu0 %863 }
 0x570   :  { %4858 = vrcp.f32 %v864_v24 }
 0x573   :  { %v879_v28 = vpop.permute.xlu0 %878  ;;  %v867_v29 = vpop.xlane.xlu1 %866 }
 0x574   :  { %4860 = vrcp.f32 %v867_v29  ;;  %4463 = vmatprep.subr.mxu0 %v879_v28 }
 0x575   :  { %4464 = vmatpush3.msra.mxu0 %v879_v28 }
 0x577   :  { %v877_v31 = vpop.permute.xlu1 %876  ;;  %v4855_v33 = vpop.eup %4854 }
 0x578   :  { %4465 = vmatprep.subr.mxu0 %v877_v31  ;;  %v873_v43 = vmul.f32 %v4855_v33, %v4847_v6  ;;  %v1174_v52 = vpop.permute.xlu0 %1173 }
 0x579   :  { %v4857_v35 = vpop.eup %4856  ;;  %4466 = vmatpush3.msra.mxu0 %v877_v31 }
 0x57a   :  { %v872_v41 = vmul.f32 %v4857_v35, %v4849_v8  ;;  %4481 = vmatprep.subr.mxu0 %v451_v32 }
 0x57b   :  { %v1184_v44 = vpop.permute.xlu1 %1183 }
 0x57c   :  { %4467 = vmatprep.mubr.msk.f32.mxu0 %vm567_vm2, %v872_v41  ;;  %4489 = vmatprep.subr.msk.mxu1 %vm455_vm1, %v1184_v44 }
 0x57d   :  { %v4859_v45 = vpop.eup %4858  ;;  %4468 = vmatmul.mubr.msk.f32.vlgmr.msra.gmra.mxu0 %vm567_vm2, %v873_v43 }
 0x57e   :  { %v874_v46 = vmul.f32 %v4859_v45, %v4851_v14  ;;  %4482 = vmatpush3.msra.mxu0 %v451_v32 }
 0x57f   :  { %v1182_v51 = vpop.permute.xlu1 %1181 }
 0x580   :  { %4470 = vmatprep.mubr.msk.f32.mxu0 %vm567_vm2, %v874_v46 }
 0x581   :  { %v4861_v47 = vpop.eup %4860 }
 0x582   :  { %v875_v48 = vmul.f32 %v4861_v47, %v4853_v17 }
 0x584   :  { %4471 = vmatmul.mubr.msk.f32.gmra.mxu0 %vm567_vm2, %v875_v48 }
 0x585   :  { %4483 = vmatprep.mubr.msk.f32.mxu0 %vm455_vm1, %v5529_v38 }
 0x588   :  { %4484 = vmatmul.mubr.msk.f32.vlgmr.msra.gmra.mxu0 %vm455_vm1, %v5527_v36 }
 0x589   :  { %4486 = vmatprep.mubr.msk.f32.mxu0 %vm455_vm1, %v5533_v40  ;;  %v1178_v40 = vpop.permute.xlu0 %1177 }
 0x58c   :  { %4487 = vmatmul.mubr.msk.f32.gmra.mxu0 %vm455_vm1, %v5531_v39  ;;  %v1176_v39 = vpop.permute.xlu1 %1175 }
 0x590   :  { %v1180_v53 = vpop.permute.xlu1 %1179 }
 0x63d   :  { %v4469_v49 = vpop.f32.mrf.mxu0 }
 0x63f   :  { %v960_v50 = vpop.f32.mrf.mxu0 }
 0x640   :  { %4475 = vmatprep.mubr.msk.f32.mxu1 %vm455_vm1, %v960_v50 }
 0x641   :  { %4476 = vmatmul.mubr.msk.f32.vlgmr.msra.gmra.mxu1 %vm455_vm1, %v4469_v49 }
 0x642   :  { %4490 = vmatpush3.xpose.msk.msra.mxu1 %vm455_vm1, %v1184_v44 }
 0x643   :  { %4491 = vmatprep.subr.msk.mxu1 %vm455_vm1, %v1182_v51 }
 0x644   :  { %v4472_v38 = vpop.f32.mrf.mxu0 }
 0x646   :  { %4492 = vmatpush3.xpose.msk.msra.mxu1 %vm455_vm1, %v1182_v51  ;;  %v970_v36 = vpop.f32.mrf.mxu0 }
 0x647   :  { %4478 = vmatprep.mubr.msk.f32.mxu1 %vm455_vm1, %v970_v36 }
 0x648   :  { %4479 = vmatmul.mubr.msk.f32.gmra.mxu1 %vm455_vm1, %v4472_v38 }
 0x649   :  { %4493 = vmatprep.mubr.msk.f32.mxu1 %vm455_vm1, %v1174_v52 }
 0x64c   :  { %4494 = vmatmul.mubr.msk.f32.vlgmr.msra.gmra.mxu1 %vm455_vm1, %v1176_v39 }
 0x64d   :  { %4496 = vmatprep.mubr.msk.f32.mxu1 %vm455_vm1, %v1178_v40 }
 0x650   :  { %4497 = vmatmul.mubr.msk.f32.gmra.mxu1 %vm455_vm1, %v1180_v53 }
 0x701   :  { %v5589_v54 = vpop.f32.mrf.mxu1 }
 0x703   :  { %v5591_v55 = vpop.f32.mrf.mxu1 }
 0x708   :  { %v5593_v56 = vpop.f32.mrf.mxu1 }
 0x70a   :  { %v5595_v57 = vpop.f32.mrf.mxu1 }
 0x70c   :  { %v4495_v58 = vpop.f32.mrf.mxu1 }
 0x70d   :  { %v1283_v59 = vmul.f32 0.35355338, %v4495_v58 }
 0x70e   :  { %v1263_v60 = vpop.f32.mrf.mxu1 }
 0x70f   :  { %v1282_v61 = vmul.f32 0.35355338, %v1263_v60  ;;  %v1287_v62 = vadd.f32 %v1283_v59, %v5479_v34 }
 0x710   :  { %v4498_v63 = vpop.f32.mrf.mxu1 }
 0x711   :  { %v1293_v0 = vsel %vm567_vm2, %v1287_v62, -inf  ;;  %v1286_v1 = vadd.f32 %v1282_v61, %v5476_v30  ;;  %v1285_v3 = vmul.f32 0.35355338, %v4498_v63 }
 0x712   :  { %1294 = vmax.xlane.f32.xlu1 %v1293_v0  ;;  %v1273_v2 = vpop.f32.mrf.mxu1  ;;  %v453_v0 = vld [vmem:[%s6053_s3 + $0x10] sm:$0xff] }
 0x713   :  { %v1284_v4 = vmul.f32 0.35355338, %v1273_v2  ;;  %v1290_v5 = vsel %vm567_vm2, %v1286_v1, -inf  ;;  %v1289_v8 = vadd.f32 %v1285_v3, %v5488_v42  ;;  %4509 = vmatprep.subr.mxu1 %v453_v0 }
 0x714   :  { %1291 = vmax.xlane.f32.xlu0 %v1290_v5  ;;  %4510 = vmatpush3.msra.mxu1 %v453_v0  ;;  %v454_v0 = vld [vmem:[%s6053_s3 + $0x18] sm:$0xff] }
 0x715   :  { %v1288_v6 = vadd.f32 %v1284_v4, %v5483_v37  ;;  %v1299_v9 = vsel %vm567_vm2, %v1289_v8, -inf }
 0x717   :  { %v1296_v7 = vsel %vm567_vm2, %v1288_v6, -inf }
 0x718   :  { %1297 = vmax.xlane.f32.xlu0 %v1296_v7 }
 0x71c   :  { %1300 = vmax.xlane.f32.xlu0 %v1299_v9 }
 0x79b   :  { %v1295_v14 = vpop.xlane.xlu1 %1294 }
 0x79c   :  { %v1303_v15 = vsub.f32 %v1287_v62, %v1295_v14 }
 0x79d   :  { %v1292_v17 = vpop.xlane.xlu0 %1291 }
 0x79e   :  { %v1308_v18 = vmul.f32 1.442695, %v1303_v15  ;;  %v1302_v19 = vsub.f32 %v1286_v1, %v1292_v17  ;;  %v4485_v1 = vpop.f32.mrf.mxu0 }
 0x7a0   :  { %4862 = vpow2.f32 %v1308_v18  ;;  %v1306_v21 = vmul.f32 1.442695, %v1302_v19  ;;  %v1154_v2 = vpop.f32.mrf.mxu0 }
 0x7a1   :  { %v1298_v23 = vpop.xlane.xlu0 %1297 }
 0x7a2   :  { %4864 = vpow2.f32 %v1306_v21  ;;  %v1304_v24 = vsub.f32 %v1288_v6, %v1298_v23  ;;  %v5638_v3 = vpop.f32.mrf.mxu0 }
 0x7a4   :  { %v1310_v28 = vmul.f32 1.442695, %v1304_v24  ;;  %v5640_v4 = vpop.f32.mrf.mxu0 }
 0x7a5   :  { %v1301_v29 = vpop.xlane.xlu0 %1300 }
 0x7a6   :  { %4866 = vpow2.f32 %v1310_v28  ;;  %v1305_v31 = vsub.f32 %v1289_v8, %v1301_v29 }
 0x7a8   :  { %v1312_v32 = vmul.f32 1.442695, %v1305_v31 }
 0x7aa   :  { %4868 = vpow2.f32 %v1312_v32 }
 0x7ad   :  { %v4863_v33 = vpop.eup %4862 }
 0x7ae   :  { %v1317_v35 = vsel %vm567_vm2, %v4863_v33, 0.0 }
 0x7af   :  { %v4865_v41 = vpop.eup %4864  ;;  %1318 = vadd.xlane.f32.xlu1 %v1317_v35 }
 0x7b0   :  { %v1314_v43 = vsel %vm567_vm2, %v4865_v41, 0.0 }
 0x7b1   :  { %1315 = vadd.xlane.f32.xlu0 %v1314_v43 }
 0x7b3   :  { %v4867_v44 = vpop.eup %4866 }
 0x7b4   :  { %v1320_v45 = vsel %vm567_vm2, %v4867_v44, 0.0 }
 0x7b5   :  { %1321 = vadd.xlane.f32.xlu0 %v1320_v45 }
 0x7b7   :  { %v4869_v46 = vpop.eup %4868 }
 0x7b8   :  { %v1323_v47 = vsel %vm567_vm2, %v4869_v46, 0.0 }
 0x7b9   :  { %1324 = vadd.xlane.f32.xlu1 %v1323_v47 }
 0x7ca   :  { %1334 = vrot.lane.b32.xlu1 %v5449_v20, %s5213_s24 }
 0x7cb   :  { %1336 = vrot.lane.b32.xlu0 %v5446_v16, %s5213_s24 }
 0x7ce   :  { %1548 = vrot.lane.b32.xlu1 %v5446_v16, %s5214_s12 }
 0x7cf   :  { %1538 = vrot.lane.b32.xlu0 %v5457_v22, %s5214_s12 }
 0x7d2   :  { %1546 = vrot.lane.b32.xlu1 %v5449_v20, %s5214_s12 }
 0x7d3   :  { %1542 = vrot.lane.b32.xlu0 %v5465_v26, %s5214_s12 }
 0x7d6   :  { %1540 = vrot.lane.b32.xlu1 %v5463_v25, %s5214_s12 }
 0x7da   :  { %1544 = vrot.lane.b32.xlu1 %v5471_v27, %s5214_s12 }
 0x838   :  { %v1319_v48 = vpop.xlane.xlu1 %1318 }
 0x839   :  { %4870 = vrcp.f32 %v1319_v48 }
 0x83a   :  { %v1316_v49 = vpop.xlane.xlu0 %1315 }
 0x83b   :  { %4872 = vrcp.f32 %v1316_v49 }
 0x83e   :  { %v1322_v50 = vpop.xlane.xlu0 %1321 }
 0x83f   :  { %4874 = vrcp.f32 %v1322_v50 }
 0x842   :  { %v1337_v51 = vpop.permute.xlu0 %1336  ;;  %v1325_v22 = vpop.xlane.xlu1 %1324 }
 0x843   :  { %4876 = vrcp.f32 %v1325_v22  ;;  %4499 = vmatprep.subr.mxu0 %v1337_v51 }
 0x844   :  { %4500 = vmatpush3.msra.mxu0 %v1337_v51 }
 0x846   :  { %v1335_v38 = vpop.permute.xlu1 %1334  ;;  %v4871_v52 = vpop.eup %4870 }
 0x847   :  { %4501 = vmatprep.subr.mxu0 %v1335_v38  ;;  %v1331_v36 = vmul.f32 %v4871_v52, %v4863_v33  ;;  %v1539_v59 = vpop.permute.xlu0 %1538 }
 0x848   :  { %v4873_v26 = vpop.eup %4872  ;;  %4502 = vmatpush3.msra.mxu0 %v1335_v38 }
 0x849   :  { %v1330_v25 = vmul.f32 %v4873_v26, %v4865_v41 }
 0x84a   :  { %v1549_v39 = vpop.permute.xlu1 %1548 }
 0x84b   :  { %4503 = vmatprep.mubr.msk.f32.mxu0 %vm567_vm2, %v1330_v25  ;;  %4517 = vmatprep.subr.msk.mxu0 %vm455_vm1, %v1549_v39  ;;  %v1543_v62 = vpop.permute.xlu0 %1542 }
 0x84c   :  { %v4875_v27 = vpop.eup %4874  ;;  %4504 = vmatmul.mubr.msk.f32.vlgmr.msra.gmra.mxu0 %vm567_vm2, %v1331_v36 }
 0x84d   :  { %4518 = vmatpush3.xpose.msk.msra.mxu0 %vm455_vm1, %v1549_v39  ;;  %v1332_v40 = vmul.f32 %v4875_v27, %v4867_v44  ;;  %v1160_v27 = vadd.f32 %v4485_v1, %v5589_v54 }
 0x84e   :  { %v1547_v53 = vpop.permute.xlu1 %1546 }
 0x84f   :  { %4506 = vmatprep.mubr.msk.f32.mxu0 %vm567_vm2, %v1332_v40  ;;  %4519 = vmatprep.subr.msk.mxu0 %vm455_vm1, %v1547_v53 }
 0x850   :  { %v4877_v58 = vpop.eup %4876 }
 0x851   :  { %4520 = vmatpush3.xpose.msk.msra.mxu0 %vm455_vm1, %v1547_v53  ;;  %v1333_v60 = vmul.f32 %v4877_v58, %v4869_v46  ;;  %v1155_v53 = vadd.f32 %v1154_v2, %v5591_v55 }
 0x852   :  { %v1541_v61 = vpop.permute.xlu1 %1540  ;;  %4537 = vmatprep.subr.mxu0 %v454_v0 }
 0x853   :  { %4507 = vmatmul.mubr.msk.f32.gmra.mxu0 %vm567_vm2, %v1333_v60 }
 0x854   :  { %4521 = vmatprep.mubr.msk.f32.mxu0 %vm455_vm1, %v1539_v59 }
 0x856   :  { %v1545_v63 = vpop.permute.xlu1 %1544 }
 0x857   :  { %4522 = vmatmul.mubr.msk.f32.vlgmr.msra.gmra.mxu0 %vm455_vm1, %v1541_v61  ;;  %v1170_v61 = vadd.f32 %v5638_v3, %v5593_v56 }
 0x858   :  { %4524 = vmatprep.mubr.msk.f32.mxu0 %vm455_vm1, %v1543_v62  ;;  %4538 = vmatpush3.msra.mxu0 %v454_v0  ;;  %v1995_v0 = vld [vmem:[%s6055_s13 + $0x10] sm:$0xff] }
 0x85b   :  { %4525 = vmatmul.mubr.msk.f32.gmra.mxu0 %vm455_vm1, %v1545_v63 }
 0x90c   :  { %v4505_v5 = vpop.f32.mrf.mxu0 }
 0x90e   :  { %v1418_v6 = vpop.f32.mrf.mxu0 }
 0x90f   :  { %4511 = vmatprep.mubr.msk.f32.mxu1 %vm455_vm1, %v1418_v6 }
 0x910   :  { %4512 = vmatmul.mubr.msk.f32.vlgmr.msra.gmra.mxu1 %vm455_vm1, %v4505_v5 }
 0x913   :  { %v4508_v7 = vpop.f32.mrf.mxu0 }
 0x915   :  { %v1428_v8 = vpop.f32.mrf.mxu0 }
 0x916   :  { %4514 = vmatprep.mubr.msk.f32.mxu1 %vm455_vm1, %v1428_v8 }
 0x917   :  { %4515 = vmatmul.mubr.msk.f32.gmra.mxu1 %vm455_vm1, %v4508_v7  ;;  %v4523_v9 = vpop.f32.mrf.mxu0 }
 0x918   :  { %v1648_v14 = vmul.f32 0.35355338, %v4523_v9 }
 0x919   :  { %v1628_v15 = vpop.f32.mrf.mxu0 }
 0x91a   :  { %v1647_v17 = vmul.f32 0.35355338, %v1628_v15  ;;  %v1652_v18 = vadd.f32 %v1648_v14, %v5479_v34 }
 0x91b   :  { %v4526_v19 = vpop.f32.mrf.mxu0 }
 0x91c   :  { %v1658_v21 = vsel %vm567_vm2, %v1652_v18, -inf  ;;  %v1651_v23 = vadd.f32 %v1647_v17, %v5476_v30  ;;  %v1650_v28 = vmul.f32 0.35355338, %v4526_v19 }
 0x91d   :  { %1659 = vmax.xlane.f32.xlu1 %v1658_v21  ;;  %v1638_v24 = vpop.f32.mrf.mxu0 }
 0x91e   :  { %v1649_v29 = vmul.f32 0.35355338, %v1638_v24  ;;  %v1655_v31 = vsel %vm567_vm2, %v1651_v23, -inf  ;;  %v1654_v35 = vadd.f32 %v1650_v28, %v5488_v42  ;;  %v4132_v24 = vld [vmem:[%s6054_s23] ss:$0 sm:$0xff] }
 0x91f   :  { %1656 = vmax.xlane.f32.xlu0 %v1655_v31 }
 0x920   :  { %v1653_v32 = vadd.f32 %v1649_v29, %v5483_v37  ;;  %v1664_v34 = vsel %vm567_vm2, %v1654_v35, -inf }
 0x922   :  { %v1661_v33 = vsel %vm567_vm2, %v1653_v32, -inf }
 0x923   :  { %1662 = vmax.xlane.f32.xlu0 %v1661_v33 }
 0x927   :  { %1665 = vmax.xlane.f32.xlu0 %v1664_v34  ;;  %v1165_v34 = vadd.f32 %v5640_v4, %v5595_v57 }
 0x9a6   :  { %v1660_v41 = vpop.xlane.xlu1 %1659 }
 0x9a7   :  { %v1668_v43 = vsub.f32 %v1652_v18, %v1660_v41 }
 0x9a8   :  { %v1657_v30 = vpop.xlane.xlu0 %1656 }
 0x9a9   :  { %v1673_v44 = vmul.f32 1.442695, %v1668_v43  ;;  %v1667_v45 = vsub.f32 %v1651_v23, %v1657_v30 }
 0x9ab   :  { %4878 = vpow2.f32 %v1673_v44  ;;  %v1671_v46 = vmul.f32 1.442695, %v1667_v45 }
 0x9ac   :  { %v1663_v47 = vpop.xlane.xlu0 %1662 }
 0x9ad   :  { %4880 = vpow2.f32 %v1671_v46  ;;  %v1669_v48 = vsub.f32 %v1653_v32, %v1663_v47 }
 0x9af   :  { %v1675_v49 = vmul.f32 1.442695, %v1669_v48 }
 0x9b0   :  { %v1666_v37 = vpop.xlane.xlu0 %1665 }
 0x9b1   :  { %4882 = vpow2.f32 %v1675_v49  ;;  %v1670_v50 = vsub.f32 %v1654_v35, %v1666_v37 }
 0x9b3   :  { %v1677_v51 = vmul.f32 1.442695, %v1670_v50 }
 0x9b5   :  { %4884 = vpow2.f32 %v1677_v51 }
 0x9b8   :  { %v4879_v42 = vpop.eup %4878 }
 0x9b9   :  { %v1682_v22 = vsel %vm567_vm2, %v4879_v42, 0.0 }
 0x9ba   :  { %v4881_v38 = vpop.eup %4880  ;;  %1683 = vadd.xlane.f32.xlu1 %v1682_v22 }
 0x9bb   :  { %v1679_v52 = vsel %vm567_vm2, %v4881_v38, 0.0 }
 0x9bc   :  { %1680 = vadd.xlane.f32.xlu0 %v1679_v52 }
 0x9be   :  { %v4883_v26 = vpop.eup %4882 }
 0x9bf   :  { %v1685_v25 = vsel %vm567_vm2, %v4883_v26, 0.0 }
 0x9c0   :  { %1686 = vadd.xlane.f32.xlu0 %v1685_v25 }
 0x9c2   :  { %v4885_v36 = vpop.eup %4884 }
 0x9c3   :  { %v1688_v39 = vsel %vm567_vm2, %v4885_v36, 0.0 }
 0x9c4   :  { %1689 = vadd.xlane.f32.xlu1 %v1688_v39 }
 0x9d0   :  { %v4513_v40 = vpop.f32.mrf.mxu1 }
 0x9d1   :  { %v1535_v58 = vadd.f32 %v4513_v40, %v1160_v27 }
 0x9d2   :  { %v1515_v59 = vpop.f32.mrf.mxu1 }
 0x9d3   :  { %v1534_v60 = vadd.f32 %v1515_v59, %v1155_v53 }
 0x9d5   :  { %1699 = vrot.lane.b32.xlu1 %v5449_v20, %s5215_s6 }
 0x9d6   :  { %1701 = vrot.lane.b32.xlu0 %v5446_v16, %s5215_s6 }
 0x9d7   :  { %v4516_v62 = vpop.f32.mrf.mxu1 }
 0x9d8   :  { %v1537_v63 = vadd.f32 %v4516_v62, %v1170_v61 }
 0x9d9   :  { %v1525_v15 = vpop.f32.mrf.mxu1 }
 0x9da   :  { %v1536_v44 = vadd.f32 %v1525_v15, %v1165_v34 }
 0xa43   :  { %v1684_v54 = vpop.xlane.xlu1 %1683 }
 0xa44   :  { %4886 = vrcp.f32 %v1684_v54  ;;  %v1994_v54 = vld [vmem:[%s6055_s13 + $0x8] sm:$0xff] }
 0xa45   :  { %v1681_v55 = vpop.xlane.xlu0 %1680 }
 0xa46   :  { %4888 = vrcp.f32 %v1681_v55  ;;  %v1993_v55 = vld [vmem:[%s6055_s13] sm:$0xff] }
 0xa49   :  { %v1687_v1 = vpop.xlane.xlu0 %1686 }
 0xa4a   :  { %4890 = vrcp.f32 %v1687_v1  ;;  %v2120_v1 = vld [vmem:[%s6056_s26 + $0x78] sm:$0xff] }
 0xa4b   :  { %4559 = vmatprep.subr.mxu0 %v2120_v1 }
 0xa4d   :  { %v1702_v2 = vpop.permute.xlu0 %1701  ;;  %v1690_v5 = vpop.xlane.xlu1 %1689 }
 0xa4e   :  { %4892 = vrcp.f32 %v1690_v5  ;;  %4527 = vmatprep.subr.mxu1 %v1702_v2  ;;  %v2118_v5 = vld [vmem:[%s6056_s26 + $0x68] sm:$0xff] }
 0xa4f   :  { %4528 = vmatpush3.msra.mxu1 %v1702_v2  ;;  %v2119_v2 = vld [vmem:[%s6056_s26 + $0x70] sm:$0xff] }
 0xa51   :  { %v1700_v20 = vpop.permute.xlu1 %1699  ;;  %v4887_v56 = vpop.eup %4886 }
 0xa52   :  { %4529 = vmatprep.subr.mxu1 %v1700_v20  ;;  %v1696_v6 = vmul.f32 %v4887_v56, %v4879_v42  ;;  %v2116_v56 = vld [vmem:[%s6056_s26 + $0x58] sm:$0xff] }
 0xa53   :  { %v4889_v16 = vpop.eup %4888  ;;  %4530 = vmatpush3.msra.mxu1 %v1700_v20  ;;  %v2117_v20 = vld [vmem:[%s6056_s26 + $0x60] sm:$0xff] }
 0xa54   :  { %v1695_v3 = vmul.f32 %v4889_v16, %v4881_v38  ;;  %v2115_v16 = vld [vmem:[%s6056_s26 + $0x50] sm:$0xff] }
 0xa56   :  { %4531 = vmatprep.mubr.msk.f32.mxu1 %vm567_vm2, %v1695_v3  ;;  %v2114_v3 = vld [vmem:[%s6056_s26 + $0x48] sm:$0xff] }
 0xa57   :  { %v4891_v7 = vpop.eup %4890  ;;  %4532 = vmatmul.mubr.msk.f32.vlgmr.msra.gmra.mxu1 %vm567_vm2, %v1696_v6  ;;  %v2113_v6 = vld [vmem:[%s6056_s26 + $0x40] sm:$0xff] }
 0xa58   :  { %v1697_v8 = vmul.f32 %v4891_v7, %v4883_v26  ;;  %v2112_v7 = vld [vmem:[%s6056_s26 + $0x38] sm:$0xff] }
 0xa5a   :  { %4534 = vmatprep.mubr.msk.f32.mxu1 %vm567_vm2, %v1697_v8  ;;  %v2111_v8 = vld [vmem:[%s6056_s26 + $0x30] sm:$0xff] }
 0xa5b   :  { %v4893_v9 = vpop.eup %4892 }
 0xa5c   :  { %v1698_v14 = vmul.f32 %v4893_v9, %v4885_v36  ;;  %v2110_v9 = vld [vmem:[%s6056_s26 + $0x28] sm:$0xff] }
 0xa5e   :  { %4535 = vmatmul.mubr.msk.f32.gmra.mxu1 %vm567_vm2, %v1698_v14  ;;  %v2109_v14 = vld [vmem:[%s6056_s26 + $0x20] sm:$0xff] }
 0xb17   :  { %v4533_v17 = vpop.f32.mrf.mxu1 }
 0xb19   :  { %v1783_v18 = vpop.f32.mrf.mxu1 }
 0xb1a   :  { %4539 = vmatprep.mubr.msk.f32.mxu0 %vm455_vm1, %v1783_v18 }
 0xb1b   :  { %4540 = vmatmul.mubr.msk.f32.vlgmr.msra.gmra.mxu0 %vm455_vm1, %v4533_v17 }
 0xb1c   :  { %4560 = vmatpush3.msra.mxu0 %v2120_v1 }
 0xb1d   :  { %4561 = vmatprep.subr.mxu0 %v2119_v2 }
 0xb1e   :  { %v4536_v19 = vpop.f32.mrf.mxu1  ;;  %4562 = vmatpush3.msra.mxu0 %v2119_v2  ;;  %v2213_v2 = vld [vmem:[%s6058_s1] sm:$0xff] }
 0xb1f   :  { %4563 = vmatprep.subr.mxu0 %v2118_v5 }
 0xb20   :  { %v1793_v21 = vpop.f32.mrf.mxu1  ;;  %4564 = vmatpush3.msra.mxu0 %v2118_v5 }
 0xb21   :  { %4542 = vmatprep.mubr.msk.f32.mxu0 %vm455_vm1, %v1793_v21  ;;  %4565 = vmatprep.subr.mxu0 %v2117_v20 }
 0xb22   :  { %4543 = vmatmul.mubr.msk.f32.gmra.mxu0 %vm455_vm1, %v4536_v19 }
 0xb23   :  { %4566 = vmatpush3.msra.mxu0 %v2117_v20 }
 0xb24   :  { %4567 = vmatprep.subr.mxu0 %v2116_v56 }
 0xb25   :  { %4568 = vmatpush3.msra.mxu0 %v2116_v56 }
 0xb26   :  { %4569 = vmatprep.subr.mxu0 %v2115_v16 }
 0xb27   :  { %4570 = vmatpush3.msra.mxu0 %v2115_v16 }
 0xb28   :  { %4571 = vmatprep.subr.mxu0 %v2114_v3 }
 0xb29   :  { %4572 = vmatpush3.msra.mxu0 %v2114_v3 }
 0xb2a   :  { %4573 = vmatprep.subr.mxu0 %v2113_v6 }
 0xb2b   :  { %4574 = vmatpush3.msra.mxu0 %v2113_v6  ;;  %v2216_v6 = vld [vmem:[%s6058_s1 + $0x18] sm:$0xff] }
 0xb2c   :  { %4575 = vmatprep.subr.mxu0 %v2112_v7 }
 0xb2d   :  { %4576 = vmatpush3.msra.mxu0 %v2112_v7 }
 0xb2e   :  { %4577 = vmatprep.subr.mxu0 %v2111_v8 }
 0xb2f   :  { %4578 = vmatpush3.msra.mxu0 %v2111_v8 }
 0xb30   :  { %4579 = vmatprep.subr.mxu0 %v2110_v9 }
 0xb31   :  { %4580 = vmatpush3.msra.mxu0 %v2110_v9 }
 0xb32   :  { %4581 = vmatprep.subr.mxu0 %v2109_v14 }
 0xb33   :  { %4582 = vmatpush3.msra.mxu0 %v2109_v14 }
 0xbdb   :  { %v4541_v23 = vpop.f32.mrf.mxu0 }
 0xbdc   :  { %v1900_v28 = vadd.f32 %v4541_v23, %v1535_v58 }
 0xbdd   :  { %v1880_v29 = vpop.f32.mrf.mxu0 }
 0xbde   :  { %v1911_v31 = vadd.f32 %v4132_v24, %v1900_v28  ;;  %v1899_v32 = vadd.f32 %v1880_v29, %v1534_v60 }
 0xbe0   :  { %v1910_v33 = vadd.f32 %v4132_v24, %v1899_v32  ;;  %v1915_v35 = vadd.f32 %v1911_v31, %v5428_v11 }
 0xbe2   :  { %v4544_v41 = vpop.f32.mrf.mxu0  ;;  %v1921_v43 = vsel %vm261_vm0, %v1915_v35, 0.0  ;;  %v1914_v30 = vadd.f32 %v1910_v33, %v5425_v10 }
 0xbe3   :  { %v1902_v45 = vadd.f32 %v4544_v41, %v1537_v63  ;;  %1922 = vadd.xlane.f32.xlu0 %v1921_v43  ;;  %v1996_v63 = vld [vmem:[%s6055_s13 + $0x18] sm:$0xff]  ;;  %v4133_v41 = vld [vmem:[#allocation2] ss:$0 sm:$0xff] }
 0xbe4   :  { %v1890_v46 = vpop.f32.mrf.mxu0  ;;  %v1918_v47 = vsel %vm261_vm0, %v1914_v30, 0.0  ;;  %4545 = vmatprep.subr.mxu1 %v1996_v63 }
 0xbe5   :  { %v1913_v48 = vadd.f32 %v4132_v24, %v1902_v45  ;;  %v1901_v49 = vadd.f32 %v1890_v46, %v1536_v44  ;;  %1919 = vadd.xlane.f32.xlu1 %v1918_v47  ;;  %4546 = vmatpush3.msra.mxu1 %v1996_v63  ;;  %v4134_v46 = vld [vmem:[#allocation5] ss:$0 sm:$0xff]  ;;  %v4140_v63 = vld [vmem:[%s6057_s28] ss:$0 sm:$0xff] }
 0xbe6   :  { %4547 = vmatprep.subr.mxu1 %v1995_v0 }
 0xbe7   :  { %v1912_v37 = vadd.f32 %v4132_v24, %v1901_v49  ;;  %v1917_v11 = vadd.f32 %v1913_v48, %v5441_v13  ;;  %4548 = vmatpush3.msra.mxu1 %v1995_v0 }
 0xbe8   :  { %4549 = vmatprep.subr.mxu1 %v1994_v54 }
 0xbe9   :  { %v1927_v50 = vsel %vm261_vm0, %v1917_v11, 0.0  ;;  %v1916_v57 = vadd.f32 %v1912_v37, %v5432_v12  ;;  %4550 = vmatpush3.msra.mxu1 %v1994_v54  ;;  %v2214_v54 = vld [vmem:[%s6058_s1 + $0x8] sm:$0xff] }
 0xbea   :  { %1928 = vadd.xlane.f32.xlu1 %v1927_v50  ;;  %4551 = vmatprep.subr.mxu1 %v1993_v55 }
 0xbeb   :  { %v1924_v4 = vsel %vm261_vm0, %v1916_v57, 0.0  ;;  %4552 = vmatpush3.msra.mxu1 %v1993_v55 }
 0xbec   :  { %1925 = vadd.xlane.f32.xlu0 %v1924_v4 }
 0xc6c   :  { %v1923_v10 = vpop.xlane.xlu0 %1922 }
 0xc6d   :  { %v1932_v51 = vmul.f32 0.03125, %v1923_v10 }
 0xc6e   :  { %v1920_v42 = vpop.xlane.xlu1 %1919 }
 0xc6f   :  { %v5686_v22 = vsub.f32 %v1915_v35, %v1932_v51  ;;  %v1931_v38 = vmul.f32 0.03125, %v1920_v42  ;;  %v5731_v42 = vld [vmem:[%s5233_s9] sm:$0xff] }
 0xc71   :  { %v5688_v52 = vsub.f32 %v1914_v30, %v1931_v38  ;;  %v1940_v26 = vmul.f32 %v5686_v22, %v5686_v22  ;;  %v2107_v38 = vld [vmem:[%s6056_s26 + $0x10] sm:$0xff] }
 0xc73   :  { %v1929_v13 = vpop.xlane.xlu1 %1928  ;;  %v1946_v25 = vsel %vm261_vm0, %v1940_v26, 0.0  ;;  %v1939_v12 = vmul.f32 %v5688_v52, %v5688_v52  ;;  %v2105_v26 = vld [vmem:[%s6056_s26] sm:$0xff] }
 0xc74   :  { %v1934_v36 = vmul.f32 0.03125, %v1929_v13  ;;  %1947 = vadd.xlane.f32.xlu1 %v1946_v25  ;;  %v4135_v13 = vld [vmem:[#allocation7] ss:$0 sm:$0xff] }
 0xc75   :  { %v1926_v39 = vpop.xlane.xlu0 %1925  ;;  %v1943_v27 = vsel %vm261_vm0, %v1939_v12, 0.0 }
 0xc76   :  { %v5696_v40 = vsub.f32 %v1917_v11, %v1934_v36  ;;  %v1933_v53 = vmul.f32 0.03125, %v1926_v39  ;;  %1944 = vadd.xlane.f32.xlu0 %v1943_v27 }
 0xc78   :  { %v5698_v58 = vsub.f32 %v1916_v57, %v1933_v53  ;;  %v1942_v59 = vmul.f32 %v5696_v40, %v5696_v40 }
 0xc7a   :  { %v1952_v60 = vsel %vm261_vm0, %v1942_v59, 0.0  ;;  %v1941_v61 = vmul.f32 %v5698_v58, %v5698_v58 }
 0xc7b   :  { %1953 = vadd.xlane.f32.xlu1 %v1952_v60 }
 0xc7c   :  { %v1949_v62 = vsel %vm261_vm0, %v1941_v61, 0.0 }
 0xc7d   :  { %1950 = vadd.xlane.f32.xlu0 %v1949_v62 }
 0xcfd   :  { %v1948_v15 = vpop.xlane.xlu1 %1947 }
 0xcfe   :  { %v1956_v17 = vmul.f32 0.03125, %v1948_v15  ;;  %v2215_v15 = vld [vmem:[%s6058_s1 + $0x10] sm:$0xff] }
 0xcff   :  { %v1945_v18 = vpop.xlane.xlu0 %1944 }
 0xd00   :  { %v1960_v19 = vadd.f32 1e-05, %v1956_v17  ;;  %v1955_v21 = vmul.f32 0.03125, %v1945_v18 }
 0xd02   :  { %4894 = vrsqrt.f32 %v1960_v19  ;;  %v1959_v23 = vadd.f32 1e-05, %v1955_v21 }
 0xd04   :  { %4896 = vrsqrt.f32 %v1959_v23  ;;  %v1954_v24 = vpop.xlane.xlu1 %1953 }
 0xd05   :  { %v1958_v28 = vmul.f32 0.03125, %v1954_v24 }
 0xd06   :  { %v1951_v29 = vpop.xlane.xlu0 %1950 }
 0xd07   :  { %v1962_v31 = vadd.f32 1e-05, %v1958_v28  ;;  %v1957_v32 = vmul.f32 0.03125, %v1951_v29 }
 0xd09   :  { %4898 = vrsqrt.f32 %v1962_v31  ;;  %v1961_v33 = vadd.f32 1e-05, %v1957_v32 }
 0xd0b   :  { %4900 = vrsqrt.f32 %v1961_v33 }
 0xd0f   :  { %v4895_v35 = vpop.eup %4894 }
 0xd10   :  { %v1968_v34 = vmul.f32 %v4895_v35, %v5686_v22  ;;  %v2108_v22 = vld [vmem:[%s6056_s26 + $0x18] sm:$0xff] }
 0xd11   :  { %v4897_v43 = vpop.eup %4896  ;;  %4583 = vmatprep.subr.mxu0 %v2108_v22 }
 0xd12   :  { %v1967_v30 = vmul.f32 %v4897_v43, %v5688_v52  ;;  %v1979_v44 = vmul.f32 %v4133_v41, %v1968_v34  ;;  %4584 = vmatpush3.msra.mxu0 %v2108_v22  ;;  %v2106_v52 = vld [vmem:[%s6056_s26 + $0x8] sm:$0xff]  ;;  %v2303_v22 = vld [vmem:[%s6059_s2 + $0x10] sm:$0xff] }
 0xd13   :  { %4585 = vmatprep.subr.mxu0 %v2107_v38 }
 0xd14   :  { %v1978_v45 = vmul.f32 %v4133_v41, %v1967_v30  ;;  %v1990_v49 = vadd.f32 %v4134_v46, %v1979_v44  ;;  %4586 = vmatpush3.msra.mxu0 %v2107_v38  ;;  %v2302_v38 = vld [vmem:[%s6059_s2 + $0x8] sm:$0xff] }
 0xd15   :  { %4587 = vmatprep.subr.mxu0 %v2106_v52 }
 0xd16   :  { %v4899_v47 = vpop.eup %4898  ;;  %v1989_v48 = vadd.f32 %v4134_v46, %v1978_v45  ;;  %4588 = vmatpush3.msra.mxu0 %v2106_v52  ;;  %v2301_v52 = vld [vmem:[%s6059_s2] sm:$0xff] }
 0xd17   :  { %v1970_v37 = vmul.f32 %v4899_v47, %v5696_v40  ;;  %4589 = vmatprep.subr.mxu0 %v2105_v26 }
 0xd18   :  { %v4901_v11 = vpop.eup %4900  ;;  %4553 = vmatprep.mubr.msk.f32.mxu1 %vm261_vm0, %v1989_v48  ;;  %4590 = vmatpush3.msra.mxu0 %v2105_v26  ;;  %v2390_v26 = vld [vmem:[%s6060_s0 + $0x18] sm:$0xff] }
 0xd19   :  { %4554 = vmatmul.mubr.msk.f32.vlgmr.msra.gmra.mxu1 %vm261_vm0, %v1990_v49  ;;  %v1969_v50 = vmul.f32 %v4901_v11, %v5698_v58  ;;  %v1981_v57 = vmul.f32 %v4133_v41, %v1970_v37 }
 0xd1b   :  { %v1980_v4 = vmul.f32 %v4133_v41, %v1969_v50  ;;  %v1992_v51 = vadd.f32 %v4134_v46, %v1981_v57 }
 0xd1d   :  { %v1991_v10 = vadd.f32 %v4134_v46, %v1980_v4 }
 0xd1f   :  { %4556 = vmatprep.mubr.msk.f32.mxu1 %vm261_vm0, %v1991_v10 }
 0xd20   :  { %4557 = vmatmul.mubr.msk.f32.gmra.mxu1 %vm261_vm0, %v1992_v51 }
 0xd21   :  { %4605 = vmatprep.mubr.msk.f32.mxu1 %vm261_vm0, %v5731_v42 }
 0xdd9   :  { %v4555_v25 = vpop.f32.mrf.mxu1 }
 0xdda   :  { %v2088_v12 = vadd.f32 %v4555_v25, %v4135_v13  ;;  %v5775_v25 = vld [vmem:[%s5233_s9 + $0x8] sm:$0xff]  ;;  %s6061_s9 = sld [smem:[#allocation29_spill]] }
 0xddb   :  { %v2082_v36 = vpop.f32.mrf.mxu1 }
 0xddc   :  { %v2083_v39 = vadd.f32 %v4135_v13, %v2082_v36  ;;  %v2102_v40 = vmax.f32 %v2088_v12, 0.0  ;;  %v2388_v12 = vld [vmem:[%s6060_s0 + $0x8] sm:$0xff]  ;;  %v2387_v36 = vld [vmem:[%s6060_s0] sm:$0xff] }
 0xdde   :  { %v2101_v27 = vmax.f32 %v2083_v39, 0.0 }
 0xde0   :  { %v4558_v53 = vpop.f32.mrf.mxu1  ;;  %4591 = vmatprep.mubr.f32.mxu0 %v2101_v27 }
 0xde1   :  { %4592 = vmatmul.mubr.f32.vlgmr.msra.gmra.mxu0 %v2102_v40  ;;  %v2098_v58 = vadd.f32 %v4558_v53, %v4135_v13 }
 0xde2   :  { %v2092_v59 = vpop.f32.mrf.mxu1 }
 0xde3   :  { %v2093_v60 = vadd.f32 %v4135_v13, %v2092_v59  ;;  %v2104_v62 = vmax.f32 %v2098_v58, 0.0  ;;  %v2389_v13 = vld [vmem:[%s6060_s0 + $0x10] sm:$0xff] }
 0xde5   :  { %v2103_v61 = vmax.f32 %v2093_v60, 0.0 }
 0xde7   :  { %4594 = vmatprep.mubr.f32.mxu0 %v2103_v61 }
 0xde8   :  { %4595 = vmatmul.mubr.f32.gmra.mxu0 %v2104_v62 }
 0xea1   :  { %v4593_v0 = vpop.f32.mrf.mxu0 }
 0xea2   :  { %v2200_v55 = vadd.f32 %v4593_v0, %v4140_v63 }
 0xea3   :  { %v2194_v1 = vpop.f32.mrf.mxu0 }
 0xea4   :  { %v2218_v5 = vadd.f32 %v2214_v54, %v2200_v55  ;;  %v2195_v20 = vadd.f32 %v4140_v63, %v2194_v1  ;;  %v4141_v1 = vld [vmem:[#allocation8] ss:$0 sm:$0xff] }
 0xea6   :  { %v2217_v56 = vadd.f32 %v2213_v2, %v2195_v20  ;;  %v2222_v16 = vadd.f32 %v2218_v5, %v1990_v49  ;;  %v4142_v20 = vld [vmem:[#allocation10] ss:$0 sm:$0xff] }
 0xea8   :  { %v4596_v3 = vpop.f32.mrf.mxu0  ;;  %v2228_v7 = vsel %vm261_vm0, %v2222_v16, 0.0  ;;  %v2221_v8 = vadd.f32 %v2217_v56, %v1989_v48 }
 0xea9   :  { %v2210_v9 = vadd.f32 %v4596_v3, %v4140_v63  ;;  %2229 = vadd.xlane.f32.xlu1 %v2228_v7 }
 0xeaa   :  { %v2204_v14 = vpop.f32.mrf.mxu0  ;;  %v2225_v17 = vsel %vm261_vm0, %v2221_v8, 0.0 }
 0xeab   :  { %v2220_v18 = vadd.f32 %v2216_v6, %v2210_v9  ;;  %v2205_v19 = vadd.f32 %v4140_v63, %v2204_v14  ;;  %2226 = vadd.xlane.f32.xlu0 %v2225_v17 }
 0xead   :  { %v2219_v21 = vadd.f32 %v2215_v15, %v2205_v19  ;;  %v2224_v23 = vadd.f32 %v2220_v18, %v1992_v51  ;;  %v2304_v51 = vld [vmem:[%s6059_s2 + $0x18] sm:$0xff] }
 0xeae   :  { %4597 = vmatprep.subr.mxu1 %v2304_v51 }
 0xeaf   :  { %v2234_v24 = vsel %vm261_vm0, %v2224_v23, 0.0  ;;  %v2223_v28 = vadd.f32 %v2219_v21, %v1991_v10  ;;  %4598 = vmatpush3.msra.mxu1 %v2304_v51 }
 0xeb0   :  { %2235 = vadd.xlane.f32.xlu1 %v2234_v24  ;;  %4599 = vmatprep.subr.mxu1 %v2303_v22 }
 0xeb1   :  { %v2231_v29 = vsel %vm261_vm0, %v2223_v28, 0.0  ;;  %4600 = vmatpush3.msra.mxu1 %v2303_v22 }
 0xeb2   :  { %2232 = vadd.xlane.f32.xlu0 %v2231_v29  ;;  %4601 = vmatprep.subr.mxu1 %v2302_v38 }
 0xeb3   :  { %4602 = vmatpush3.msra.mxu1 %v2302_v38 }
 0xeb4   :  { %4603 = vmatprep.subr.mxu1 %v2301_v52 }
 0xeb5   :  { %4604 = vmatpush3.msra.mxu1 %v2301_v52 }
 0xeb6   :  { %4608 = vmatprep.subr.mxu1 %v2390_v26  ;;  %4606 = vmatmul.mubr.msk.f32.vlgmr.msra.gmra.mxu1 %vm261_vm0, %v5775_v25 }
 0xeb7   :  { %4609 = vmatpush3.msra.mxu1 %v2390_v26 }
 0xeb8   :  { %4610 = vmatprep.subr.mxu1 %v2389_v13 }
 0xeb9   :  { %4611 = vmatpush3.msra.mxu1 %v2389_v13 }
 0xeba   :  { %4612 = vmatprep.subr.mxu1 %v2388_v12 }
 0xebb   :  { %4613 = vmatpush3.msra.mxu1 %v2388_v12 }
 0xebc   :  { %4614 = vmatprep.subr.mxu1 %v2387_v36 }
 0xebd   :  { %4615 = vmatpush3.msra.mxu1 %v2387_v36 }
 0xf32   :  { %v2230_v31 = vpop.xlane.xlu1 %2229 }
 0xf33   :  { %v2238_v32 = vmul.f32 0.03125, %v2230_v31 }
 0xf34   :  { %v2227_v33 = vpop.xlane.xlu0 %2226 }
 0xf35   :  { %v5748_v35 = vsub.f32 %v2222_v16, %v2238_v32  ;;  %v2237_v34 = vmul.f32 0.03125, %v2227_v33 }
 0xf37   :  { %v5750_v41 = vsub.f32 %v2221_v8, %v2237_v34  ;;  %v2246_v43 = vmul.f32 %v5748_v35, %v5748_v35 }
 0xf39   :  { %v2236_v30 = vpop.xlane.xlu1 %2235  ;;  %v2252_v44 = vsel %vm261_vm0, %v2246_v43, 0.0  ;;  %v2245_v45 = vmul.f32 %v5750_v41, %v5750_v41 }
 0xf3a   :  { %v2240_v46 = vmul.f32 0.03125, %v2236_v30  ;;  %2253 = vadd.xlane.f32.xlu1 %v2252_v44 }
 0xf3b   :  { %v2233_v47 = vpop.xlane.xlu0 %2232  ;;  %v2249_v48 = vsel %vm261_vm0, %v2245_v45, 0.0 }
 0xf3c   :  { %v5758_v49 = vsub.f32 %v2224_v23, %v2240_v46  ;;  %v2239_v37 = vmul.f32 0.03125, %v2233_v47  ;;  %2250 = vadd.xlane.f32.xlu0 %v2249_v48  ;;  %v4143_v23 = vld [vmem:[#allocation11] ss:$0 sm:$0xff] }
 0xf3e   :  { %v5760_v11 = vsub.f32 %v2223_v28, %v2239_v37  ;;  %v2248_v50 = vmul.f32 %v5758_v49, %v5758_v49 }
 0xf40   :  { %v2258_v57 = vsel %vm261_vm0, %v2248_v50, 0.0  ;;  %v2247_v4 = vmul.f32 %v5760_v11, %v5760_v11 }
 0xf41   :  { %2259 = vadd.xlane.f32.xlu1 %v2258_v57 }
 0xf42   :  { %v2255_v10 = vsel %vm261_vm0, %v2247_v4, 0.0 }
 0xf43   :  { %2256 = vadd.xlane.f32.xlu0 %v2255_v10 }
 0xf76   :  { %v4607_v24 = vpop.f32.mrf.mxu1 }
 0xf77   :  { %v2384_v28 = vadd.f32 %v4607_v24, %v4143_v23 }
 0xf78   :  { %v2378_v29 = vpop.f32.mrf.mxu1 }
 0xf79   :  { %v2379_v31 = vadd.f32 %v4143_v23, %v2378_v29 }
 0xfc3   :  { %v2254_v39 = vpop.xlane.xlu1 %2253 }
 0xfc4   :  { %v2262_v27 = vmul.f32 0.03125, %v2254_v39 }
 0xfc5   :  { %v2251_v40 = vpop.xlane.xlu0 %2250 }
 0xfc6   :  { %v2266_v53 = vadd.f32 1e-05, %v2262_v27  ;;  %v2261_v58 = vmul.f32 0.03125, %v2251_v40  ;;  %v5880_v27 = vld [vmem:[%s6061_s9 + $0x8] sm:$0xff] }
 0xfc8   :  { %4902 = vrsqrt.f32 %v2266_v53  ;;  %v2265_v59 = vadd.f32 1e-05, %v2261_v58  ;;  %v5883_v58 = vld [vmem:[%s6061_s9] sm:$0xff] }
 0xfca   :  { %4904 = vrsqrt.f32 %v2265_v59  ;;  %v2260_v60 = vpop.xlane.xlu1 %2259 }
 0xfcb   :  { %v2264_v61 = vmul.f32 0.03125, %v2260_v60 }
 0xfcc   :  { %v2257_v62 = vpop.xlane.xlu0 %2256 }
 0xfcd   :  { %v2268_v63 = vadd.f32 1e-05, %v2264_v61  ;;  %v2263_v0 = vmul.f32 0.03125, %v2257_v62 }
 0xfcf   :  { %4906 = vrsqrt.f32 %v2268_v63  ;;  %v2267_v54 = vadd.f32 1e-05, %v2263_v0 }
 0xfd1   :  { %4908 = vrsqrt.f32 %v2267_v54 }
 0xfd5   :  { %v4903_v55 = vpop.eup %4902 }
 0xfd6   :  { %v2274_v2 = vmul.f32 %v4903_v55, %v5748_v35  ;;  %v4146_v35 = vld [vmem:[#allocation13] ss:$0 sm:$0xff] }
 0xfd7   :  { %v4905_v5 = vpop.eup %4904 }
 0xfd8   :  { %v2273_v56 = vmul.f32 %v4905_v5, %v5750_v41  ;;  %v2285_v16 = vmul.f32 %v4141_v1, %v2274_v2 }
 0xfda   :  { %v2284_v3 = vmul.f32 %v4141_v1, %v2273_v56  ;;  %v2296_v6 = vadd.f32 %v4142_v20, %v2285_v16 }
 0xfdc   :  { %v4907_v7 = vpop.eup %4906  ;;  %v2295_v8 = vadd.f32 %v4142_v20, %v2284_v3  ;;  %3991 = vst.msk [vmem:[#allocation16 + $0x8] sm:$0xff] %vm261_vm0, %v2296_v6 }
 0xfdd   :  { %v2276_v9 = vmul.f32 %v4907_v7, %v5758_v49 }
 0xfde   :  { %v4909_v14 = vpop.eup %4908  ;;  %4616 = vmatprep.mubr.msk.f32.mxu1 %vm261_vm0, %v2295_v8  ;;  %3990 = vst.msk [vmem:[#allocation16] sm:$0xff] %vm261_vm0, %v2295_v8 }
 0xfdf   :  { %4617 = vmatmul.mubr.msk.f32.vlgmr.msra.gmra.mxu1 %vm261_vm0, %v2296_v6  ;;  %v2275_v15 = vmul.f32 %v4909_v14, %v5760_v11  ;;  %v2287_v17 = vmul.f32 %v4141_v1, %v2276_v9 }
 0xfe1   :  { %v2286_v18 = vmul.f32 %v4141_v1, %v2275_v15  ;;  %v2298_v19 = vadd.f32 %v4142_v20, %v2287_v17 }
 0xfe3   :  { %v2297_v21 = vadd.f32 %v4142_v20, %v2286_v18  ;;  %3993 = vst.msk [vmem:[#allocation16 + $0x18] sm:$0xff] %vm261_vm0, %v2298_v19 }
 0xfe5   :  { %4619 = vmatprep.mubr.msk.f32.mxu1 %vm261_vm0, %v2297_v21  ;;  %3992 = vst.msk [vmem:[#allocation16 + $0x10] sm:$0xff] %vm261_vm0, %v2297_v21 }
 0xfe6   :  { %4620 = vmatmul.mubr.msk.f32.gmra.mxu1 %vm261_vm0, %v2298_v19 }
 0xfe7   :  { %4630 = vmatprep.mubr.msk.f32.mxu1 %vm455_vm1, %v2379_v31 }
0x109f   :  { %v4618_v32 = vpop.f32.mrf.mxu1 }
0x10a0   :  { %v5808_v44 = vadd.f32 %v4618_v32, %v4146_v35 }
0x10a1   :  { %v2476_v33 = vpop.f32.mrf.mxu1 }
0x10a2   :  { %v5817_v45 = vadd.f32 %v4146_v35, %v2476_v33 }
0x10a6   :  { %v4621_v34 = vpop.f32.mrf.mxu1 }
0x10a7   :  { %v5794_v41 = vadd.f32 %v4621_v34, %v4146_v35 }
0x10a8   :  { %v2486_v43 = vpop.f32.mrf.mxu1 }
0x10a9   :  { %v5796_v30 = vadd.f32 %v4146_v35, %v2486_v43  ;;  %2721 = vrot.lane.b32.xlu0 %v5794_v41, %s5210_s29  ;;  %4622 = vmatprep.subr.msk.mxu1 %vm455_vm1, %v5794_v41 }
0x10aa   :  { %4623 = vmatpush3.xpose.msk.msra.mxu1 %vm455_vm1, %v5794_v41 }
0x10ab   :  { %2719 = vrot.lane.b32.xlu1 %v5796_v30, %s5210_s29  ;;  %4624 = vmatprep.subr.msk.mxu1 %vm455_vm1, %v5796_v30 }
0x10ad   :  { %2711 = vrot.lane.b32.xlu0 %v2379_v31, %s5210_s29 }
0x10ae   :  { %4625 = vmatpush3.xpose.msk.msra.mxu1 %vm455_vm1, %v5796_v30 }
0x10af   :  { %2717 = vrot.lane.b32.xlu1 %v5808_v44, %s5210_s29  ;;  %4626 = vmatprep.subr.msk.mxu1 %vm455_vm1, %v5808_v44 }
0x10b1   :  { %3101 = vrot.lane.b32.xlu0 %v5794_v41, %s5212_s14 }
0x10b2   :  { %4627 = vmatpush3.xpose.msk.msra.mxu1 %vm455_vm1, %v5808_v44 }
0x10b3   :  { %2715 = vrot.lane.b32.xlu1 %v5817_v45, %s5210_s29  ;;  %4628 = vmatprep.subr.msk.mxu1 %vm455_vm1, %v5817_v45 }
0x10b5   :  { %3097 = vrot.lane.b32.xlu0 %v5808_v44, %s5212_s14 }
0x10b6   :  { %4629 = vmatpush3.xpose.msk.msra.mxu1 %vm455_vm1, %v5817_v45 }
0x10b7   :  { %2713 = vrot.lane.b32.xlu1 %v2384_v28, %s5210_s29 }
0x10b9   :  { %3091 = vrot.lane.b32.xlu0 %v2379_v31, %s5212_s14  ;;  %4631 = vmatmul.mubr.msk.f32.vlgmr.msra.gmra.mxu1 %vm455_vm1, %v2384_v28 }
0x10bb   :  { %3099 = vrot.lane.b32.xlu1 %v5796_v30, %s5212_s14 }
0x10bd   :  { %3093 = vrot.lane.b32.xlu0 %v2384_v28, %s5212_s14 }
0x10bf   :  { %3095 = vrot.lane.b32.xlu1 %v5817_v45, %s5212_s14 }
0x10c1   :  { %3398 = vrot.lane.b32.xlu0 %v5808_v44, %s5214_s12 }
0x10c3   :  { %3402 = vrot.lane.b32.xlu1 %v5794_v41, %s5214_s12 }
0x10c5   :  { %3392 = vrot.lane.b32.xlu0 %v2379_v31, %s5214_s12 }
0x10c7   :  { %3400 = vrot.lane.b32.xlu1 %v5796_v30, %s5214_s12 }
0x10cb   :  { %3396 = vrot.lane.b32.xlu1 %v5817_v45, %s5214_s12 }
0x10cf   :  { %3394 = vrot.lane.b32.xlu1 %v2384_v28, %s5214_s12 }
0x111b   :  { %v2722_v46 = vpop.permute.xlu0 %2721 }
0x111c   :  { %4644 = vmatprep.subr.msk.mxu1 %vm455_vm1, %v2722_v46 }
0x111d   :  { %v2720_v47 = vpop.permute.xlu1 %2719  ;;  %4645 = vmatpush3.xpose.msk.msra.mxu1 %vm455_vm1, %v2722_v46 }
0x111e   :  { %4646 = vmatprep.subr.msk.mxu1 %vm455_vm1, %v2720_v47 }
0x111f   :  { %v2712_v48 = vpop.permute.xlu0 %2711 }
0x1120   :  { %4652 = vmatprep.mubr.msk.f32.mxu1 %vm455_vm1, %v2712_v48 }
0x1121   :  { %v2718_v49 = vpop.permute.xlu1 %2717  ;;  %4647 = vmatpush3.xpose.msk.msra.mxu1 %vm455_vm1, %v2720_v47 }
0x1122   :  { %4648 = vmatprep.subr.msk.mxu1 %vm455_vm1, %v2718_v49 }
0x1123   :  { %v3102_v37 = vpop.permute.xlu0 %3101 }
0x1125   :  { %v2716_v11 = vpop.permute.xlu1 %2715  ;;  %4649 = vmatpush3.xpose.msk.msra.mxu1 %vm455_vm1, %v2718_v49 }
0x1126   :  { %4650 = vmatprep.subr.msk.mxu1 %vm455_vm1, %v2716_v11 }
0x1127   :  { %v3098_v50 = vpop.permute.xlu0 %3097 }
0x1129   :  { %v2714_v57 = vpop.permute.xlu1 %2713  ;;  %4651 = vmatpush3.xpose.msk.msra.mxu1 %vm455_vm1, %v2716_v11 }
0x112a   :  { %4676 = vmatprep.subr.msk.mxu1 %vm455_vm1, %v3102_v37 }
0x112b   :  { %v3092_v4 = vpop.permute.xlu0 %3091 }
0x112c   :  { %4653 = vmatmul.mubr.msk.f32.vlgmr.msra.gmra.mxu1 %vm455_vm1, %v2714_v57 }
0x112d   :  { %v3100_v10 = vpop.permute.xlu1 %3099  ;;  %4677 = vmatpush3.xpose.msk.msra.mxu1 %vm455_vm1, %v3102_v37  ;;  %4684 = vmatprep.mubr.msk.f32.mxu1 %vm455_vm1, %v3092_v4 }
0x112e   :  { %4678 = vmatprep.subr.msk.mxu1 %vm455_vm1, %v3100_v10 }
0x112f   :  { %v3094_v51 = vpop.permute.xlu0 %3093 }
0x1131   :  { %v3096_v22 = vpop.permute.xlu1 %3095  ;;  %4679 = vmatpush3.xpose.msk.msra.mxu1 %vm455_vm1, %v3100_v10 }
0x1132   :  { %4680 = vmatprep.subr.msk.mxu1 %vm455_vm1, %v3098_v50 }
0x1133   :  { %v3399_v38 = vpop.permute.xlu0 %3398 }
0x1135   :  { %4681 = vmatpush3.xpose.msk.msra.mxu1 %vm455_vm1, %v3098_v50  ;;  %v3403_v52 = vpop.permute.xlu1 %3402 }
0x1136   :  { %4682 = vmatprep.subr.msk.mxu1 %vm455_vm1, %v3096_v22 }
0x1137   :  { %v3393_v26 = vpop.permute.xlu0 %3392 }
0x1139   :  { %4683 = vmatpush3.xpose.msk.msra.mxu1 %vm455_vm1, %v3096_v22  ;;  %v3401_v13 = vpop.permute.xlu1 %3400 }
0x113a   :  { %4703 = vmatprep.subr.msk.mxu1 %vm455_vm1, %v3403_v52 }
0x113c   :  { %4685 = vmatmul.mubr.msk.f32.vlgmr.msra.gmra.mxu1 %vm455_vm1, %v3094_v51 }
0x113d   :  { %4704 = vmatpush3.xpose.msk.msra.mxu1 %vm455_vm1, %v3403_v52  ;;  %4711 = vmatprep.mubr.msk.f32.mxu1 %vm455_vm1, %v3393_v26  ;;  %v3397_v12 = vpop.permute.xlu1 %3396 }
0x113e   :  { %4705 = vmatprep.subr.msk.mxu1 %vm455_vm1, %v3401_v13 }
0x1141   :  { %4706 = vmatpush3.xpose.msk.msra.mxu1 %vm455_vm1, %v3401_v13  ;;  %v3395_v36 = vpop.permute.xlu1 %3394 }
0x1142   :  { %4707 = vmatprep.subr.msk.mxu1 %vm455_vm1, %v3399_v38 }
0x1145   :  { %4708 = vmatpush3.xpose.msk.msra.mxu1 %vm455_vm1, %v3399_v38 }
0x1146   :  { %4709 = vmatprep.subr.msk.mxu1 %vm455_vm1, %v3397_v12 }
0x1149   :  { %4710 = vmatpush3.xpose.msk.msra.mxu1 %vm455_vm1, %v3397_v12 }
0x114c   :  { %4712 = vmatmul.mubr.msk.f32.vlgmr.msra.gmra.mxu1 %vm455_vm1, %v3395_v36 }
0x1179   :  { %v4632_v39 = vpop.f32.mrf.mxu1 }
0x117a   :  { %v2593_v40 = vmul.f32 0.35355338, %v4632_v39 }
0x117b   :  { %v2583_v53 = vpop.f32.mrf.mxu1 }
0x117c   :  { %v2592_v59 = vmul.f32 0.35355338, %v2583_v53  ;;  %v2595_v60 = vadd.f32 %v2593_v40, %v5880_v27 }
0x117e   :  { %v2599_v61 = vsel %vm261_vm0, %v2595_v60, -inf  ;;  %v2594_v62 = vadd.f32 %v2592_v59, %v5883_v58 }
0x117f   :  { %2600 = vmax.xlane.f32.xlu1 %v2599_v61 }
0x1180   :  { %v2596_v63 = vsel %vm261_vm0, %v2594_v62, -inf }
0x1181   :  { %2597 = vmax.xlane.f32.xlu0 %v2596_v63 }
0x1190   :  { %2622 = vrot.lane.b32.xlu1 %v5796_v30, %s5209_s25 }
0x1194   :  { %2620 = vrot.lane.b32.xlu1 %v5808_v44, %s5209_s25 }
0x1198   :  { %2618 = vrot.lane.b32.xlu1 %v5817_v45, %s5209_s25 }
0x119c   :  { %2840 = vrot.lane.b32.xlu1 %v5796_v30, %s5211_s8 }
0x11ec   :  { %v4654_v0 = vpop.f32.mrf.mxu1 }
0x11ed   :  { %v2811_v55 = vmul.f32 0.35355338, %v4654_v0 }
0x11ee   :  { %v2801_v54 = vpop.f32.mrf.mxu1 }
0x11ef   :  { %v2810_v1 = vmul.f32 0.35355338, %v2801_v54  ;;  %v2813_v20 = vadd.f32 %v2811_v55, %v5880_v27 }
0x11f1   :  { %v2812_v2 = vadd.f32 %v2810_v1, %v5883_v58  ;;  %v2817_v56 = vsel %vm261_vm0, %v2813_v20, -inf }
0x11f3   :  { %v2814_v5 = vsel %vm261_vm0, %v2812_v2, -inf }
0x11f4   :  { %2815 = vmax.xlane.f32.xlu0 %v2814_v5 }
0x11f8   :  { %2818 = vmax.xlane.f32.xlu0 %v2817_v56 }
0x11fc   :  { %v4686_v37 = vpop.f32.mrf.mxu1 }
0x11fd   :  { %v3191_v22 = vmul.f32 0.35355338, %v4686_v37 }
0x11fe   :  { %v3181_v50 = vpop.f32.mrf.mxu1 }
0x11ff   :  { %v3190_v10 = vmul.f32 0.35355338, %v3181_v50  ;;  %v3193_v26 = vadd.f32 %v3191_v22, %v5880_v27 }
0x1201   :  { %v3192_v38 = vadd.f32 %v3190_v10, %v5883_v58 }
0x1203   :  { %v3194_v36 = vsel %vm261_vm0, %v3192_v38, -inf }
0x1208   :  { %v2601_v16 = vpop.xlane.xlu1 %2600 }
0x1209   :  { %v2603_v3 = vsub.f32 %v2595_v60, %v2601_v16  ;;  %v3197_v60 = vsel %vm261_vm0, %v3193_v26, -inf }
0x120a   :  { %v2598_v7 = vpop.xlane.xlu0 %2597 }
0x120b   :  { %v2606_v6 = vmul.f32 1.442695, %v2603_v3  ;;  %v2602_v8 = vsub.f32 %v2594_v62, %v2598_v7 }
0x120c   :  { %v2623_v23 = vpop.permute.xlu1 %2622  ;;  %v4713_v57 = vpop.f32.mrf.mxu1 }
0x120d   :  { %4910 = vpow2.f32 %v2606_v6  ;;  %v2604_v15 = vmul.f32 1.442695, %v2602_v8  ;;  %v3492_v13 = vmul.f32 0.35355338, %v4713_v57 }
0x120e   :  { %2624 = vrot.lane.b32.xlu0 %v5794_v41, %s5209_s25  ;;  %v3482_v51 = vpop.f32.mrf.mxu1 }
0x120f   :  { %4912 = vpow2.f32 %v2604_v15  ;;  %v3491_v52 = vmul.f32 0.35355338, %v3482_v51  ;;  %v3494_v53 = vadd.f32 %v3492_v13, %v5880_v27 }
0x1210   :  { %v2621_v32 = vpop.permute.xlu1 %2620 }
0x1211   :  { %v3493_v12 = vadd.f32 %v3491_v52, %v5883_v58  ;;  %v3498_v58 = vsel %vm261_vm0, %v3494_v53, -inf }
0x1212   :  { %2842 = vrot.lane.b32.xlu0 %v5794_v41, %s5211_s8 }
0x1213   :  { %v3495_v59 = vsel %vm261_vm0, %v3493_v12, -inf }
0x1214   :  { %v2619_v35 = vpop.permute.xlu1 %2618 }
0x1218   :  { %v2841_v49 = vpop.permute.xlu1 %2840 }
0x121a   :  { %v4911_v9 = vpop.eup %4910 }
0x121b   :  { %v2611_v14 = vsel %vm261_vm0, %v4911_v9, 0.0 }
0x121c   :  { %2612 = vadd.xlane.f32.xlu1 %v2611_v14  ;;  %v4913_v17 = vpop.eup %4912 }
0x121d   :  { %v2608_v18 = vsel %vm261_vm0, %v4913_v17, 0.0 }
0x1231   :  { %2609 = vadd.xlane.f32.xlu0 %v2608_v18 }
0x127d   :  { %v2816_v19 = vpop.xlane.xlu0 %2815 }
0x127e   :  { %v2820_v21 = vsub.f32 %v2812_v2, %v2816_v19 }
0x1280   :  { %v2822_v24 = vmul.f32 1.442695, %v2820_v21 }
0x1281   :  { %v2819_v28 = vpop.xlane.xlu0 %2818 }
0x1282   :  { %4914 = vpow2.f32 %v2822_v24  ;;  %v2821_v29 = vsub.f32 %v2813_v20, %v2819_v28 }
0x1284   :  { %v2824_v31 = vmul.f32 1.442695, %v2821_v29 }
0x1285   :  { %v2625_v33 = vpop.permute.xlu0 %2624 }
0x1286   :  { %4916 = vpow2.f32 %v2824_v31  ;;  %4633 = vmatprep.subr.mxu0 %v2625_v33 }
0x1287   :  { %4634 = vmatpush3.msra.mxu0 %v2625_v33 }
0x1288   :  { %4635 = vmatprep.subr.mxu0 %v2623_v23 }
0x1289   :  { %4636 = vmatpush3.msra.mxu0 %v2623_v23  ;;  %v2843_v34 = vpop.permute.xlu0 %2842 }
0x128a   :  { %4637 = vmatprep.subr.mxu0 %v2621_v32 }
0x128b   :  { %4638 = vmatpush3.msra.mxu0 %v2621_v32 }
0x128c   :  { %4639 = vmatprep.subr.mxu0 %v2619_v35 }
0x128d   :  { %4640 = vmatpush3.msra.mxu0 %v2619_v35 }
0x128e   :  { %4655 = vmatprep.subr.mxu0 %v2843_v34 }
0x128f   :  { %v4915_v43 = vpop.eup %4914 }
0x1290   :  { %v2826_v46 = vsel %vm261_vm0, %v4915_v43, 0.0 }
0x1291   :  { %2827 = vadd.xlane.f32.xlu0 %v2826_v46 }
0x1293   :  { %v4917_v47 = vpop.eup %4916 }
0x1294   :  { %v2829_v48 = vsel %vm261_vm0, %v4917_v47, 0.0 }
0x1295   :  { %2830 = vadd.xlane.f32.xlu1 %v2829_v48 }
0x12a5   :  { %v2613_v11 = vpop.xlane.xlu1 %2612 }
0x12a6   :  { %2836 = vrot.lane.b32.xlu1 %v5817_v45, %s5211_s8  ;;  %4918 = vrcp.f32 %v2613_v11 }
0x12a7   :  { %2838 = vrot.lane.b32.xlu0 %v5808_v44, %s5211_s8 }
0x12b3   :  { %v4919_v39 = vpop.eup %4918 }
0x12b4   :  { %v2617_v62 = vmul.f32 %v4919_v39, %v4911_v9  ;;  %v2497_v39 = vld [vmem:[%s6062_s4 + $0x10] sm:$0xff] }
0x12ba   :  { %v2610_v4 = vpop.xlane.xlu0 %2609 }
0x12bb   :  { %4920 = vrcp.f32 %v2610_v4 }
0x12c6   :  { %3195 = vmax.xlane.f32.xlu0 %v3194_v36 }
0x12c8   :  { %v4921_v40 = vpop.eup %4920 }
0x12c9   :  { %v2616_v61 = vmul.f32 %v4921_v40, %v4913_v17  ;;  %v2498_v40 = vld [vmem:[%s6062_s4 + $0x18] sm:$0xff] }
0x12ca   :  { %3496 = vmax.xlane.f32.xlu0 %v3495_v59  ;;  %3198 = vmax.xlane.f32.xlu1 %v3197_v60 }
0x12cb   :  { %4641 = vmatprep.mubr.msk.f32.mxu0 %vm261_vm0, %v2616_v61 }
0x12cc   :  { %4642 = vmatmul.mubr.msk.f32.vlgmr.msra.gmra.mxu0 %vm261_vm0, %v2617_v62 }
0x12cd   :  { %4656 = vmatpush3.msra.mxu0 %v2843_v34  ;;  %v2496_v34 = vld [vmem:[%s6062_s4 + $0x8] sm:$0xff] }
0x12ce   :  { %4657 = vmatprep.subr.mxu0 %v2841_v49  ;;  %3499 = vmax.xlane.f32.xlu0 %v3498_v58 }
0x12cf   :  { %4658 = vmatpush3.msra.mxu0 %v2841_v49 }
0x12db   :  { %3220 = vrot.lane.b32.xlu1 %v5796_v30, %s5213_s24 }
0x12df   :  { %3523 = vrot.lane.b32.xlu1 %v5794_v41, %s5215_s6 }
0x12e3   :  { %3218 = vrot.lane.b32.xlu1 %v5808_v44, %s5213_s24 }
0x12e4   :  { %3222 = vrot.lane.b32.xlu0 %v5794_v41, %s5213_s24 }
0x12e7   :  { %3216 = vrot.lane.b32.xlu1 %v5817_v45, %s5213_s24 }
0x12e8   :  { %3521 = vrot.lane.b32.xlu0 %v5796_v30, %s5215_s6 }
0x131a   :  { %v2828_v27 = vpop.xlane.xlu0 %2827 }
0x131b   :  { %4922 = vrcp.f32 %v2828_v27 }
0x131e   :  { %v2831_v63 = vpop.xlane.xlu1 %2830  ;;  %v2839_v0 = vpop.permute.xlu0 %2838 }
0x131f   :  { %4924 = vrcp.f32 %v2831_v63  ;;  %4659 = vmatprep.subr.mxu0 %v2839_v0 }
0x1320   :  { %4660 = vmatpush3.msra.mxu0 %v2839_v0 }
0x1322   :  { %v2837_v54 = vpop.permute.xlu1 %2836 }
0x1323   :  { %4661 = vmatprep.subr.mxu0 %v2837_v54 }
0x1324   :  { %4662 = vmatpush3.msra.mxu0 %v2837_v54 }
0x1325   :  { %4666 = vmatprep.subr.mxu0 %v2496_v34 }
0x1328   :  { %v4923_v55 = vpop.eup %4922 }
0x1329   :  { %v2834_v1 = vmul.f32 %v4923_v55, %v4915_v43  ;;  %v2495_v43 = vld [vmem:[%s6062_s4] sm:$0xff] }
0x132b   :  { %4663 = vmatprep.mubr.msk.f32.mxu0 %vm261_vm0, %v2834_v1 }
0x132c   :  { %v4925_v41 = vpop.eup %4924 }
0x132d   :  { %v2835_v2 = vmul.f32 %v4925_v41, %v4917_v47 }
0x132f   :  { %4664 = vmatmul.mubr.msk.f32.vlgmr.msra.gmra.mxu0 %vm261_vm0, %v2835_v2 }
0x1330   :  { %4667 = vmatpush3.msra.mxu0 %v2496_v34  ;;  %v3856_v34 = vld [vmem:[%s6064_s30 + $0x70] sm:$0xff] }
0x1331   :  { %4671 = vmatprep.subr.mxu0 %v2495_v43 }
0x134f   :  { %v3196_v5 = vpop.xlane.xlu0 %3195 }
0x1350   :  { %v3200_v30 = vsub.f32 %v3192_v38, %v3196_v5  ;;  %v4191_v5 = vld [vmem:[#allocation14] ss:$0 sm:$0xff] }
0x1352   :  { %v3202_v20 = vmul.f32 1.442695, %v3200_v30 }
0x1353   :  { %v3199_v56 = vpop.xlane.xlu1 %3198  ;;  %v3497_v16 = vpop.xlane.xlu0 %3496 }
0x1354   :  { %4926 = vpow2.f32 %v3202_v20  ;;  %v3201_v3 = vsub.f32 %v3193_v26, %v3199_v56  ;;  %v3501_v6 = vsub.f32 %v3493_v12, %v3497_v16 }
0x1356   :  { %v3204_v7 = vmul.f32 1.442695, %v3201_v3  ;;  %v3503_v8 = vmul.f32 1.442695, %v3501_v6 }
0x1357   :  { %v3221_v9 = vpop.permute.xlu1 %3220  ;;  %v3500_v14 = vpop.xlane.xlu0 %3499 }
0x1358   :  { %4928 = vpow2.f32 %v3204_v7  ;;  %v3502_v15 = vsub.f32 %v3494_v53, %v3500_v14 }
0x1359   :  { %4930 = vpow2.f32 %v3503_v8 }
0x135a   :  { %v3505_v17 = vmul.f32 1.442695, %v3502_v15 }
0x135b   :  { %v3524_v18 = vpop.permute.xlu1 %3523  ;;  %v3223_v19 = vpop.permute.xlu0 %3222 }
0x135c   :  { %4932 = vpow2.f32 %v3505_v17  ;;  %4714 = vmatprep.subr.mxu1 %v3524_v18 }
0x135d   :  { %4715 = vmatpush3.msra.mxu1 %v3524_v18 }
0x135f   :  { %v3522_v21 = vpop.permute.xlu0 %3521  ;;  %v3219_v46 = vpop.permute.xlu1 %3218 }
0x1360   :  { %4716 = vmatprep.subr.mxu1 %v3522_v21 }
0x1361   :  { %v4927_v23 = vpop.eup %4926  ;;  %4717 = vmatpush3.msra.mxu1 %v3522_v21 }
0x1362   :  { %v3206_v24 = vsel %vm261_vm0, %v4927_v23, 0.0 }
0x1363   :  { %3207 = vadd.xlane.f32.xlu0 %v3206_v24  ;;  %v3217_v48 = vpop.permute.xlu1 %3216 }
0x1365   :  { %v4929_v28 = vpop.eup %4928 }
0x1366   :  { %v4931_v29 = vpop.eup %4930  ;;  %v3209_v31 = vsel %vm261_vm0, %v4929_v28, 0.0 }
0x1367   :  { %3210 = vadd.xlane.f32.xlu1 %v3209_v31  ;;  %v3507_v32 = vsel %vm261_vm0, %v4931_v29, 0.0  ;;  %v3750_v31 = vld [vmem:[%s6063_s7 + $0x10] sm:$0xff] }
0x1368   :  { %3508 = vadd.xlane.f32.xlu0 %v3507_v32  ;;  %v3749_v32 = vld [vmem:[%s6063_s7 + $0x8] sm:$0xff] }
0x1369   :  { %v4933_v33 = vpop.eup %4932 }
0x136a   :  { %v3510_v35 = vsel %vm261_vm0, %v4933_v33, 0.0 }
0x136b   :  { %3511 = vadd.xlane.f32.xlu1 %v3510_v35  ;;  %v3857_v35 = vld [vmem:[%s6064_s30 + $0x78] sm:$0xff] }
0x137c   :  { %3517 = vrot.lane.b32.xlu1 %v5817_v45, %s5215_s6 }
0x137e   :  { %3519 = vrot.lane.b32.xlu0 %v5808_v44, %s5215_s6 }
0x138c   :  { %v4643_v47 = vpop.f32.mrf.mxu0 }
0x138e   :  { %v2702_v37 = vpop.f32.mrf.mxu0 }
0x13ec   :  { %v3208_v49 = vpop.xlane.xlu0 %3207 }
0x13ed   :  { %4934 = vrcp.f32 %v3208_v49  ;;  %v3851_v49 = vld [vmem:[%s6064_s30 + $0x48] sm:$0xff] }
0x13ef   :  { %v4665_v11 = vpop.f32.mrf.mxu0 }
0x13f0   :  { %v3211_v50 = vpop.xlane.xlu1 %3210 }
0x13f1   :  { %4936 = vrcp.f32 %v3211_v50  ;;  %v3509_v57 = vpop.xlane.xlu0 %3508  ;;  %v2920_v4 = vpop.f32.mrf.mxu0  ;;  %v3848_v50 = vld [vmem:[%s6064_s30 + $0x30] sm:$0xff] }
0x13f2   :  { %4938 = vrcp.f32 %v3509_v57  ;;  %4668 = vmatprep.mubr.msk.f32.mxu0 %vm455_vm1, %v2920_v4  ;;  %v3847_v57 = vld [vmem:[%s6064_s30 + $0x28] sm:$0xff]  ;;  %v3846_v4 = vld [vmem:[%s6064_s30 + $0x20] sm:$0xff] }
0x13f3   :  { %4669 = vmatmul.mubr.msk.f32.vlgmr.msra.gmra.mxu0 %vm455_vm1, %v4665_v11  ;;  %v3849_v11 = vld [vmem:[%s6064_s30 + $0x38] sm:$0xff] }
0x13f4   :  { %4672 = vmatpush3.msra.mxu0 %v2495_v43  ;;  %4673 = vmatprep.mubr.msk.f32.mxu0 %vm455_vm1, %v2702_v37  ;;  %v3512_v44 = vpop.xlane.xlu1 %3511  ;;  %v3855_v43 = vld [vmem:[%s6064_s30 + $0x68] sm:$0xff]  ;;  %v3850_v37 = vld [vmem:[%s6064_s30 + $0x40] sm:$0xff] }
0x13f5   :  { %4940 = vrcp.f32 %v3512_v44  ;;  %4687 = vmatprep.subr.mxu0 %v3223_v19  ;;  %v3520_v45 = vpop.permute.xlu0 %3519 }
0x13f6   :  { %4718 = vmatprep.subr.mxu1 %v3520_v45 }
0x13f7   :  { %4719 = vmatpush3.msra.mxu1 %v3520_v45  ;;  %4674 = vmatmul.mubr.msk.f32.vlgmr.msra.gmra.mxu0 %vm455_vm1, %v4643_v47  ;;  %v3853_v47 = vld [vmem:[%s6064_s30 + $0x58] sm:$0xff] }
0x13f8   :  { %4688 = vmatpush3.msra.mxu0 %v3223_v19  ;;  %v3518_v10 = vpop.permute.xlu1 %3517 }
0x13f9   :  { %4689 = vmatprep.subr.mxu0 %v3221_v9  ;;  %4720 = vmatprep.subr.mxu1 %v3518_v10 }
0x13fa   :  { %v4935_v51 = vpop.eup %4934  ;;  %4690 = vmatpush3.msra.mxu0 %v3221_v9  ;;  %4721 = vmatpush3.msra.mxu1 %v3518_v10 }
0x13fb   :  { %4691 = vmatprep.subr.mxu0 %v3219_v46  ;;  %v3214_v22 = vmul.f32 %v4935_v51, %v4927_v23  ;;  %4725 = vmatprep.subr.mxu1 %v2498_v40 }
0x13fc   :  { %4692 = vmatpush3.msra.mxu0 %v3219_v46  ;;  %v3854_v46 = vld [vmem:[%s6064_s30 + $0x60] sm:$0xff] }
0x13fd   :  { %4693 = vmatprep.subr.mxu0 %v3217_v48  ;;  %4695 = vmatprep.mubr.msk.f32.mxu0 %vm261_vm0, %v3214_v22 }
0x13fe   :  { %v4937_v38 = vpop.eup %4936  ;;  %4694 = vmatpush3.msra.mxu0 %v3217_v48  ;;  %v3852_v48 = vld [vmem:[%s6064_s30 + $0x50] sm:$0xff] }
0x13ff   :  { %v4939_v52 = vpop.eup %4938  ;;  %v3215_v26 = vmul.f32 %v4937_v38, %v4929_v28  ;;  %4698 = vmatprep.subr.mxu0 %v2497_v39 }
0x1400   :  { %v3515_v13 = vmul.f32 %v4939_v52, %v4931_v29  ;;  %v3751_v29 = vld [vmem:[%s6063_s7 + $0x18] sm:$0xff] }
0x1401   :  { %4696 = vmatmul.mubr.msk.f32.vlgmr.msra.gmra.mxu0 %vm261_vm0, %v3215_v26  ;;  %v4192_v26 = vld [vmem:[%s6065_s10] ss:$0 sm:$0xff] }
0x1402   :  { %v4941_v12 = vpop.eup %4940  ;;  %4722 = vmatprep.mubr.msk.f32.mxu1 %vm261_vm0, %v3515_v13  ;;  %4699 = vmatpush3.msra.mxu0 %v2497_v39 }
0x1403   :  { %v3516_v36 = vmul.f32 %v4941_v12, %v4933_v33  ;;  %v3748_v33 = vld [vmem:[%s6063_s7] sm:$0xff]  ;;  %4741 = vmatprep.subr.mxu0 %v3857_v35 }
0x1404   :  { %v4193_v12 = vld [vmem:[%s6066_s11] ss:$0 sm:$0xff] }
0x1405   :  { %4723 = vmatmul.mubr.msk.f32.vlgmr.msra.gmra.mxu1 %vm261_vm0, %v3516_v36 }
0x1406   :  { %4726 = vmatpush3.msra.mxu1 %v2498_v40 }
0x1407   :  { %4730 = vmatprep.subr.mxu1 %v3751_v29 }
0x14b3   :  { %v4670_v53 = vpop.f32.mrf.mxu0 }
0x14b5   :  { %v3001_v59 = vpop.f32.mrf.mxu0 }
0x14b7   :  { %v4675_v60 = vpop.f32.mrf.mxu0 }
0x14b8   :  { %v3088_v61 = vadd.f32 %v4675_v60, %v4670_v53 }
0x14b9   :  { %v3082_v62 = vpop.f32.mrf.mxu0 }
0x14ba   :  { %v3083_v58 = vadd.f32 %v3082_v62, %v3001_v59  ;;  %v3844_v62 = vld [vmem:[%s6064_s30 + $0x10] sm:$0xff] }
0x14c1   :  { %v4697_v27 = vpop.f32.mrf.mxu0 }
0x14c3   :  { %v3300_v63 = vpop.f32.mrf.mxu0 }
0x14c4   :  { %4700 = vmatprep.mubr.msk.f32.mxu0 %vm455_vm1, %v3300_v63  ;;  %v4194_v63 = vld [vmem:[%s6067_s15] ss:$0 sm:$0xff] }
0x14c5   :  { %4701 = vmatmul.mubr.msk.f32.vlgmr.msra.gmra.mxu0 %vm455_vm1, %v4697_v27  ;;  %v4724_v0 = vpop.f32.mrf.mxu1  ;;  %v3842_v27 = vld [vmem:[%s6064_s30] sm:$0xff] }
0x14c6   :  { %4742 = vmatpush3.msra.mxu0 %v3857_v35 }
0x14c7   :  { %v3601_v54 = vpop.f32.mrf.mxu1  ;;  %4743 = vmatprep.subr.mxu0 %v3856_v34 }
0x14c8   :  { %4727 = vmatprep.mubr.msk.f32.mxu1 %vm455_vm1, %v3601_v54  ;;  %4744 = vmatpush3.msra.mxu0 %v3856_v34 }
0x14c9   :  { %4728 = vmatmul.mubr.msk.f32.vlgmr.msra.gmra.mxu1 %vm455_vm1, %v4724_v0  ;;  %4745 = vmatprep.subr.mxu0 %v3855_v43 }
0x14ca   :  { %4731 = vmatpush3.msra.mxu1 %v3751_v29  ;;  %4746 = vmatpush3.msra.mxu0 %v3855_v43 }
0x14cb   :  { %4732 = vmatprep.subr.mxu1 %v3750_v31  ;;  %4747 = vmatprep.subr.mxu0 %v3854_v46 }
0x14cc   :  { %4733 = vmatpush3.msra.mxu1 %v3750_v31  ;;  %4748 = vmatpush3.msra.mxu0 %v3854_v46 }
0x14cd   :  { %4734 = vmatprep.subr.mxu1 %v3749_v32  ;;  %4749 = vmatprep.subr.mxu0 %v3853_v47 }
0x14ce   :  { %4735 = vmatpush3.msra.mxu1 %v3749_v32  ;;  %4750 = vmatpush3.msra.mxu0 %v3853_v47 }
0x14cf   :  { %4736 = vmatprep.subr.mxu1 %v3748_v33  ;;  %4751 = vmatprep.subr.mxu0 %v3852_v48 }
0x14d0   :  { %4737 = vmatpush3.msra.mxu1 %v3748_v33  ;;  %4752 = vmatpush3.msra.mxu0 %v3852_v48 }
0x14d1   :  { %4753 = vmatprep.subr.mxu0 %v3851_v49 }
0x14d2   :  { %4754 = vmatpush3.msra.mxu0 %v3851_v49 }
0x14d3   :  { %4755 = vmatprep.subr.mxu0 %v3850_v37 }
0x14d4   :  { %4756 = vmatpush3.msra.mxu0 %v3850_v37 }
0x14d5   :  { %4757 = vmatprep.subr.mxu0 %v3849_v11 }
0x14d6   :  { %4758 = vmatpush3.msra.mxu0 %v3849_v11 }
0x14d7   :  { %4759 = vmatprep.subr.mxu0 %v3848_v50 }
0x14d8   :  { %4760 = vmatpush3.msra.mxu0 %v3848_v50 }
0x14d9   :  { %4761 = vmatprep.subr.mxu0 %v3847_v57 }
0x14da   :  { %4762 = vmatpush3.msra.mxu0 %v3847_v57 }
0x14db   :  { %4763 = vmatprep.subr.mxu0 %v3846_v4 }
0x14dc   :  { %4764 = vmatpush3.msra.mxu0 %v3846_v4 }
0x1585   :  { %v4702_v55 = vpop.f32.mrf.mxu0 }
0x1586   :  { %v3391_v41 = vadd.f32 %v4702_v55, %v3088_v61  ;;  %v3845_v61 = vld [vmem:[%s6064_s30 + $0x18] sm:$0xff] }
0x1587   :  { %v3381_v1 = vpop.f32.mrf.mxu0  ;;  %4765 = vmatprep.subr.mxu0 %v3845_v61 }
0x1588   :  { %v3390_v30 = vadd.f32 %v3381_v1, %v3083_v58  ;;  %4766 = vmatpush3.msra.mxu0 %v3845_v61  ;;  %v3843_v58 = vld [vmem:[%s6064_s30 + $0x8] sm:$0xff] }
0x1589   :  { %v4729_v2 = vpop.f32.mrf.mxu1  ;;  %4767 = vmatprep.subr.mxu0 %v3844_v62 }
0x158a   :  { %v3692_v20 = vadd.f32 %v4729_v2, %v3391_v41  ;;  %4768 = vmatpush3.msra.mxu0 %v3844_v62 }
0x158b   :  { %v3682_v56 = vpop.f32.mrf.mxu1  ;;  %4769 = vmatprep.subr.mxu0 %v3843_v58 }
0x158c   :  { %v3701_v16 = vadd.f32 %v4191_v5, %v3692_v20  ;;  %v3691_v3 = vadd.f32 %v3682_v56, %v3390_v30  ;;  %4770 = vmatpush3.msra.mxu0 %v3843_v58 }
0x158d   :  { %4771 = vmatprep.subr.mxu0 %v3842_v27 }
0x158e   :  { %v3700_v6 = vadd.f32 %v4191_v5, %v3691_v3  ;;  %v3703_v7 = vadd.f32 %v5775_v25, %v3701_v16  ;;  %4772 = vmatpush3.msra.mxu0 %v3842_v27  ;;  %v4197_v5 = vld [vmem:[%s6068_s16] ss:$0 sm:$0xff] }
0x1590   :  { %v3707_v8 = vsel %vm261_vm0, %v3703_v7, 0.0  ;;  %v3702_v9 = vadd.f32 %v5731_v42, %v3700_v6 }
0x1591   :  { %3708 = vadd.xlane.f32.xlu1 %v3707_v8 }
0x1592   :  { %v3704_v14 = vsel %vm261_vm0, %v3702_v9, 0.0 }
0x1593   :  { %3705 = vadd.xlane.f32.xlu0 %v3704_v14 }
0x161a   :  { %v3709_v15 = vpop.xlane.xlu1 %3708 }
0x161b   :  { %v3711_v17 = vmul.f32 0.03125, %v3709_v15 }
0x161c   :  { %v3706_v18 = vpop.xlane.xlu0 %3705 }
0x161d   :  { %v3710_v19 = vmul.f32 0.03125, %v3706_v18  ;;  %v5965_v21 = vsub.f32 %v3703_v7, %v3711_v17 }
0x161f   :  { %v5967_v23 = vsub.f32 %v3702_v9, %v3710_v19  ;;  %v3715_v24 = vmul.f32 %v5965_v21, %v5965_v21 }
0x1621   :  { %v3714_v25 = vmul.f32 %v5967_v23, %v5967_v23  ;;  %v3719_v28 = vsel %vm261_vm0, %v3715_v24, 0.0 }
0x1623   :  { %v3716_v42 = vsel %vm261_vm0, %v3714_v25, 0.0 }
0x1624   :  { %3717 = vadd.xlane.f32.xlu0 %v3716_v42 }
0x1628   :  { %3720 = vadd.xlane.f32.xlu0 %v3719_v28 }
0x16ad   :  { %v3718_v44 = vpop.xlane.xlu0 %3717 }
0x16ae   :  { %v3722_v45 = vmul.f32 0.03125, %v3718_v44 }
0x16b0   :  { %v3724_v10 = vadd.f32 1e-05, %v3722_v45 }
0x16b1   :  { %v3721_v51 = vpop.xlane.xlu0 %3720 }
0x16b2   :  { %4942 = vrsqrt.f32 %v3724_v10  ;;  %v3723_v22 = vmul.f32 0.03125, %v3721_v51 }
0x16b4   :  { %v3725_v38 = vadd.f32 1e-05, %v3723_v22 }
0x16b6   :  { %4944 = vrsqrt.f32 %v3725_v38 }
0x16bf   :  { %v4943_v52 = vpop.eup %4942 }
0x16c0   :  { %v3728_v13 = vmul.f32 %v4943_v52, %v5967_v23 }
0x16c2   :  { %v3737_v36 = vmul.f32 %v4192_v26, %v3728_v13 }
0x16c3   :  { %v4945_v39 = vpop.eup %4944 }
0x16c4   :  { %v3729_v40 = vmul.f32 %v4945_v39, %v5965_v21  ;;  %v3746_v53 = vadd.f32 %v4193_v12, %v3737_v36 }
0x16c6   :  { %v3738_v59 = vmul.f32 %v4192_v26, %v3729_v40  ;;  %4738 = vmatprep.mubr.msk.f32.mxu1 %vm261_vm0, %v3746_v53 }
0x16c8   :  { %v3747_v60 = vadd.f32 %v4193_v12, %v3738_v59 }
0x16ca   :  { %4739 = vmatmul.mubr.msk.f32.vlgmr.msra.gmra.mxu1 %vm261_vm0, %v3747_v60 }
0x178a   :  { %v4740_v0 = vpop.f32.mrf.mxu1 }
0x178b   :  { %v3837_v54 = vadd.f32 %v4740_v0, %v4194_v63 }
0x178c   :  { %v3831_v55 = vpop.f32.mrf.mxu1 }
0x178d   :  { %v3832_v1 = vadd.f32 %v4194_v63, %v3831_v55  ;;  %v3841_v2 = vmax.f32 %v3837_v54, 0.0 }
0x178f   :  { %v3840_v41 = vmax.f32 %v3832_v1, 0.0 }
0x1791   :  { %4773 = vmatprep.mubr.f32.mxu0 %v3840_v41 }
0x1792   :  { %4774 = vmatmul.mubr.f32.vlgmr.msra.gmra.mxu0 %v3841_v2 }
0x1852   :  { %v4775_v30 = vpop.f32.mrf.mxu0 }
0x1853   :  { %v3937_v20 = vadd.f32 %v4775_v30, %v4197_v5 }
0x1854   :  { %v3931_v56 = vpop.f32.mrf.mxu0 }
0x1855   :  { %v3941_v16 = vadd.f32 %v3937_v20, %v3747_v60  ;;  %v3932_v3 = vadd.f32 %v4197_v5, %v3931_v56 }
0x1857   :  { %v3940_v6 = vadd.f32 %v3932_v3, %v3746_v53  ;;  %v3945_v7 = vsel %vm261_vm0, %v3941_v16, 0.0 }
0x1858   :  { %3946 = vadd.xlane.f32.xlu1 %v3945_v7 }
0x1859   :  { %v3942_v8 = vsel %vm261_vm0, %v3940_v6, 0.0 }
0x185a   :  { %3943 = vadd.xlane.f32.xlu0 %v3942_v8 }
0x18e1   :  { %v3947_v9 = vpop.xlane.xlu1 %3946 }
0x18e2   :  { %v3949_v14 = vmul.f32 0.03125, %v3947_v9 }
0x18e3   :  { %v3944_v15 = vpop.xlane.xlu0 %3943 }
0x18e4   :  { %v3951_v17 = vsub.f32 %v3941_v16, %v3949_v14  ;;  %v3948_v18 = vmul.f32 0.03125, %v3944_v15 }
0x18e6   :  { %v3950_v19 = vsub.f32 %v3940_v6, %v3948_v18  ;;  %v3953_v21 = vmul.f32 %v3951_v17, %v3951_v17 }
0x18e8   :  { %v3957_v23 = vsel %vm261_vm0, %v3953_v21, 0.0  ;;  %v3952_v25 = vmul.f32 %v3950_v19, %v3950_v19 }
0x18e9   :  { %3958 = vadd.xlane.f32.xlu1 %v3957_v23 }
0x18ea   :  { %v3954_v42 = vsel %vm261_vm0, %v3952_v25, 0.0 }
0x18eb   :  { %3955 = vadd.xlane.f32.xlu0 %v3954_v42 }
0x18ec   :  { %5123 = shalt.err (!%p5120_p2)
}
0x18ed   :  { %s5217_s5 = smov 128   ;;  %s5218_s25 = smov 8   ;;  %v4198_v34 = vld [vmem:[%s5388_s17] ss:$0 sm:$0xff] }
0x18ee   :  { %4007 = dma.vmem_to_hbm [thread:$0]  %s4002_s20, 512, %s5398_s27, [#allocation4], %s5217_s5, %s5217_s5, %s5218_s25  }
0x18ef   :  { %s6069_s29 = sld [smem:[#allocation26_spill]]  ;;  %v4199_v47 = vld [vmem:[%s5393_s21] ss:$0 sm:$0xff]  ;;  %s5219_s27 = smov [#allocation17]  }
0x18f0   :  { %s4013_s3 = sshll.u32 %s5219_s27, 4  ;;  %s4014_s3 = int_to_ptr.vmem [resolvable:$true] %s4013_s3 }
0x18f1   :  { %s5132_s17 = scalar_lea.vmem %s4014_s3, 256  ;;  %p5137_p4 = scmp.lt.s32.totalorder %s4014_s3, %s4014_s3 }
0x18f2   :  { %p5133_p3 = scmp.ne.s32.totalorder %s4014_s3, %s5132_s17  ;;  %p5138_p5 = scmp.lt.s32.totalorder %s5132_s17, %s5132_s17 }
0x18f4   :  { %p5139_p6 = por %p5138_p5, %p5137_p4 }
0x18f5   :  { %v3987_v37 = vld [vmem:[%s6069_s29 + $0x8] sm:$0xff]  ;;  %v3986_v57 = vld [vmem:[%s6069_s29] sm:$0xff] }
0x18f6   :  { %p5140_p7 = pnand %p5139_p6, %p5133_p3 }
0x1972   :  { %v3959_v24 = vpop.xlane.xlu1 %3958 }
0x1973   :  { %v3961_v28 = vmul.f32 0.03125, %v3959_v24 }
0x1974   :  { %v3956_v29 = vpop.xlane.xlu0 %3955 }
0x1975   :  { %v3963_v31 = vadd.f32 1e-05, %v3961_v28  ;;  %v3960_v32 = vmul.f32 0.03125, %v3956_v29 }
0x1977   :  { %4946 = vrsqrt.f32 %v3963_v31  ;;  %v3962_v33 = vadd.f32 1e-05, %v3960_v32 }
0x1979   :  { %4948 = vrsqrt.f32 %v3962_v33 }
0x1984   :  { %v4947_v35 = vpop.eup %4946 }
0x1985   :  { %v3967_v43 = vmul.f32 %v4947_v35, %v3951_v17 }
0x1986   :  { %v4949_v46 = vpop.eup %4948 }
0x1987   :  { %v3976_v48 = vmul.f32 %v4198_v34, %v3967_v43  ;;  %v3966_v49 = vmul.f32 %v4949_v46, %v3950_v19 }
0x1989   :  { %v3975_v11 = vmul.f32 %v4198_v34, %v3966_v49  ;;  %v3985_v50 = vadd.f32 %v4199_v47, %v3976_v48 }
0x198b   :  { %v3984_v4 = vadd.f32 %v4199_v47, %v3975_v11  ;;  %v3989_v44 = vadd.f32 %v3987_v37, %v3985_v50 }
0x198d   :  { %v3988_v45 = vadd.f32 %v3986_v57, %v3984_v4  ;;  %3995 = vst.msk [vmem:[#allocation17 + $0x8] sm:$0xff] %vm261_vm0, %v3989_v44 }
0x198f   :  { %3994 = vst.msk [vmem:[#allocation17] sm:$0xff] %vm261_vm0, %v3988_v45 }
0x1990   :  { %5143 = shalt.err (!%p5140_p7)
}
0x1991   :  { %4019 = dma.vmem_to_hbm [thread:$0]  %s4014_s3, 256, %s5403_s19, [#allocation18], %s5217_s5, %s5217_s5, %s5218_s25  }
0x1992   :  { %5162 = dma.done.wait [#allocation4], 512  }
0x1993   :  { %5163 = vsyncadd [#allocation4], 4294966784 }
0x1994   :  { %5164 = dma.done.wait [#allocation18], 256  }
0x1995   :  { %5165 = vsyncadd [#allocation18], 4294967040 }
0x1996   :  { %4026 = vsyncpa [#allocation3], 1 }
0x1997   :  { %4027 = vsyncpa [#allocation6], 1 }
0x1998   :  { %4028 = vsyncpa [#allocation9], 1 }
0x1999   :  { %4029 = vsyncpa [#allocation12], 1 }
0x199a   :  { %4030 = vsyncpa [#allocation15], 1 }
0x199b   :  { %4031 = vsyncpa [#allocation4], 1 }
0x199c   :  { %4032 = vsyncpa [#allocation18], 1 }

</bundles_post_ra>
